<compile_context>
chip_gen: v5e
topology: v5e:2x2
jax: 0.10.0
libtpu: 0.0.40
codegen_flags: <defaults>
</compile_context>

<pallas_src>
import functools

import jax
import jax.numpy as jnp
from jax.experimental import pallas as pl
from jax.experimental.pallas import tpu as pltpu

LANE = 128
TILE_M = 512  # row tile for the flattened (N*H*W, C) kernels


def _round_up(x, m):
    return ((x + m - 1) // m) * m


def _row_grid(m):
    tile = TILE_M if m > TILE_M else _round_up(m, 8)
    return tile, _round_up(m, tile)


def _pad_axis(a, axis, target):
    d = target - a.shape[axis]
    if d <= 0:
        return a
    widths = [(0, 0)] * a.ndim
    widths[axis] = (0, d)
    return jnp.pad(a, widths)


# ----------------------------- Pallas kernels -----------------------------

def _matmul_bias_relu_kernel(x_ref, w_ref, b_ref, o_ref):
    """relu(x @ w + b) — stem conv (im2col patches) with folded BN0."""
    acc = jnp.dot(x_ref[...].astype(jnp.bfloat16), w_ref[...],
                  preferred_element_type=jnp.float32)
    o_ref[...] = jnp.maximum(acc + b_ref[...], 0.0)


def _maxpool_kernel(ee_ref, eo_ref, oe_ref, oo_ref, o_ref, *, ho, wo):
    """3x3/s2/p1 max pool from the four parity-split slabs of the padded input."""
    ee = ee_ref[0]
    eo = eo_ref[0]
    oe = oe_ref[0]
    oo = oo_ref[0]
    m = ee[0:ho, 0:wo]
    m = jnp.maximum(m, ee[0:ho, 1:wo + 1])
    m = jnp.maximum(m, ee[1:ho + 1, 0:wo])
    m = jnp.maximum(m, ee[1:ho + 1, 1:wo + 1])
    m = jnp.maximum(m, eo[0:ho, 0:wo])
    m = jnp.maximum(m, eo[1:ho + 1, 0:wo])
    m = jnp.maximum(m, oe[0:ho, 0:wo])
    m = jnp.maximum(m, oe[0:ho, 1:wo + 1])
    m = jnp.maximum(m, oo[0:ho, 0:wo])
    o_ref[0] = m


def _dense_layer_kernel(x_ref, s1_ref, b1_ref, w1_ref, b2_ref, w2_ref, m_ref,
                        o_ref, pad_ref, *, h, w, pt):
    """One fused DenseLayer on one image.

    bottleneck: relu( relu(x*s1+b1) @ W1' + b2 )      (BN2 scale folded into W1')
    then 3x3/s1/p1 conv of the bottleneck activation expressed as 9 shifted
    matmuls on a flattened, zero row-padded VMEM staging buffer. Horizontal
    (column) halo taps are zeroed via precomputed masks, so the intermediate
    never round-trips through HBM and no spatially-padded copy is built in XLA.
    """
    L = h * w
    growth = o_ref.shape[2]

    # ---- bottleneck (BN1 + ReLU + 1x1 conv + BN2 + ReLU), all in VMEM ----
    a = jnp.maximum(x_ref[0] * s1_ref[...] + b1_ref[...], 0.0)
    hb = jnp.dot(a.astype(jnp.bfloat16), w1_ref[...],
                 preferred_element_type=jnp.float32) + b2_ref[...]
    hb = jnp.maximum(hb, 0.0).astype(jnp.bfloat16)            # (L, gbp)

    # ---- stage into zero row-padded flat buffer (top/bottom pads of pt rows) ----
    pad_ref[...] = jnp.zeros_like(pad_ref)
    pad_ref[pt:pt + L, :] = hb
    X = pad_ref[...]

    # ---- 3x3 conv as 9 shifted matmuls; column edges masked ----
    ml = m_ref[0]      # (L, 1): 1.0 where x >= 1     (valid for kx == 0 taps)
    mr = m_ref[1]      # (L, 1): 1.0 where x <= w - 2 (valid for kx == 2 taps)
    acc = jnp.zeros((L, growth), jnp.float32)
    for ky in range(3):
        for kx in range(3):
            st = pt + (ky - 1) * w + (kx - 1)                 # static offset
            p = jnp.dot(X[st:st + L, :], w2_ref[ky * 3 + kx],
                        preferred_element_type=jnp.float32)
            if kx == 0:
                p = p * ml
            elif kx == 2:
                p = p * mr
            acc = acc + p
    o_ref[0] = acc


def _transition_kernel(ee_ref, eo_ref, oe_ref, oo_ref, s_ref, b_ref, w_ref, o_ref):
    """BN + ReLU + 2x2 avg pool + 1x1 conv fused (pool commuted before the conv)."""
    s = s_ref[...]
    b = b_ref[...]

    def act(r):
        return jnp.maximum(r[...] * s + b, 0.0)

    pooled = 0.25 * (act(ee_ref) + act(eo_ref) + act(oe_ref) + act(oo_ref))
    o_ref[...] = jnp.dot(pooled.astype(jnp.bfloat16), w_ref[...],
                         preferred_element_type=jnp.float32)


def _gap_fc_kernel(x_ref, w_ref, b_ref, o_ref):
    """global average pool + classifier (norm5 folded into w/b)."""
    pooled = jnp.mean(x_ref[...], axis=1)             # (N, Cpad) f32
    o_ref[...] = jnp.dot(pooled.astype(jnp.bfloat16), w_ref[...],
                         preferred_element_type=jnp.float32) + b_ref[...]


# ----------------------------- Pallas wrappers -----------------------------

def pallas_matmul_bias_relu(x, w, b):
    m0, k = x.shape
    nout = w.shape[1]
    tile, mp = _row_grid(m0)
    if mp != m0:
        x = jnp.pad(x, ((0, mp - m0), (0, 0)))
    out = pl.pallas_call(
        _matmul_bias_relu_kernel,
        out_shape=jax.ShapeDtypeStruct((mp, nout), jnp.float32),
        grid=(mp // tile,),
        in_specs=[
            pl.BlockSpec((tile, k), lambda i: (i, 0)),
            pl.BlockSpec((k, nout), lambda i: (0, 0)),
            pl.BlockSpec((1, nout), lambda i: (0, 0)),
        ],
        out_specs=pl.BlockSpec((tile, nout), lambda i: (i, 0)),
        compiler_params=pltpu.CompilerParams(dimension_semantics=("parallel",)),
    )(x, w, b.reshape(1, nout))
    return out[:m0]


def pallas_maxpool_3x3_s2(x):
    """x: (N, H, W, C) post-ReLU (>=0), H and W even. Zero spatial pad == -inf pad."""
    n, h, w, c = x.shape
    assert h % 2 == 0 and w % 2 == 0
    ho, wo = h // 2, w // 2
    xp = jnp.pad(x, ((0, 0), (1, 1), (1, 1), (0, 0)))
    ee = xp[:, 0::2, 0::2, :]
    eo = xp[:, 0::2, 1::2, :]
    oe = xp[:, 1::2, 0::2, :]
    oo = xp[:, 1::2, 1::2, :]
    return pl.pallas_call(
        functools.partial(_maxpool_kernel, ho=ho, wo=wo),
        out_shape=jax.ShapeDtypeStruct((n, ho, wo, c), jnp.float32),
        grid=(n,),
        in_specs=[pl.BlockSpec((1, ho + 1, wo + 1, c), lambda i: (i, 0, 0, 0))] * 4,
        out_specs=pl.BlockSpec((1, ho, wo, c), lambda i: (i, 0, 0, 0)),
        compiler_params=pltpu.CompilerParams(dimension_semantics=("parallel",)),
    )(ee, eo, oe, oo)


def pallas_dense_layer(feats_flat, s1, b1, w1, b2, w2_taps, masks, h, w):
    """feats_flat: (n, h*w, cpad) f32 -> new features (n, h*w, growth) f32."""
    n, L, cpad = feats_flat.shape
    gbp = w1.shape[1]
    growth = w2_taps.shape[2]
    pt = _round_up(w + 1, 8)          # zero pad rows on each side of the flat buffer
    return pl.pallas_call(
        functools.partial(_dense_layer_kernel, h=h, w=w, pt=pt),
        out_shape=jax.ShapeDtypeStruct((n, L, growth), jnp.float32),
        grid=(n,),
        in_specs=[
            pl.BlockSpec((1, L, cpad), lambda i: (i, 0, 0)),
            pl.BlockSpec((1, cpad), lambda i: (0, 0)),
            pl.BlockSpec((1, cpad), lambda i: (0, 0)),
            pl.BlockSpec((cpad, gbp), lambda i: (0, 0)),
            pl.BlockSpec((1, gbp), lambda i: (0, 0)),
            pl.BlockSpec((9, gbp, growth), lambda i: (0, 0, 0)),
            pl.BlockSpec((2, L, 1), lambda i: (0, 0, 0)),
        ],
        out_specs=pl.BlockSpec((1, L, growth), lambda i: (i, 0, 0)),
        scratch_shapes=[pltpu.VMEM((pt + L + pt, gbp), jnp.bfloat16)],
        compiler_params=pltpu.CompilerParams(dimension_semantics=("parallel",)),
    )(feats_flat, s1.reshape(1, cpad), b1.reshape(1, cpad), w1,
      b2.reshape(1, gbp), w2_taps, masks)


def pallas_transition(x, s, b, w):
    """x: (N, H, W, Cin_pad) with H, W even -> (N, H//2, W//2, Cout_pad)."""
    n, h, wd, c = x.shape
    assert h % 2 == 0 and wd % 2 == 0
    ho, wo = h // 2, wd // 2
    cout = w.shape[1]
    ee = x[:, 0::2, 0::2, :].reshape(-1, c)
    eo = x[:, 0::2, 1::2, :].reshape(-1, c)
    oe = x[:, 1::2, 0::2, :].reshape(-1, c)
    oo = x[:, 1::2, 1::2, :].reshape(-1, c)
    m0 = n * ho * wo
    tile, mp = _row_grid(m0)
    if mp != m0:
        pad = ((0, mp - m0), (0, 0))
        ee, eo, oe, oo = (jnp.pad(a, pad) for a in (ee, eo, oe, oo))
    out = pl.pallas_call(
        _transition_kernel,
        out_shape=jax.ShapeDtypeStruct((mp, cout), jnp.float32),
        grid=(mp // tile,),
        in_specs=[pl.BlockSpec((tile, c), lambda i: (i, 0))] * 4
        + [
            pl.BlockSpec((1, c), lambda i: (0, 0)),
            pl.BlockSpec((1, c), lambda i: (0, 0)),
            pl.BlockSpec((c, cout), lambda i: (0, 0)),
        ],
        out_specs=pl.BlockSpec((tile, cout), lambda i: (i, 0)),
        compiler_params=pltpu.CompilerParams(dimension_semantics=("parallel",)),
    )(ee, eo, oe, oo, s.reshape(1, c), b.reshape(1, c), w)
    return out[:m0].reshape(n, ho, wo, cout)


def pallas_gap_fc(x, w, b):
    n, hw, c = x.shape
    ncls = w.shape[1]
    return pl.pallas_call(
        _gap_fc_kernel,
        out_shape=jax.ShapeDtypeStruct((n, ncls), jnp.float32),
        grid=(1,),
        in_specs=[
            pl.BlockSpec((n, hw, c), lambda i: (0, 0, 0)),
            pl.BlockSpec((c, ncls), lambda i: (0, 0)),
            pl.BlockSpec((1, ncls), lambda i: (0, 0)),
        ],
        out_specs=pl.BlockSpec((n, ncls), lambda i: (0, 0)),
    )(x, w, b.reshape(1, ncls))


# ----------------------------- layer glue (plain JAX) -----------------------------

def _im2col(x, k, stride, pad):
    n, h, w, c = x.shape
    xp = jnp.pad(x, ((0, 0), (pad, pad), (pad, pad), (0, 0)))
    ho = (h + 2 * pad - k) // stride + 1
    wo = (w + 2 * pad - k) // stride + 1
    cols = []
    for ky in range(k):
        for kx in range(k):
            cols.append(xp[:, ky:ky + stride * (ho - 1) + 1:stride,
                           kx:kx + stride * (wo - 1) + 1:stride, :])
    return jnp.concatenate(cols, axis=-1).reshape(n * ho * wo, k * k * c), ho, wo


def _column_masks(h, w):
    """(2, h*w, 1) float masks for the kx=0 (left) and kx=2 (right) conv taps."""
    col = jnp.arange(h * w, dtype=jnp.int32) % w
    ml = (col >= 1).astype(jnp.float32).reshape(h * w, 1)
    mr = (col <= w - 2).astype(jnp.float32).reshape(h * w, 1)
    return jnp.stack([ml, mr], axis=0)


# ----------------------------- parameter init -----------------------------

def init_params(key, block_cfg, growth_rate, bottleneck_size, num_classes):
    keys = iter(jax.random.split(key, 1024))

    def nk():
        return next(keys)

    def conv_w(kh, kw, cin, cout):
        std = (2.0 / (kh * kw * cin)) ** 0.5
        return std * jax.random.normal(nk(), (kh, kw, cin, cout), jnp.float32)

    def bn(c):
        gamma = jax.random.uniform(nk(), (c,), jnp.float32, 0.5, 1.5)
        beta = 0.1 * jax.random.normal(nk(), (c,), jnp.float32)
        mean = 0.1 * jax.random.normal(nk(), (c,), jnp.float32)
        var = jax.random.uniform(nk(), (c,), jnp.float32, 0.5, 1.5)
        eps = 1e-5
        scale = gamma / jnp.sqrt(var + eps)
        bias = beta - mean * scale
        return scale, bias

    params = {}
    feat = growth_rate * 2
    params["conv0_w"] = conv_w(7, 7, 3, feat)
    params["bn0"] = bn(feat)
    params["blocks"] = []
    params["transitions"] = []
    for i, num_layer in enumerate(block_cfg):
        layers = []
        for l in range(num_layer):
            cin = feat + l * growth_rate
            gb = growth_rate * bottleneck_size
            layers.append(dict(
                bn1=bn(cin),
                conv1_w=conv_w(1, 1, cin, gb)[0, 0],          # (cin, gb)
                bn2=bn(gb),
                conv2_w=conv_w(3, 3, gb, growth_rate),        # (3, 3, gb, growth)
            ))
        params["blocks"].append(layers)
        feat = feat + growth_rate * num_layer
        if i + 1 != len(block_cfg):
            params["transitions"].append(dict(
                bn=bn(feat),
                conv_w=conv_w(1, 1, feat, feat // 2)[0, 0],   # (feat, feat//2)
            ))
            feat = feat // 2
    params["bn5"] = bn(feat)
    params["fc_w"] = (1.0 / feat ** 0.5) * jax.random.normal(
        nk(), (feat, num_classes), jnp.float32)
    params["fc_b"] = jnp.zeros((num_classes,), jnp.float32)
    return params


# ----------------------------- forward -----------------------------

def densenet_forward(params, x_nchw):
    x = jnp.transpose(x_nchw, (0, 2, 3, 1)).astype(jnp.float32)   # NCHW -> NHWC
    N = x.shape[0]
    growth = params["blocks"][0][0]["conv2_w"].shape[-1]
    n_blocks = len(params["blocks"])

    # ---- stem: conv0(7x7,s2,p3) with folded BN0 + ReLU (single fused matmul) ----
    w0 = params["conv0_w"]
    s0, b0 = params["bn0"]
    f0 = w0.shape[-1]
    c_in_b = f0
    cpad_b1 = _round_up(c_in_b + growth * len(params["blocks"][0]), LANE)
    w0f = _pad_axis((w0 * s0).reshape(-1, f0), 1, cpad_b1).astype(jnp.bfloat16)
    b0p = _pad_axis(b0, 0, cpad_b1)
    pat, ho0, wo0 = _im2col(x, 7, stride=2, pad=3)
    y = pallas_matmul_bias_relu(pat, w0f, b0p).reshape(N, ho0, wo0, cpad_b1)

    # ---- pool0: 3x3/s2/p1 max pool (input >= 0) — becomes the block-1 feature buffer ----
    feats = pallas_maxpool_3x3_s2(y)

    for bi, block in enumerate(params["blocks"]):
        n, h, w, cpad = feats.shape
        masks = _column_masks(h, w)
        feats_flat = feats.reshape(n, h * w, cpad)
        for li, layer in enumerate(block):
            cin = c_in_b + li * growth
            gb = layer["conv1_w"].shape[1]
            gbp = _round_up(gb, LANE)
            s1, b1 = layer["bn1"]
            s2, b2 = layer["bn2"]
            # fold BN2 scale into the 1x1 conv columns; BN2 bias is the epilogue bias
            w1f = _pad_axis(_pad_axis(layer["conv1_w"] * s2, 0, cpad), 1,
                            gbp).astype(jnp.bfloat16)
            s1p = _pad_axis(s1, 0, cpad)
            b1p = _pad_axis(b1, 0, cpad)
            b2p = _pad_axis(b2, 0, gbp)
            w2 = _pad_axis(layer["conv2_w"], 2, gbp)
            w2 = w2.reshape(9, gbp, growth).astype(jnp.bfloat16)
            # fused bottleneck + 3x3 conv, one pallas_call per layer, no HBM intermediate
            new = pallas_dense_layer(feats_flat, s1p, b1p, w1f, b2p, w2, masks, h, w)
            # in-place write of the new growth channels into the padded feature buffer
            feats_flat = jax.lax.dynamic_update_slice(feats_flat, new, (0, 0, cin))
        feats = feats_flat.reshape(n, h, w, cpad)

        c_real = c_in_b + growth * len(block)
        if bi + 1 != n_blocks:
            t = params["transitions"][bi]
            st, bt = t["bn"]
            c_next_in = t["conv_w"].shape[1]
            cpad_next = _round_up(
                c_next_in + growth * len(params["blocks"][bi + 1]), LANE)
            wt = _pad_axis(_pad_axis(t["conv_w"], 0, cpad), 1,
                           cpad_next).astype(jnp.bfloat16)
            stp = _pad_axis(st, 0, cpad)
            btp = _pad_axis(bt, 0, cpad)
            # fused BN+ReLU+avgpool+1x1conv; output is the next block's feature buffer
            feats = pallas_transition(feats, stp, btp, wt)
            c_in_b = c_next_in
        else:
            c_in_b = c_real

    # ---- tail: norm5 (no ReLU) folded into the classifier; GAP + FC fused ----
    s5, b5 = params["bn5"]
    wfc, bfc = params["fc_w"], params["fc_b"]
    n, h, w, cpad = feats.shape
    wfc_f = _pad_axis(s5[:, None] * wfc, 0, cpad).astype(jnp.bfloat16)
    bfc_f = b5 @ wfc + bfc
    return pallas_gap_fc(feats.reshape(n, h * w, cpad), wfc_f, bfc_f)


# ----------------------------- main -----------------------------

if __name__ == "__main__":
    key = jax.random.PRNGKey(0)
    pkey, xkey = jax.random.split(key)

    block_cfg = (2, 2, 2)
    growth_rate = 8
    bottleneck_size = 4
    num_classes = 10

    params = init_params(pkey, block_cfg, growth_rate, bottleneck_size, num_classes)
    x = jax.random.normal(xkey, (2, 3, 32, 32), jnp.float32)   # NCHW, like PyTorch

    fwd = jax.jit(densenet_forward)
    logits = fwd(params, x)
    logits = jax.block_until_ready(logits)

    assert logits.shape == (2, num_classes), logits.shape
    assert jnp.all(jnp.isfinite(logits))
    print("KERNEL_OK")
</pallas_src>

<mosaic_0001>
module attributes {stable_mosaic.version = 11 : i64} {
  func.func @_matmul_bias_relu_kernel(%arg0: i32, %arg1: memref<512x147xf32, #tpu.memory_space<vmem>>, %arg2: memref<147x128xbf16, #tpu.memory_space<vmem>>, %arg3: memref<1x128xf32, #tpu.memory_space<vmem>>, %arg4: memref<512x128xf32, #tpu.memory_space<vmem>>) attributes {dimension_semantics = [#tpu.dimension_semantics<parallel>], iteration_bounds = array<i64: 1>, scalar_prefetch = 0 : i64, scratch_operands = 0 : i64, tpu.core_type = #tpu.core_type<tc>, window_params = [{transform_indices = @transform_0, window_bounds = array<i64: 512, 147>}, {pipeline_mode = #tpu.pipeline_mode<synchronous>, transform_indices = @transform_1, window_bounds = array<i64: 147, 128>}, {pipeline_mode = #tpu.pipeline_mode<synchronous>, transform_indices = @transform_2, window_bounds = array<i64: 1, 128>}, {transform_indices = @transform_3, window_bounds = array<i64: 512, 128>}]} {
    %c0 = arith.constant 0 : index
    %c0_0 = arith.constant 0 : index
    %0 = vector.load %arg1[%c0, %c0_0] : memref<512x147xf32, #tpu.memory_space<vmem>>, vector<512x147xf32>
    %1 = arith.truncf %0 : vector<512x147xf32> to vector<512x147xbf16>
    %c0_1 = arith.constant 0 : index
    %c0_2 = arith.constant 0 : index
    %2 = vector.load %arg2[%c0_1, %c0_2] : memref<147x128xbf16, #tpu.memory_space<vmem>>, vector<147x128xbf16>
    %cst = arith.constant dense<0.000000e+00> : vector<512x128xf32>
    %3 = tpu.matmul %1, %2, %cst {dimension_numbers = #tpu.dot_dimension_numbers<[1], [0], [0], [1], [0, 0, 1, 1], [], []>} : vector<512x147xbf16>, vector<147x128xbf16>, vector<512x128xf32> -> vector<512x128xf32>
    %c0_3 = arith.constant 0 : index
    %c0_4 = arith.constant 0 : index
    %4 = vector.load %arg3[%c0_3, %c0_4] : memref<1x128xf32, #tpu.memory_space<vmem>>, vector<1x128xf32>
    %5 = vector.broadcast %4 : vector<1x128xf32> to vector<512x128xf32>
    %6 = arith.addf %3, %5 : vector<512x128xf32>
    %cst_5 = arith.constant 0.000000e+00 : f32
    %7 = vector.broadcast %cst_5 : f32 to vector<512x128xf32>
    %8 = arith.maximumf %6, %7 : vector<512x128xf32>
    %c0_6 = arith.constant 0 : index
    %c0_7 = arith.constant 0 : index
    %9 = vector.load %arg4[%c0_6, %c0_7] : memref<512x128xf32, #tpu.memory_space<vmem>>, vector<512x128xf32>
    tpu.vector_store %arg4[%c0_6, %c0_7], %8 {strides = array<i32>} : memref<512x128xf32, #tpu.memory_space<vmem>>, vector<512x128xf32>,
    return
  }
  func.func @transform_0(%arg0: i32) -> (i32, i32) {
    %c0_i32 = arith.constant 0 : i32
    %c0_i32_0 = arith.constant 0 : i32
    return %arg0, %c0_i32 : i32, i32
  }
  func.func @transform_1(%arg0: i32) -> (i32, i32) {
    %c0_i32 = arith.constant 0 : i32
    %c0_i32_0 = arith.constant 0 : i32
    %c0_i32_1 = arith.constant 0 : i32
    return %c0_i32, %c0_i32_0 : i32, i32
  }
  func.func @transform_2(%arg0: i32) -> (i32, i32) {
    %c0_i32 = arith.constant 0 : i32
    %c0_i32_0 = arith.constant 0 : i32
    %c0_i32_1 = arith.constant 0 : i32
    return %c0_i32, %c0_i32_0 : i32, i32
  }
  func.func @transform_3(%arg0: i32) -> (i32, i32) {
    %c0_i32 = arith.constant 0 : i32
    %c0_i32_0 = arith.constant 0 : i32
    return %arg0, %c0_i32 : i32, i32
  }
}

module attributes {stable_mosaic.version = 11 : i64} {
  func.func @_maxpool_kernel(%arg0: i32, %arg1: memref<1x9x9x128xf32, #tpu.memory_space<vmem>>, %arg2: memref<1x9x9x128xf32, #tpu.memory_space<vmem>>, %arg3: memref<1x9x9x128xf32, #tpu.memory_space<vmem>>, %arg4: memref<1x9x9x128xf32, #tpu.memory_space<vmem>>, %arg5: memref<1x8x8x128xf32, #tpu.memory_space<vmem>>) attributes {dimension_semantics = [#tpu.dimension_semantics<parallel>], iteration_bounds = array<i64: 2>, scalar_prefetch = 0 : i64, scratch_operands = 0 : i64, tpu.core_type = #tpu.core_type<tc>, window_params = [{transform_indices = @transform_0, window_bounds = array<i64: 1, 9, 9, 128>}, {transform_indices = @transform_1, window_bounds = array<i64: 1, 9, 9, 128>}, {transform_indices = @transform_2, window_bounds = array<i64: 1, 9, 9, 128>}, {transform_indices = @transform_3, window_bounds = array<i64: 1, 9, 9, 128>}, {transform_indices = @transform_4, window_bounds = array<i64: 1, 8, 8, 128>}]} {
    %c0 = arith.constant 0 : index
    %c0_0 = arith.constant 0 : index
    %c0_1 = arith.constant 0 : index
    %c0_2 = arith.constant 0 : index
    %0 = vector.load %arg1[%c0, %c0_0, %c0_1, %c0_2] : memref<1x9x9x128xf32, #tpu.memory_space<vmem>>, vector<1x9x9x128xf32>
    %1 = vector.shape_cast %0 : vector<1x9x9x128xf32> to vector<9x9x128xf32>
    %c0_3 = arith.constant 0 : index
    %c0_4 = arith.constant 0 : index
    %c0_5 = arith.constant 0 : index
    %c0_6 = arith.constant 0 : index
    %2 = vector.load %arg2[%c0_3, %c0_4, %c0_5, %c0_6] : memref<1x9x9x128xf32, #tpu.memory_space<vmem>>, vector<1x9x9x128xf32>
    %3 = vector.shape_cast %2 : vector<1x9x9x128xf32> to vector<9x9x128xf32>
    %c0_7 = arith.constant 0 : index
    %c0_8 = arith.constant 0 : index
    %c0_9 = arith.constant 0 : index
    %c0_10 = arith.constant 0 : index
    %4 = vector.load %arg3[%c0_7, %c0_8, %c0_9, %c0_10] : memref<1x9x9x128xf32, #tpu.memory_space<vmem>>, vector<1x9x9x128xf32>
    %5 = vector.shape_cast %4 : vector<1x9x9x128xf32> to vector<9x9x128xf32>
    %c0_11 = arith.constant 0 : index
    %c0_12 = arith.constant 0 : index
    %c0_13 = arith.constant 0 : index
    %c0_14 = arith.constant 0 : index
    %6 = vector.load %arg4[%c0_11, %c0_12, %c0_13, %c0_14] : memref<1x9x9x128xf32, #tpu.memory_space<vmem>>, vector<1x9x9x128xf32>
    %7 = vector.shape_cast %6 : vector<1x9x9x128xf32> to vector<9x9x128xf32>
    %8 = vector.extract_strided_slice %1 {offsets = [0, 0, 0], sizes = [8, 8, 128], strides = [1, 1, 1]} : vector<9x9x128xf32> to vector<8x8x128xf32>
    %9 = vector.extract_strided_slice %1 {offsets = [0, 1, 0], sizes = [8, 8, 128], strides = [1, 1, 1]} : vector<9x9x128xf32> to vector<8x8x128xf32>
    %10 = arith.maximumf %8, %9 : vector<8x8x128xf32>
    %11 = vector.extract_strided_slice %1 {offsets = [1, 0, 0], sizes = [8, 8, 128], strides = [1, 1, 1]} : vector<9x9x128xf32> to vector<8x8x128xf32>
    %12 = arith.maximumf %10, %11 : vector<8x8x128xf32>
    %13 = vector.extract_strided_slice %1 {offsets = [1, 1, 0], sizes = [8, 8, 128], strides = [1, 1, 1]} : vector<9x9x128xf32> to vector<8x8x128xf32>
    %14 = arith.maximumf %12, %13 : vector<8x8x128xf32>
    %15 = vector.extract_strided_slice %3 {offsets = [0, 0, 0], sizes = [8, 8, 128], strides = [1, 1, 1]} : vector<9x9x128xf32> to vector<8x8x128xf32>
    %16 = arith.maximumf %14, %15 : vector<8x8x128xf32>
    %17 = vector.extract_strided_slice %3 {offsets = [1, 0, 0], sizes = [8, 8, 128], strides = [1, 1, 1]} : vector<9x9x128xf32> to vector<8x8x128xf32>
    %18 = arith.maximumf %16, %17 : vector<8x8x128xf32>
    %19 = vector.extract_strided_slice %5 {offsets = [0, 0, 0], sizes = [8, 8, 128], strides = [1, 1, 1]} : vector<9x9x128xf32> to vector<8x8x128xf32>
    %20 = arith.maximumf %18, %19 : vector<8x8x128xf32>
    %21 = vector.extract_strided_slice %5 {offsets = [0, 1, 0], sizes = [8, 8, 128], strides = [1, 1, 1]} : vector<9x9x128xf32> to vector<8x8x128xf32>
    %22 = arith.maximumf %20, %21 : vector<8x8x128xf32>
    %23 = vector.extract_strided_slice %7 {offsets = [0, 0, 0], sizes = [8, 8, 128], strides = [1, 1, 1]} : vector<9x9x128xf32> to vector<8x8x128xf32>
    %24 = arith.maximumf %22, %23 : vector<8x8x128xf32>
    %c0_15 = arith.constant 0 : index
    %c0_16 = arith.constant 0 : index
    %c0_17 = arith.constant 0 : index
    %c0_18 = arith.constant 0 : index
    %25 = vector.load %arg5[%c0_15, %c0_16, %c0_17, %c0_18] : memref<1x8x8x128xf32, #tpu.memory_space<vmem>>, vector<1x8x8x128xf32>
    %26 = vector.shape_cast %25 : vector<1x8x8x128xf32> to vector<8x8x128xf32>
    %27 = vector.shape_cast %24 : vector<8x8x128xf32> to vector<1x8x8x128xf32>
    tpu.vector_store %arg5[%c0_15, %c0_16, %c0_17, %c0_18], %27 {strides = array<i32>} : memref<1x8x8x128xf32, #tpu.memory_space<vmem>>, vector<1x8x8x128xf32>,
    return
  }
  func.func @transform_0(%arg0: i32) -> (i32, i32, i32, i32) {
    %c0_i32 = arith.constant 0 : i32
    %c0_i32_0 = arith.constant 0 : i32
    %c0_i32_1 = arith.constant 0 : i32
    %c0_i32_2 = arith.constant 0 : i32
    return %arg0, %c0_i32, %c0_i32_0, %c0_i32_1 : i32, i32, i32, i32
  }
  func.func @transform_1(%arg0: i32) -> (i32, i32, i32, i32) {
    %c0_i32 = arith.constant 0 : i32
    %c0_i32_0 = arith.constant 0 : i32
    %c0_i32_1 = arith.constant 0 : i32
    %c0_i32_2 = arith.constant 0 : i32
    return %arg0, %c0_i32, %c0_i32_0, %c0_i32_1 : i32, i32, i32, i32
  }
  func.func @transform_2(%arg0: i32) -> (i32, i32, i32, i32) {
    %c0_i32 = arith.constant 0 : i32
    %c0_i32_0 = arith.constant 0 : i32
    %c0_i32_1 = arith.constant 0 : i32
    %c0_i32_2 = arith.constant 0 : i32
    return %arg0, %c0_i32, %c0_i32_0, %c0_i32_1 : i32, i32, i32, i32
  }
  func.func @transform_3(%arg0: i32) -> (i32, i32, i32, i32) {
    %c0_i32 = arith.constant 0 : i32
    %c0_i32_0 = arith.constant 0 : i32
    %c0_i32_1 = arith.constant 0 : i32
    %c0_i32_2 = arith.constant 0 : i32
    return %arg0, %c0_i32, %c0_i32_0, %c0_i32_1 : i32, i32, i32, i32
  }
  func.func @transform_4(%arg0: i32) -> (i32, i32, i32, i32) {
    %c0_i32 = arith.constant 0 : i32
    %c0_i32_0 = arith.constant 0 : i32
    %c0_i32_1 = arith.constant 0 : i32
    %c0_i32_2 = arith.constant 0 : i32
    return %arg0, %c0_i32, %c0_i32_0, %c0_i32_1 : i32, i32, i32, i32
  }
}

module attributes {stable_mosaic.version = 11 : i64} {
  func.func @_dense_layer_kernel(%arg0: i32, %arg1: memref<1x64x128xf32, #tpu.memory_space<vmem>>, %arg2: memref<1x128xf32, #tpu.memory_space<vmem>>, %arg3: memref<1x128xf32, #tpu.memory_space<vmem>>, %arg4: memref<128x128xbf16, #tpu.memory_space<vmem>>, %arg5: memref<1x128xf32, #tpu.memory_space<vmem>>, %arg6: memref<9x128x8xbf16, #tpu.memory_space<vmem>>, %arg7: memref<2x64x1xf32, #tpu.memory_space<vmem>>, %arg8: memref<1x64x8xf32, #tpu.memory_space<vmem>>, %arg9: memref<96x128xbf16, #tpu.memory_space<vmem>>) attributes {dimension_semantics = [#tpu.dimension_semantics<parallel>], iteration_bounds = array<i64: 2>, scalar_prefetch = 0 : i64, scratch_operands = 1 : i64, tpu.core_type = #tpu.core_type<tc>, window_params = [{transform_indices = @transform_0, window_bounds = array<i64: 1, 64, 128>}, {pipeline_mode = #tpu.pipeline_mode<synchronous>, transform_indices = @transform_1, window_bounds = array<i64: 1, 128>}, {pipeline_mode = #tpu.pipeline_mode<synchronous>, transform_indices = @transform_2, window_bounds = array<i64: 1, 128>}, {pipeline_mode = #tpu.pipeline_mode<synchronous>, transform_indices = @transform_3, window_bounds = array<i64: 128, 128>}, {pipeline_mode = #tpu.pipeline_mode<synchronous>, transform_indices = @transform_4, window_bounds = array<i64: 1, 128>}, {pipeline_mode = #tpu.pipeline_mode<synchronous>, transform_indices = @transform_5, window_bounds = array<i64: 9, 128, 8>}, {pipeline_mode = #tpu.pipeline_mode<synchronous>, transform_indices = @transform_6, window_bounds = array<i64: 2, 64, 1>}, {transform_indices = @transform_7, window_bounds = array<i64: 1, 64, 8>}]} {
    %c0 = arith.constant 0 : index
    %c0_0 = arith.constant 0 : index
    %c0_1 = arith.constant 0 : index
    %0 = vector.load %arg1[%c0, %c0_0, %c0_1] : memref<1x64x128xf32, #tpu.memory_space<vmem>>, vector<1x64x128xf32>
    %1 = vector.shape_cast %0 : vector<1x64x128xf32> to vector<64x128xf32>
    %c0_2 = arith.constant 0 : index
    %c0_3 = arith.constant 0 : index
    %2 = vector.load %arg2[%c0_2, %c0_3] : memref<1x128xf32, #tpu.memory_space<vmem>>, vector<1x128xf32>
    %3 = vector.broadcast %2 : vector<1x128xf32> to vector<64x128xf32>
    %4 = arith.mulf %1, %3 : vector<64x128xf32>
    %c0_4 = arith.constant 0 : index
    %c0_5 = arith.constant 0 : index
    %5 = vector.load %arg3[%c0_4, %c0_5] : memref<1x128xf32, #tpu.memory_space<vmem>>, vector<1x128xf32>
    %6 = vector.broadcast %5 : vector<1x128xf32> to vector<64x128xf32>
    %7 = arith.addf %4, %6 : vector<64x128xf32>
    %cst = arith.constant 0.000000e+00 : f32
    %8 = vector.broadcast %cst : f32 to vector<64x128xf32>
    %9 = arith.maximumf %7, %8 : vector<64x128xf32>
    %10 = arith.truncf %9 : vector<64x128xf32> to vector<64x128xbf16>
    %c0_6 = arith.constant 0 : index
    %c0_7 = arith.constant 0 : index
    %11 = vector.load %arg4[%c0_6, %c0_7] : memref<128x128xbf16, #tpu.memory_space<vmem>>, vector<128x128xbf16>
    %cst_8 = arith.constant dense<0.000000e+00> : vector<64x128xf32>
    %12 = tpu.matmul %10, %11, %cst_8 {dimension_numbers = #tpu.dot_dimension_numbers<[1], [0], [0], [1], [0, 0, 1, 1], [], []>} : vector<64x128xbf16>, vector<128x128xbf16>, vector<64x128xf32> -> vector<64x128xf32>
    %c0_9 = arith.constant 0 : index
    %c0_10 = arith.constant 0 : index
    %13 = vector.load %arg5[%c0_9, %c0_10] : memref<1x128xf32, #tpu.memory_space<vmem>>, vector<1x128xf32>
    %14 = vector.broadcast %13 : vector<1x128xf32> to vector<64x128xf32>
    %15 = arith.addf %12, %14 : vector<64x128xf32>
    %cst_11 = arith.constant 0.000000e+00 : f32
    %16 = vector.broadcast %cst_11 : f32 to vector<64x128xf32>
    %17 = arith.maximumf %15, %16 : vector<64x128xf32>
    %18 = arith.truncf %17 : vector<64x128xf32> to vector<64x128xbf16>
    %cst_12 = arith.constant 0.000000e+00 : bf16
    %19 = vector.broadcast %cst_12 : bf16 to vector<96x128xbf16>
    %c0_13 = arith.constant 0 : index
    %c0_14 = arith.constant 0 : index
    %20 = vector.load %arg9[%c0_13, %c0_14] : memref<96x128xbf16, #tpu.memory_space<vmem>>, vector<96x128xbf16>
    tpu.vector_store %arg9[%c0_13, %c0_14], %19 {strides = array<i32>} : memref<96x128xbf16, #tpu.memory_space<vmem>>, vector<96x128xbf16>,
    %c16 = arith.constant 16 : index
    %c0_15 = arith.constant 0 : index
    %21 = vector.load %arg9[%c16, %c0_15] : memref<96x128xbf16, #tpu.memory_space<vmem>>, vector<64x128xbf16>
    tpu.vector_store %arg9[%c16, %c0_15], %18 {strides = array<i32>} : memref<96x128xbf16, #tpu.memory_space<vmem>>, vector<64x128xbf16>,
    %c0_16 = arith.constant 0 : index
    %c0_17 = arith.constant 0 : index
    %22 = vector.load %arg9[%c0_16, %c0_17] : memref<96x128xbf16, #tpu.memory_space<vmem>>, vector<96x128xbf16>
    %c0_18 = arith.constant 0 : index
    %c0_19 = arith.constant 0 : index
    %c0_20 = arith.constant 0 : index
    %23 = vector.load %arg7[%c0_18, %c0_19, %c0_20] : memref<2x64x1xf32, #tpu.memory_space<vmem>>, vector<1x64x1xf32>
    %24 = vector.shape_cast %23 : vector<1x64x1xf32> to vector<64x1xf32>
    %c1 = arith.constant 1 : index
    %c0_21 = arith.constant 0 : index
    %c0_22 = arith.constant 0 : index
    %25 = vector.load %arg7[%c1, %c0_21, %c0_22] : memref<2x64x1xf32, #tpu.memory_space<vmem>>, vector<1x64x1xf32>
    %26 = vector.shape_cast %25 : vector<1x64x1xf32> to vector<64x1xf32>
    %cst_23 = arith.constant 0.000000e+00 : f32
    %27 = vector.broadcast %cst_23 : f32 to vector<64x8xf32>
    %28 = vector.extract_strided_slice %22 {offsets = [7, 0], sizes = [64, 128], strides = [1, 1]} : vector<96x128xbf16> to vector<64x128xbf16>
    %c0_24 = arith.constant 0 : index
    %c0_25 = arith.constant 0 : index
    %c0_26 = arith.constant 0 : index
    %29 = vector.load %arg6[%c0_24, %c0_25, %c0_26] : memref<9x128x8xbf16, #tpu.memory_space<vmem>>, vector<1x128x8xbf16>
    %30 = vector.shape_cast %29 : vector<1x128x8xbf16> to vector<128x8xbf16>
    %cst_27 = arith.constant dense<0.000000e+00> : vector<64x8xf32>
    %31 = tpu.matmul %28, %30, %cst_27 {dimension_numbers = #tpu.dot_dimension_numbers<[1], [0], [0], [1], [0, 0, 1, 1], [], []>} : vector<64x128xbf16>, vector<128x8xbf16>, vector<64x8xf32> -> vector<64x8xf32>
    %32 = vector.broadcast %24 : vector<64x1xf32> to vector<64x8xf32>
    %33 = arith.mulf %31, %32 : vector<64x8xf32>
    %34 = arith.addf %27, %33 : vector<64x8xf32>
    %35 = vector.extract_strided_slice %22 {offsets = [8, 0], sizes = [64, 128], strides = [1, 1]} : vector<96x128xbf16> to vector<64x128xbf16>
    %c1_28 = arith.constant 1 : index
    %c0_29 = arith.constant 0 : index
    %c0_30 = arith.constant 0 : index
    %36 = vector.load %arg6[%c1_28, %c0_29, %c0_30] : memref<9x128x8xbf16, #tpu.memory_space<vmem>>, vector<1x128x8xbf16>
    %37 = vector.shape_cast %36 : vector<1x128x8xbf16> to vector<128x8xbf16>
    %cst_31 = arith.constant dense<0.000000e+00> : vector<64x8xf32>
    %38 = tpu.matmul %35, %37, %cst_31 {dimension_numbers = #tpu.dot_dimension_numbers<[1], [0], [0], [1], [0, 0, 1, 1], [], []>} : vector<64x128xbf16>, vector<128x8xbf16>, vector<64x8xf32> -> vector<64x8xf32>
    %39 = arith.addf %34, %38 : vector<64x8xf32>
    %40 = vector.extract_strided_slice %22 {offsets = [9, 0], sizes = [64, 128], strides = [1, 1]} : vector<96x128xbf16> to vector<64x128xbf16>
    %c2 = arith.constant 2 : index
    %c0_32 = arith.constant 0 : index
    %c0_33 = arith.constant 0 : index
    %41 = vector.load %arg6[%c2, %c0_32, %c0_33] : memref<9x128x8xbf16, #tpu.memory_space<vmem>>, vector<1x128x8xbf16>
    %42 = vector.shape_cast %41 : vector<1x128x8xbf16> to vector<128x8xbf16>
    %cst_34 = arith.constant dense<0.000000e+00> : vector<64x8xf32>
    %43 = tpu.matmul %40, %42, %cst_34 {dimension_numbers = #tpu.dot_dimension_numbers<[1], [0], [0], [1], [0, 0, 1, 1], [], []>} : vector<64x128xbf16>, vector<128x8xbf16>, vector<64x8xf32> -> vector<64x8xf32>
    %44 = vector.broadcast %26 : vector<64x1xf32> to vector<64x8xf32>
    %45 = arith.mulf %43, %44 : vector<64x8xf32>
    %46 = arith.addf %39, %45 : vector<64x8xf32>
    %47 = vector.extract_strided_slice %22 {offsets = [15, 0], sizes = [64, 128], strides = [1, 1]} : vector<96x128xbf16> to vector<64x128xbf16>
    %c3 = arith.constant 3 : index
    %c0_35 = arith.constant 0 : index
    %c0_36 = arith.constant 0 : index
    %48 = vector.load %arg6[%c3, %c0_35, %c0_36] : memref<9x128x8xbf16, #tpu.memory_space<vmem>>, vector<1x128x8xbf16>
    %49 = vector.shape_cast %48 : vector<1x128x8xbf16> to vector<128x8xbf16>
    %cst_37 = arith.constant dense<0.000000e+00> : vector<64x8xf32>
    %50 = tpu.matmul %47, %49, %cst_37 {dimension_numbers = #tpu.dot_dimension_numbers<[1], [0], [0], [1], [0, 0, 1, 1], [], []>} : vector<64x128xbf16>, vector<128x8xbf16>, vector<64x8xf32> -> vector<64x8xf32>
    %51 = vector.broadcast %24 : vector<64x1xf32> to vector<64x8xf32>
    %52 = arith.mulf %50, %51 : vector<64x8xf32>
    %53 = arith.addf %46, %52 : vector<64x8xf32>
    %54 = vector.extract_strided_slice %22 {offsets = [16, 0], sizes = [64, 128], strides = [1, 1]} : vector<96x128xbf16> to vector<64x128xbf16>
    %c4 = arith.constant 4 : index
    %c0_38 = arith.constant 0 : index
    %c0_39 = arith.constant 0 : index
    %55 = vector.load %arg6[%c4, %c0_38, %c0_39] : memref<9x128x8xbf16, #tpu.memory_space<vmem>>, vector<1x128x8xbf16>
    %56 = vector.shape_cast %55 : vector<1x128x8xbf16> to vector<128x8xbf16>
    %cst_40 = arith.constant dense<0.000000e+00> : vector<64x8xf32>
    %57 = tpu.matmul %54, %56, %cst_40 {dimension_numbers = #tpu.dot_dimension_numbers<[1], [0], [0], [1], [0, 0, 1, 1], [], []>} : vector<64x128xbf16>, vector<128x8xbf16>, vector<64x8xf32> -> vector<64x8xf32>
    %58 = arith.addf %53, %57 : vector<64x8xf32>
    %59 = vector.extract_strided_slice %22 {offsets = [17, 0], sizes = [64, 128], strides = [1, 1]} : vector<96x128xbf16> to vector<64x128xbf16>
    %c5 = arith.constant 5 : index
    %c0_41 = arith.constant 0 : index
    %c0_42 = arith.constant 0 : index
    %60 = vector.load %arg6[%c5, %c0_41, %c0_42] : memref<9x128x8xbf16, #tpu.memory_space<vmem>>, vector<1x128x8xbf16>
    %61 = vector.shape_cast %60 : vector<1x128x8xbf16> to vector<128x8xbf16>
    %cst_43 = arith.constant dense<0.000000e+00> : vector<64x8xf32>
    %62 = tpu.matmul %59, %61, %cst_43 {dimension_numbers = #tpu.dot_dimension_numbers<[1], [0], [0], [1], [0, 0, 1, 1], [], []>} : vector<64x128xbf16>, vector<128x8xbf16>, vector<64x8xf32> -> vector<64x8xf32>
    %63 = vector.broadcast %26 : vector<64x1xf32> to vector<64x8xf32>
    %64 = arith.mulf %62, %63 : vector<64x8xf32>
    %65 = arith.addf %58, %64 : vector<64x8xf32>
    %66 = vector.extract_strided_slice %22 {offsets = [23, 0], sizes = [64, 128], strides = [1, 1]} : vector<96x128xbf16> to vector<64x128xbf16>
    %c6 = arith.constant 6 : index
    %c0_44 = arith.constant 0 : index
    %c0_45 = arith.constant 0 : index
    %67 = vector.load %arg6[%c6, %c0_44, %c0_45] : memref<9x128x8xbf16, #tpu.memory_space<vmem>>, vector<1x128x8xbf16>
    %68 = vector.shape_cast %67 : vector<1x128x8xbf16> to vector<128x8xbf16>
    %cst_46 = arith.constant dense<0.000000e+00> : vector<64x8xf32>
    %69 = tpu.matmul %66, %68, %cst_46 {dimension_numbers = #tpu.dot_dimension_numbers<[1], [0], [0], [1], [0, 0, 1, 1], [], []>} : vector<64x128xbf16>, vector<128x8xbf16>, vector<64x8xf32> -> vector<64x8xf32>
    %70 = vector.broadcast %24 : vector<64x1xf32> to vector<64x8xf32>
    %71 = arith.mulf %69, %70 : vector<64x8xf32>
    %72 = arith.addf %65, %71 : vector<64x8xf32>
    %73 = vector.extract_strided_slice %22 {offsets = [24, 0], sizes = [64, 128], strides = [1, 1]} : vector<96x128xbf16> to vector<64x128xbf16>
    %c7 = arith.constant 7 : index
    %c0_47 = arith.constant 0 : index
    %c0_48 = arith.constant 0 : index
    %74 = vector.load %arg6[%c7, %c0_47, %c0_48] : memref<9x128x8xbf16, #tpu.memory_space<vmem>>, vector<1x128x8xbf16>
    %75 = vector.shape_cast %74 : vector<1x128x8xbf16> to vector<128x8xbf16>
    %cst_49 = arith.constant dense<0.000000e+00> : vector<64x8xf32>
    %76 = tpu.matmul %73, %75, %cst_49 {dimension_numbers = #tpu.dot_dimension_numbers<[1], [0], [0], [1], [0, 0, 1, 1], [], []>} : vector<64x128xbf16>, vector<128x8xbf16>, vector<64x8xf32> -> vector<64x8xf32>
    %77 = arith.addf %72, %76 : vector<64x8xf32>
    %78 = vector.extract_strided_slice %22 {offsets = [25, 0], sizes = [64, 128], strides = [1, 1]} : vector<96x128xbf16> to vector<64x128xbf16>
    %c8 = arith.constant 8 : index
    %c0_50 = arith.constant 0 : index
    %c0_51 = arith.constant 0 : index
    %79 = vector.load %arg6[%c8, %c0_50, %c0_51] : memref<9x128x8xbf16, #tpu.memory_space<vmem>>, vector<1x128x8xbf16>
    %80 = vector.shape_cast %79 : vector<1x128x8xbf16> to vector<128x8xbf16>
    %cst_52 = arith.constant dense<0.000000e+00> : vector<64x8xf32>
    %81 = tpu.matmul %78, %80, %cst_52 {dimension_numbers = #tpu.dot_dimension_numbers<[1], [0], [0], [1], [0, 0, 1, 1], [], []>} : vector<64x128xbf16>, vector<128x8xbf16>, vector<64x8xf32> -> vector<64x8xf32>
    %82 = vector.broadcast %26 : vector<64x1xf32> to vector<64x8xf32>
    %83 = arith.mulf %81, %82 : vector<64x8xf32>
    %84 = arith.addf %77, %83 : vector<64x8xf32>
    %c0_53 = arith.constant 0 : index
    %c0_54 = arith.constant 0 : index
    %c0_55 = arith.constant 0 : index
    %85 = vector.load %arg8[%c0_53, %c0_54, %c0_55] : memref<1x64x8xf32, #tpu.memory_space<vmem>>, vector<1x64x8xf32>
    %86 = vector.shape_cast %85 : vector<1x64x8xf32> to vector<64x8xf32>
    %87 = vector.shape_cast %84 : vector<64x8xf32> to vector<1x64x8xf32>
    tpu.vector_store %arg8[%c0_53, %c0_54, %c0_55], %87 {strides = array<i32>} : memref<1x64x8xf32, #tpu.memory_space<vmem>>, vector<1x64x8xf32>,
    return
  }
  func.func @transform_0(%arg0: i32) -> (i32, i32, i32) {
    %c0_i32 = arith.constant 0 : i32
    %c0_i32_0 = arith.constant 0 : i32
    %c0_i32_1 = arith.constant 0 : i32
    return %arg0, %c0_i32, %c0_i32_0 : i32, i32, i32
  }
  func.func @transform_1(%arg0: i32) -> (i32, i32) {
    %c0_i32 = arith.constant 0 : i32
    %c0_i32_0 = arith.constant 0 : i32
    %c0_i32_1 = arith.constant 0 : i32
    return %c0_i32, %c0_i32_0 : i32, i32
  }
  func.func @transform_2(%arg0: i32) -> (i32, i32) {
    %c0_i32 = arith.constant 0 : i32
    %c0_i32_0 = arith.constant 0 : i32
    %c0_i32_1 = arith.constant 0 : i32
    return %c0_i32, %c0_i32_0 : i32, i32
  }
  func.func @transform_3(%arg0: i32) -> (i32, i32) {
    %c0_i32 = arith.constant 0 : i32
    %c0_i32_0 = arith.constant 0 : i32
    %c0_i32_1 = arith.constant 0 : i32
    return %c0_i32, %c0_i32_0 : i32, i32
  }
  func.func @transform_4(%arg0: i32) -> (i32, i32) {
    %c0_i32 = arith.constant 0 : i32
    %c0_i32_0 = arith.constant 0 : i32
    %c0_i32_1 = arith.constant 0 : i32
    return %c0_i32, %c0_i32_0 : i32, i32
  }
  func.func @transform_5(%arg0: i32) -> (i32, i32, i32) {
    %c0_i32 = arith.constant 0 : i32
    %c0_i32_0 = arith.constant 0 : i32
    %c0_i32_1 = arith.constant 0 : i32
    %c0_i32_2 = arith.constant 0 : i32
    return %c0_i32, %c0_i32_0, %c0_i32_1 : i32, i32, i32
  }
  func.func @transform_6(%arg0: i32) -> (i32, i32, i32) {
    %c0_i32 = arith.constant 0 : i32
    %c0_i32_0 = arith.constant 0 : i32
    %c0_i32_1 = arith.constant 0 : i32
    %c0_i32_2 = arith.constant 0 : i32
    return %c0_i32, %c0_i32_0, %c0_i32_1 : i32, i32, i32
  }
  func.func @transform_7(%arg0: i32) -> (i32, i32, i32) {
    %c0_i32 = arith.constant 0 : i32
    %c0_i32_0 = arith.constant 0 : i32
    %c0_i32_1 = arith.constant 0 : i32
    return %arg0, %c0_i32, %c0_i32_0 : i32, i32, i32
  }
}

module attributes {stable_mosaic.version = 11 : i64} {
  func.func @_transition_kernel(%arg0: i32, %arg1: memref<32x128xf32, #tpu.memory_space<vmem>>, %arg2: memref<32x128xf32, #tpu.memory_space<vmem>>, %arg3: memref<32x128xf32, #tpu.memory_space<vmem>>, %arg4: memref<32x128xf32, #tpu.memory_space<vmem>>, %arg5: memref<1x128xf32, #tpu.memory_space<vmem>>, %arg6: memref<1x128xf32, #tpu.memory_space<vmem>>, %arg7: memref<128x128xbf16, #tpu.memory_space<vmem>>, %arg8: memref<32x128xf32, #tpu.memory_space<vmem>>) attributes {dimension_semantics = [#tpu.dimension_semantics<parallel>], iteration_bounds = array<i64: 1>, scalar_prefetch = 0 : i64, scratch_operands = 0 : i64, tpu.core_type = #tpu.core_type<tc>, window_params = [{transform_indices = @transform_0, window_bounds = array<i64: 32, 128>}, {transform_indices = @transform_1, window_bounds = array<i64: 32, 128>}, {transform_indices = @transform_2, window_bounds = array<i64: 32, 128>}, {transform_indices = @transform_3, window_bounds = array<i64: 32, 128>}, {pipeline_mode = #tpu.pipeline_mode<synchronous>, transform_indices = @transform_4, window_bounds = array<i64: 1, 128>}, {pipeline_mode = #tpu.pipeline_mode<synchronous>, transform_indices = @transform_5, window_bounds = array<i64: 1, 128>}, {pipeline_mode = #tpu.pipeline_mode<synchronous>, transform_indices = @transform_6, window_bounds = array<i64: 128, 128>}, {transform_indices = @transform_7, window_bounds = array<i64: 32, 128>}]} {
    %c0 = arith.constant 0 : index
    %c0_0 = arith.constant 0 : index
    %0 = vector.load %arg5[%c0, %c0_0] : memref<1x128xf32, #tpu.memory_space<vmem>>, vector<1x128xf32>
    %c0_1 = arith.constant 0 : index
    %c0_2 = arith.constant 0 : index
    %1 = vector.load %arg6[%c0_1, %c0_2] : memref<1x128xf32, #tpu.memory_space<vmem>>, vector<1x128xf32>
    %c0_3 = arith.constant 0 : index
    %c0_4 = arith.constant 0 : index
    %2 = vector.load %arg1[%c0_3, %c0_4] : memref<32x128xf32, #tpu.memory_space<vmem>>, vector<32x128xf32>
    %3 = vector.broadcast %0 : vector<1x128xf32> to vector<32x128xf32>
    %4 = arith.mulf %2, %3 : vector<32x128xf32>
    %5 = vector.broadcast %1 : vector<1x128xf32> to vector<32x128xf32>
    %6 = arith.addf %4, %5 : vector<32x128xf32>
    %cst = arith.constant 0.000000e+00 : f32
    %7 = vector.broadcast %cst : f32 to vector<32x128xf32>
    %8 = arith.maximumf %6, %7 : vector<32x128xf32>
    %c0_5 = arith.constant 0 : index
    %c0_6 = arith.constant 0 : index
    %9 = vector.load %arg2[%c0_5, %c0_6] : memref<32x128xf32, #tpu.memory_space<vmem>>, vector<32x128xf32>
    %10 = vector.broadcast %0 : vector<1x128xf32> to vector<32x128xf32>
    %11 = arith.mulf %9, %10 : vector<32x128xf32>
    %12 = vector.broadcast %1 : vector<1x128xf32> to vector<32x128xf32>
    %13 = arith.addf %11, %12 : vector<32x128xf32>
    %cst_7 = arith.constant 0.000000e+00 : f32
    %14 = vector.broadcast %cst_7 : f32 to vector<32x128xf32>
    %15 = arith.maximumf %13, %14 : vector<32x128xf32>
    %16 = arith.addf %8, %15 : vector<32x128xf32>
    %c0_8 = arith.constant 0 : index
    %c0_9 = arith.constant 0 : index
    %17 = vector.load %arg3[%c0_8, %c0_9] : memref<32x128xf32, #tpu.memory_space<vmem>>, vector<32x128xf32>
    %18 = vector.broadcast %0 : vector<1x128xf32> to vector<32x128xf32>
    %19 = arith.mulf %17, %18 : vector<32x128xf32>
    %20 = vector.broadcast %1 : vector<1x128xf32> to vector<32x128xf32>
    %21 = arith.addf %19, %20 : vector<32x128xf32>
    %cst_10 = arith.constant 0.000000e+00 : f32
    %22 = vector.broadcast %cst_10 : f32 to vector<32x128xf32>
    %23 = arith.maximumf %21, %22 : vector<32x128xf32>
    %24 = arith.addf %16, %23 : vector<32x128xf32>
    %c0_11 = arith.constant 0 : index
    %c0_12 = arith.constant 0 : index
    %25 = vector.load %arg4[%c0_11, %c0_12] : memref<32x128xf32, #tpu.memory_space<vmem>>, vector<32x128xf32>
    %26 = vector.broadcast %0 : vector<1x128xf32> to vector<32x128xf32>
    %27 = arith.mulf %25, %26 : vector<32x128xf32>
    %28 = vector.broadcast %1 : vector<1x128xf32> to vector<32x128xf32>
    %29 = arith.addf %27, %28 : vector<32x128xf32>
    %cst_13 = arith.constant 0.000000e+00 : f32
    %30 = vector.broadcast %cst_13 : f32 to vector<32x128xf32>
    %31 = arith.maximumf %29, %30 : vector<32x128xf32>
    %32 = arith.addf %24, %31 : vector<32x128xf32>
    %cst_14 = arith.constant 2.500000e-01 : f32
    %33 = vector.broadcast %cst_14 : f32 to vector<32x128xf32>
    %34 = arith.mulf %33, %32 : vector<32x128xf32>
    %35 = arith.truncf %34 : vector<32x128xf32> to vector<32x128xbf16>
    %c0_15 = arith.constant 0 : index
    %c0_16 = arith.constant 0 : index
    %36 = vector.load %arg7[%c0_15, %c0_16] : memref<128x128xbf16, #tpu.memory_space<vmem>>, vector<128x128xbf16>
    %cst_17 = arith.constant dense<0.000000e+00> : vector<32x128xf32>
    %37 = tpu.matmul %35, %36, %cst_17 {dimension_numbers = #tpu.dot_dimension_numbers<[1], [0], [0], [1], [0, 0, 1, 1], [], []>} : vector<32x128xbf16>, vector<128x128xbf16>, vector<32x128xf32> -> vector<32x128xf32>
    %c0_18 = arith.constant 0 : index
    %c0_19 = arith.constant 0 : index
    %38 = vector.load %arg8[%c0_18, %c0_19] : memref<32x128xf32, #tpu.memory_space<vmem>>, vector<32x128xf32>
    tpu.vector_store %arg8[%c0_18, %c0_19], %37 {strides = array<i32>} : memref<32x128xf32, #tpu.memory_space<vmem>>, vector<32x128xf32>,
    return
  }
  func.func @transform_0(%arg0: i32) -> (i32, i32) {
    %c0_i32 = arith.constant 0 : i32
    %c0_i32_0 = arith.constant 0 : i32
    return %arg0, %c0_i32 : i32, i32
  }
  func.func @transform_1(%arg0: i32) -> (i32, i32) {
    %c0_i32 = arith.constant 0 : i32
    %c0_i32_0 = arith.constant 0 : i32
    return %arg0, %c0_i32 : i32, i32
  }
  func.func @transform_2(%arg0: i32) -> (i32, i32) {
    %c0_i32 = arith.constant 0 : i32
    %c0_i32_0 = arith.constant 0 : i32
    return %arg0, %c0_i32 : i32, i32
  }
  func.func @transform_3(%arg0: i32) -> (i32, i32) {
    %c0_i32 = arith.constant 0 : i32
    %c0_i32_0 = arith.constant 0 : i32
    return %arg0, %c0_i32 : i32, i32
  }
  func.func @transform_4(%arg0: i32) -> (i32, i32) {
    %c0_i32 = arith.constant 0 : i32
    %c0_i32_0 = arith.constant 0 : i32
    %c0_i32_1 = arith.constant 0 : i32
    return %c0_i32, %c0_i32_0 : i32, i32
  }
  func.func @transform_5(%arg0: i32) -> (i32, i32) {
    %c0_i32 = arith.constant 0 : i32
    %c0_i32_0 = arith.constant 0 : i32
    %c0_i32_1 = arith.constant 0 : i32
    return %c0_i32, %c0_i32_0 : i32, i32
  }
  func.func @transform_6(%arg0: i32) -> (i32, i32) {
    %c0_i32 = arith.constant 0 : i32
    %c0_i32_0 = arith.constant 0 : i32
    %c0_i32_1 = arith.constant 0 : i32
    return %c0_i32, %c0_i32_0 : i32, i32
  }
  func.func @transform_7(%arg0: i32) -> (i32, i32) {
    %c0_i32 = arith.constant 0 : i32
    %c0_i32_0 = arith.constant 0 : i32
    return %arg0, %c0_i32 : i32, i32
  }
}

module attributes {stable_mosaic.version = 11 : i64} {
  func.func @_dense_layer_kernel(%arg0: i32, %arg1: memref<1x16x128xf32, #tpu.memory_space<vmem>>, %arg2: memref<1x128xf32, #tpu.memory_space<vmem>>, %arg3: memref<1x128xf32, #tpu.memory_space<vmem>>, %arg4: memref<128x128xbf16, #tpu.memory_space<vmem>>, %arg5: memref<1x128xf32, #tpu.memory_space<vmem>>, %arg6: memref<9x128x8xbf16, #tpu.memory_space<vmem>>, %arg7: memref<2x16x1xf32, #tpu.memory_space<vmem>>, %arg8: memref<1x16x8xf32, #tpu.memory_space<vmem>>, %arg9: memref<32x128xbf16, #tpu.memory_space<vmem>>) attributes {dimension_semantics = [#tpu.dimension_semantics<parallel>], iteration_bounds = array<i64: 2>, scalar_prefetch = 0 : i64, scratch_operands = 1 : i64, tpu.core_type = #tpu.core_type<tc>, window_params = [{transform_indices = @transform_0, window_bounds = array<i64: 1, 16, 128>}, {pipeline_mode = #tpu.pipeline_mode<synchronous>, transform_indices = @transform_1, window_bounds = array<i64: 1, 128>}, {pipeline_mode = #tpu.pipeline_mode<synchronous>, transform_indices = @transform_2, window_bounds = array<i64: 1, 128>}, {pipeline_mode = #tpu.pipeline_mode<synchronous>, transform_indices = @transform_3, window_bounds = array<i64: 128, 128>}, {pipeline_mode = #tpu.pipeline_mode<synchronous>, transform_indices = @transform_4, window_bounds = array<i64: 1, 128>}, {pipeline_mode = #tpu.pipeline_mode<synchronous>, transform_indices = @transform_5, window_bounds = array<i64: 9, 128, 8>}, {pipeline_mode = #tpu.pipeline_mode<synchronous>, transform_indices = @transform_6, window_bounds = array<i64: 2, 16, 1>}, {transform_indices = @transform_7, window_bounds = array<i64: 1, 16, 8>}]} {
    %c0 = arith.constant 0 : index
    %c0_0 = arith.constant 0 : index
    %c0_1 = arith.constant 0 : index
    %0 = vector.load %arg1[%c0, %c0_0, %c0_1] : memref<1x16x128xf32, #tpu.memory_space<vmem>>, vector<1x16x128xf32>
    %1 = vector.shape_cast %0 : vector<1x16x128xf32> to vector<16x128xf32>
    %c0_2 = arith.constant 0 : index
    %c0_3 = arith.constant 0 : index
    %2 = vector.load %arg2[%c0_2, %c0_3] : memref<1x128xf32, #tpu.memory_space<vmem>>, vector<1x128xf32>
    %3 = vector.broadcast %2 : vector<1x128xf32> to vector<16x128xf32>
    %4 = arith.mulf %1, %3 : vector<16x128xf32>
    %c0_4 = arith.constant 0 : index
    %c0_5 = arith.constant 0 : index
    %5 = vector.load %arg3[%c0_4, %c0_5] : memref<1x128xf32, #tpu.memory_space<vmem>>, vector<1x128xf32>
    %6 = vector.broadcast %5 : vector<1x128xf32> to vector<16x128xf32>
    %7 = arith.addf %4, %6 : vector<16x128xf32>
    %cst = arith.constant 0.000000e+00 : f32
    %8 = vector.broadcast %cst : f32 to vector<16x128xf32>
    %9 = arith.maximumf %7, %8 : vector<16x128xf32>
    %10 = arith.truncf %9 : vector<16x128xf32> to vector<16x128xbf16>
    %c0_6 = arith.constant 0 : index
    %c0_7 = arith.constant 0 : index
    %11 = vector.load %arg4[%c0_6, %c0_7] : memref<128x128xbf16, #tpu.memory_space<vmem>>, vector<128x128xbf16>
    %cst_8 = arith.constant dense<0.000000e+00> : vector<16x128xf32>
    %12 = tpu.matmul %10, %11, %cst_8 {dimension_numbers = #tpu.dot_dimension_numbers<[1], [0], [0], [1], [0, 0, 1, 1], [], []>} : vector<16x128xbf16>, vector<128x128xbf16>, vector<16x128xf32> -> vector<16x128xf32>
    %c0_9 = arith.constant 0 : index
    %c0_10 = arith.constant 0 : index
    %13 = vector.load %arg5[%c0_9, %c0_10] : memref<1x128xf32, #tpu.memory_space<vmem>>, vector<1x128xf32>
    %14 = vector.broadcast %13 : vector<1x128xf32> to vector<16x128xf32>
    %15 = arith.addf %12, %14 : vector<16x128xf32>
    %cst_11 = arith.constant 0.000000e+00 : f32
    %16 = vector.broadcast %cst_11 : f32 to vector<16x128xf32>
    %17 = arith.maximumf %15, %16 : vector<16x128xf32>
    %18 = arith.truncf %17 : vector<16x128xf32> to vector<16x128xbf16>
    %cst_12 = arith.constant 0.000000e+00 : bf16
    %19 = vector.broadcast %cst_12 : bf16 to vector<32x128xbf16>
    %c0_13 = arith.constant 0 : index
    %c0_14 = arith.constant 0 : index
    %20 = vector.load %arg9[%c0_13, %c0_14] : memref<32x128xbf16, #tpu.memory_space<vmem>>, vector<32x128xbf16>
    tpu.vector_store %arg9[%c0_13, %c0_14], %19 {strides = array<i32>} : memref<32x128xbf16, #tpu.memory_space<vmem>>, vector<32x128xbf16>,
    %c8 = arith.constant 8 : index
    %c0_15 = arith.constant 0 : index
    %21 = vector.load %arg9[%c8, %c0_15] : memref<32x128xbf16, #tpu.memory_space<vmem>>, vector<16x128xbf16>
    tpu.vector_store %arg9[%c8, %c0_15], %18 {strides = array<i32>} : memref<32x128xbf16, #tpu.memory_space<vmem>>, vector<16x128xbf16>,
    %c0_16 = arith.constant 0 : index
    %c0_17 = arith.constant 0 : index
    %22 = vector.load %arg9[%c0_16, %c0_17] : memref<32x128xbf16, #tpu.memory_space<vmem>>, vector<32x128xbf16>
    %c0_18 = arith.constant 0 : index
    %c0_19 = arith.constant 0 : index
    %c0_20 = arith.constant 0 : index
    %23 = vector.load %arg7[%c0_18, %c0_19, %c0_20] : memref<2x16x1xf32, #tpu.memory_space<vmem>>, vector<1x16x1xf32>
    %24 = vector.shape_cast %23 : vector<1x16x1xf32> to vector<16x1xf32>
    %c1 = arith.constant 1 : index
    %c0_21 = arith.constant 0 : index
    %c0_22 = arith.constant 0 : index
    %25 = vector.load %arg7[%c1, %c0_21, %c0_22] : memref<2x16x1xf32, #tpu.memory_space<vmem>>, vector<1x16x1xf32>
    %26 = vector.shape_cast %25 : vector<1x16x1xf32> to vector<16x1xf32>
    %cst_23 = arith.constant 0.000000e+00 : f32
    %27 = vector.broadcast %cst_23 : f32 to vector<16x8xf32>
    %28 = vector.extract_strided_slice %22 {offsets = [3, 0], sizes = [16, 128], strides = [1, 1]} : vector<32x128xbf16> to vector<16x128xbf16>
    %c0_24 = arith.constant 0 : index
    %c0_25 = arith.constant 0 : index
    %c0_26 = arith.constant 0 : index
    %29 = vector.load %arg6[%c0_24, %c0_25, %c0_26] : memref<9x128x8xbf16, #tpu.memory_space<vmem>>, vector<1x128x8xbf16>
    %30 = vector.shape_cast %29 : vector<1x128x8xbf16> to vector<128x8xbf16>
    %cst_27 = arith.constant dense<0.000000e+00> : vector<16x8xf32>
    %31 = tpu.matmul %28, %30, %cst_27 {dimension_numbers = #tpu.dot_dimension_numbers<[1], [0], [0], [1], [0, 0, 1, 1], [], []>} : vector<16x128xbf16>, vector<128x8xbf16>, vector<16x8xf32> -> vector<16x8xf32>
    %32 = vector.broadcast %24 : vector<16x1xf32> to vector<16x8xf32>
    %33 = arith.mulf %31, %32 : vector<16x8xf32>
    %34 = arith.addf %27, %33 : vector<16x8xf32>
    %35 = vector.extract_strided_slice %22 {offsets = [4, 0], sizes = [16, 128], strides = [1, 1]} : vector<32x128xbf16> to vector<16x128xbf16>
    %c1_28 = arith.constant 1 : index
    %c0_29 = arith.constant 0 : index
    %c0_30 = arith.constant 0 : index
    %36 = vector.load %arg6[%c1_28, %c0_29, %c0_30] : memref<9x128x8xbf16, #tpu.memory_space<vmem>>, vector<1x128x8xbf16>
    %37 = vector.shape_cast %36 : vector<1x128x8xbf16> to vector<128x8xbf16>
    %cst_31 = arith.constant dense<0.000000e+00> : vector<16x8xf32>
    %38 = tpu.matmul %35, %37, %cst_31 {dimension_numbers = #tpu.dot_dimension_numbers<[1], [0], [0], [1], [0, 0, 1, 1], [], []>} : vector<16x128xbf16>, vector<128x8xbf16>, vector<16x8xf32> -> vector<16x8xf32>
    %39 = arith.addf %34, %38 : vector<16x8xf32>
    %40 = vector.extract_strided_slice %22 {offsets = [5, 0], sizes = [16, 128], strides = [1, 1]} : vector<32x128xbf16> to vector<16x128xbf16>
    %c2 = arith.constant 2 : index
    %c0_32 = arith.constant 0 : index
    %c0_33 = arith.constant 0 : index
    %41 = vector.load %arg6[%c2, %c0_32, %c0_33] : memref<9x128x8xbf16, #tpu.memory_space<vmem>>, vector<1x128x8xbf16>
    %42 = vector.shape_cast %41 : vector<1x128x8xbf16> to vector<128x8xbf16>
    %cst_34 = arith.constant dense<0.000000e+00> : vector<16x8xf32>
    %43 = tpu.matmul %40, %42, %cst_34 {dimension_numbers = #tpu.dot_dimension_numbers<[1], [0], [0], [1], [0, 0, 1, 1], [], []>} : vector<16x128xbf16>, vector<128x8xbf16>, vector<16x8xf32> -> vector<16x8xf32>
    %44 = vector.broadcast %26 : vector<16x1xf32> to vector<16x8xf32>
    %45 = arith.mulf %43, %44 : vector<16x8xf32>
    %46 = arith.addf %39, %45 : vector<16x8xf32>
    %47 = vector.extract_strided_slice %22 {offsets = [7, 0], sizes = [16, 128], strides = [1, 1]} : vector<32x128xbf16> to vector<16x128xbf16>
    %c3 = arith.constant 3 : index
    %c0_35 = arith.constant 0 : index
    %c0_36 = arith.constant 0 : index
    %48 = vector.load %arg6[%c3, %c0_35, %c0_36] : memref<9x128x8xbf16, #tpu.memory_space<vmem>>, vector<1x128x8xbf16>
    %49 = vector.shape_cast %48 : vector<1x128x8xbf16> to vector<128x8xbf16>
    %cst_37 = arith.constant dense<0.000000e+00> : vector<16x8xf32>
    %50 = tpu.matmul %47, %49, %cst_37 {dimension_numbers = #tpu.dot_dimension_numbers<[1], [0], [0], [1], [0, 0, 1, 1], [], []>} : vector<16x128xbf16>, vector<128x8xbf16>, vector<16x8xf32> -> vector<16x8xf32>
    %51 = vector.broadcast %24 : vector<16x1xf32> to vector<16x8xf32>
    %52 = arith.mulf %50, %51 : vector<16x8xf32>
    %53 = arith.addf %46, %52 : vector<16x8xf32>
    %54 = vector.extract_strided_slice %22 {offsets = [8, 0], sizes = [16, 128], strides = [1, 1]} : vector<32x128xbf16> to vector<16x128xbf16>
    %c4 = arith.constant 4 : index
    %c0_38 = arith.constant 0 : index
    %c0_39 = arith.constant 0 : index
    %55 = vector.load %arg6[%c4, %c0_38, %c0_39] : memref<9x128x8xbf16, #tpu.memory_space<vmem>>, vector<1x128x8xbf16>
    %56 = vector.shape_cast %55 : vector<1x128x8xbf16> to vector<128x8xbf16>
    %cst_40 = arith.constant dense<0.000000e+00> : vector<16x8xf32>
    %57 = tpu.matmul %54, %56, %cst_40 {dimension_numbers = #tpu.dot_dimension_numbers<[1], [0], [0], [1], [0, 0, 1, 1], [], []>} : vector<16x128xbf16>, vector<128x8xbf16>, vector<16x8xf32> -> vector<16x8xf32>
    %58 = arith.addf %53, %57 : vector<16x8xf32>
    %59 = vector.extract_strided_slice %22 {offsets = [9, 0], sizes = [16, 128], strides = [1, 1]} : vector<32x128xbf16> to vector<16x128xbf16>
    %c5 = arith.constant 5 : index
    %c0_41 = arith.constant 0 : index
    %c0_42 = arith.constant 0 : index
    %60 = vector.load %arg6[%c5, %c0_41, %c0_42] : memref<9x128x8xbf16, #tpu.memory_space<vmem>>, vector<1x128x8xbf16>
    %61 = vector.shape_cast %60 : vector<1x128x8xbf16> to vector<128x8xbf16>
    %cst_43 = arith.constant dense<0.000000e+00> : vector<16x8xf32>
    %62 = tpu.matmul %59, %61, %cst_43 {dimension_numbers = #tpu.dot_dimension_numbers<[1], [0], [0], [1], [0, 0, 1, 1], [], []>} : vector<16x128xbf16>, vector<128x8xbf16>, vector<16x8xf32> -> vector<16x8xf32>
    %63 = vector.broadcast %26 : vector<16x1xf32> to vector<16x8xf32>
    %64 = arith.mulf %62, %63 : vector<16x8xf32>
    %65 = arith.addf %58, %64 : vector<16x8xf32>
    %66 = vector.extract_strided_slice %22 {offsets = [11, 0], sizes = [16, 128], strides = [1, 1]} : vector<32x128xbf16> to vector<16x128xbf16>
    %c6 = arith.constant 6 : index
    %c0_44 = arith.constant 0 : index
    %c0_45 = arith.constant 0 : index
    %67 = vector.load %arg6[%c6, %c0_44, %c0_45] : memref<9x128x8xbf16, #tpu.memory_space<vmem>>, vector<1x128x8xbf16>
    %68 = vector.shape_cast %67 : vector<1x128x8xbf16> to vector<128x8xbf16>
    %cst_46 = arith.constant dense<0.000000e+00> : vector<16x8xf32>
    %69 = tpu.matmul %66, %68, %cst_46 {dimension_numbers = #tpu.dot_dimension_numbers<[1], [0], [0], [1], [0, 0, 1, 1], [], []>} : vector<16x128xbf16>, vector<128x8xbf16>, vector<16x8xf32> -> vector<16x8xf32>
    %70 = vector.broadcast %24 : vector<16x1xf32> to vector<16x8xf32>
    %71 = arith.mulf %69, %70 : vector<16x8xf32>
    %72 = arith.addf %65, %71 : vector<16x8xf32>
    %73 = vector.extract_strided_slice %22 {offsets = [12, 0], sizes = [16, 128], strides = [1, 1]} : vector<32x128xbf16> to vector<16x128xbf16>
    %c7 = arith.constant 7 : index
    %c0_47 = arith.constant 0 : index
    %c0_48 = arith.constant 0 : index
    %74 = vector.load %arg6[%c7, %c0_47, %c0_48] : memref<9x128x8xbf16, #tpu.memory_space<vmem>>, vector<1x128x8xbf16>
    %75 = vector.shape_cast %74 : vector<1x128x8xbf16> to vector<128x8xbf16>
    %cst_49 = arith.constant dense<0.000000e+00> : vector<16x8xf32>
    %76 = tpu.matmul %73, %75, %cst_49 {dimension_numbers = #tpu.dot_dimension_numbers<[1], [0], [0], [1], [0, 0, 1, 1], [], []>} : vector<16x128xbf16>, vector<128x8xbf16>, vector<16x8xf32> -> vector<16x8xf32>
    %77 = arith.addf %72, %76 : vector<16x8xf32>
    %78 = vector.extract_strided_slice %22 {offsets = [13, 0], sizes = [16, 128], strides = [1, 1]} : vector<32x128xbf16> to vector<16x128xbf16>
    %c8_50 = arith.constant 8 : index
    %c0_51 = arith.constant 0 : index
    %c0_52 = arith.constant 0 : index
    %79 = vector.load %arg6[%c8_50, %c0_51, %c0_52] : memref<9x128x8xbf16, #tpu.memory_space<vmem>>, vector<1x128x8xbf16>
    %80 = vector.shape_cast %79 : vector<1x128x8xbf16> to vector<128x8xbf16>
    %cst_53 = arith.constant dense<0.000000e+00> : vector<16x8xf32>
    %81 = tpu.matmul %78, %80, %cst_53 {dimension_numbers = #tpu.dot_dimension_numbers<[1], [0], [0], [1], [0, 0, 1, 1], [], []>} : vector<16x128xbf16>, vector<128x8xbf16>, vector<16x8xf32> -> vector<16x8xf32>
    %82 = vector.broadcast %26 : vector<16x1xf32> to vector<16x8xf32>
    %83 = arith.mulf %81, %82 : vector<16x8xf32>
    %84 = arith.addf %77, %83 : vector<16x8xf32>
    %c0_54 = arith.constant 0 : index
    %c0_55 = arith.constant 0 : index
    %c0_56 = arith.constant 0 : index
    %85 = vector.load %arg8[%c0_54, %c0_55, %c0_56] : memref<1x16x8xf32, #tpu.memory_space<vmem>>, vector<1x16x8xf32>
    %86 = vector.shape_cast %85 : vector<1x16x8xf32> to vector<16x8xf32>
    %87 = vector.shape_cast %84 : vector<16x8xf32> to vector<1x16x8xf32>
    tpu.vector_store %arg8[%c0_54, %c0_55, %c0_56], %87 {strides = array<i32>} : memref<1x16x8xf32, #tpu.memory_space<vmem>>, vector<1x16x8xf32>,
    return
  }
  func.func @transform_0(%arg0: i32) -> (i32, i32, i32) {
    %c0_i32 = arith.constant 0 : i32
    %c0_i32_0 = arith.constant 0 : i32
    %c0_i32_1 = arith.constant 0 : i32
    return %arg0, %c0_i32, %c0_i32_0 : i32, i32, i32
  }
  func.func @transform_1(%arg0: i32) -> (i32, i32) {
    %c0_i32 = arith.constant 0 : i32
    %c0_i32_0 = arith.constant 0 : i32
    %c0_i32_1 = arith.constant 0 : i32
    return %c0_i32, %c0_i32_0 : i32, i32
  }
  func.func @transform_2(%arg0: i32) -> (i32, i32) {
    %c0_i32 = arith.constant 0 : i32
    %c0_i32_0 = arith.constant 0 : i32
    %c0_i32_1 = arith.constant 0 : i32
    return %c0_i32, %c0_i32_0 : i32, i32
  }
  func.func @transform_3(%arg0: i32) -> (i32, i32) {
    %c0_i32 = arith.constant 0 : i32
    %c0_i32_0 = arith.constant 0 : i32
    %c0_i32_1 = arith.constant 0 : i32
    return %c0_i32, %c0_i32_0 : i32, i32
  }
  func.func @transform_4(%arg0: i32) -> (i32, i32) {
    %c0_i32 = arith.constant 0 : i32
    %c0_i32_0 = arith.constant 0 : i32
    %c0_i32_1 = arith.constant 0 : i32
    return %c0_i32, %c0_i32_0 : i32, i32
  }
  func.func @transform_5(%arg0: i32) -> (i32, i32, i32) {
    %c0_i32 = arith.constant 0 : i32
    %c0_i32_0 = arith.constant 0 : i32
    %c0_i32_1 = arith.constant 0 : i32
    %c0_i32_2 = arith.constant 0 : i32
    return %c0_i32, %c0_i32_0, %c0_i32_1 : i32, i32, i32
  }
  func.func @transform_6(%arg0: i32) -> (i32, i32, i32) {
    %c0_i32 = arith.constant 0 : i32
    %c0_i32_0 = arith.constant 0 : i32
    %c0_i32_1 = arith.constant 0 : i32
    %c0_i32_2 = arith.constant 0 : i32
    return %c0_i32, %c0_i32_0, %c0_i32_1 : i32, i32, i32
  }
  func.func @transform_7(%arg0: i32) -> (i32, i32, i32) {
    %c0_i32 = arith.constant 0 : i32
    %c0_i32_0 = arith.constant 0 : i32
    %c0_i32_1 = arith.constant 0 : i32
    return %arg0, %c0_i32, %c0_i32_0 : i32, i32, i32
  }
}

module attributes {stable_mosaic.version = 11 : i64} {
  func.func @_transition_kernel(%arg0: i32, %arg1: memref<8x128xf32, #tpu.memory_space<vmem>>, %arg2: memref<8x128xf32, #tpu.memory_space<vmem>>, %arg3: memref<8x128xf32, #tpu.memory_space<vmem>>, %arg4: memref<8x128xf32, #tpu.memory_space<vmem>>, %arg5: memref<1x128xf32, #tpu.memory_space<vmem>>, %arg6: memref<1x128xf32, #tpu.memory_space<vmem>>, %arg7: memref<128x128xbf16, #tpu.memory_space<vmem>>, %arg8: memref<8x128xf32, #tpu.memory_space<vmem>>) attributes {dimension_semantics = [#tpu.dimension_semantics<parallel>], iteration_bounds = array<i64: 1>, scalar_prefetch = 0 : i64, scratch_operands = 0 : i64, tpu.core_type = #tpu.core_type<tc>, window_params = [{transform_indices = @transform_0, window_bounds = array<i64: 8, 128>}, {transform_indices = @transform_1, window_bounds = array<i64: 8, 128>}, {transform_indices = @transform_2, window_bounds = array<i64: 8, 128>}, {transform_indices = @transform_3, window_bounds = array<i64: 8, 128>}, {pipeline_mode = #tpu.pipeline_mode<synchronous>, transform_indices = @transform_4, window_bounds = array<i64: 1, 128>}, {pipeline_mode = #tpu.pipeline_mode<synchronous>, transform_indices = @transform_5, window_bounds = array<i64: 1, 128>}, {pipeline_mode = #tpu.pipeline_mode<synchronous>, transform_indices = @transform_6, window_bounds = array<i64: 128, 128>}, {transform_indices = @transform_7, window_bounds = array<i64: 8, 128>}]} {
    %c0 = arith.constant 0 : index
    %c0_0 = arith.constant 0 : index
    %0 = vector.load %arg5[%c0, %c0_0] : memref<1x128xf32, #tpu.memory_space<vmem>>, vector<1x128xf32>
    %c0_1 = arith.constant 0 : index
    %c0_2 = arith.constant 0 : index
    %1 = vector.load %arg6[%c0_1, %c0_2] : memref<1x128xf32, #tpu.memory_space<vmem>>, vector<1x128xf32>
    %c0_3 = arith.constant 0 : index
    %c0_4 = arith.constant 0 : index
    %2 = vector.load %arg1[%c0_3, %c0_4] : memref<8x128xf32, #tpu.memory_space<vmem>>, vector<8x128xf32>
    %3 = vector.broadcast %0 : vector<1x128xf32> to vector<8x128xf32>
    %4 = arith.mulf %2, %3 : vector<8x128xf32>
    %5 = vector.broadcast %1 : vector<1x128xf32> to vector<8x128xf32>
    %6 = arith.addf %4, %5 : vector<8x128xf32>
    %cst = arith.constant 0.000000e+00 : f32
    %7 = vector.broadcast %cst : f32 to vector<8x128xf32>
    %8 = arith.maximumf %6, %7 : vector<8x128xf32>
    %c0_5 = arith.constant 0 : index
    %c0_6 = arith.constant 0 : index
    %9 = vector.load %arg2[%c0_5, %c0_6] : memref<8x128xf32, #tpu.memory_space<vmem>>, vector<8x128xf32>
    %10 = vector.broadcast %0 : vector<1x128xf32> to vector<8x128xf32>
    %11 = arith.mulf %9, %10 : vector<8x128xf32>
    %12 = vector.broadcast %1 : vector<1x128xf32> to vector<8x128xf32>
    %13 = arith.addf %11, %12 : vector<8x128xf32>
    %cst_7 = arith.constant 0.000000e+00 : f32
    %14 = vector.broadcast %cst_7 : f32 to vector<8x128xf32>
    %15 = arith.maximumf %13, %14 : vector<8x128xf32>
    %16 = arith.addf %8, %15 : vector<8x128xf32>
    %c0_8 = arith.constant 0 : index
    %c0_9 = arith.constant 0 : index
    %17 = vector.load %arg3[%c0_8, %c0_9] : memref<8x128xf32, #tpu.memory_space<vmem>>, vector<8x128xf32>
    %18 = vector.broadcast %0 : vector<1x128xf32> to vector<8x128xf32>
    %19 = arith.mulf %17, %18 : vector<8x128xf32>
    %20 = vector.broadcast %1 : vector<1x128xf32> to vector<8x128xf32>
    %21 = arith.addf %19, %20 : vector<8x128xf32>
    %cst_10 = arith.constant 0.000000e+00 : f32
    %22 = vector.broadcast %cst_10 : f32 to vector<8x128xf32>
    %23 = arith.maximumf %21, %22 : vector<8x128xf32>
    %24 = arith.addf %16, %23 : vector<8x128xf32>
    %c0_11 = arith.constant 0 : index
    %c0_12 = arith.constant 0 : index
    %25 = vector.load %arg4[%c0_11, %c0_12] : memref<8x128xf32, #tpu.memory_space<vmem>>, vector<8x128xf32>
    %26 = vector.broadcast %0 : vector<1x128xf32> to vector<8x128xf32>
    %27 = arith.mulf %25, %26 : vector<8x128xf32>
    %28 = vector.broadcast %1 : vector<1x128xf32> to vector<8x128xf32>
    %29 = arith.addf %27, %28 : vector<8x128xf32>
    %cst_13 = arith.constant 0.000000e+00 : f32
    %30 = vector.broadcast %cst_13 : f32 to vector<8x128xf32>
    %31 = arith.maximumf %29, %30 : vector<8x128xf32>
    %32 = arith.addf %24, %31 : vector<8x128xf32>
    %cst_14 = arith.constant 2.500000e-01 : f32
    %33 = vector.broadcast %cst_14 : f32 to vector<8x128xf32>
    %34 = arith.mulf %33, %32 : vector<8x128xf32>
    %35 = arith.truncf %34 : vector<8x128xf32> to vector<8x128xbf16>
    %c0_15 = arith.constant 0 : index
    %c0_16 = arith.constant 0 : index
    %36 = vector.load %arg7[%c0_15, %c0_16] : memref<128x128xbf16, #tpu.memory_space<vmem>>, vector<128x128xbf16>
    %cst_17 = arith.constant dense<0.000000e+00> : vector<8x128xf32>
    %37 = tpu.matmul %35, %36, %cst_17 {dimension_numbers = #tpu.dot_dimension_numbers<[1], [0], [0], [1], [0, 0, 1, 1], [], []>} : vector<8x128xbf16>, vector<128x128xbf16>, vector<8x128xf32> -> vector<8x128xf32>
    %c0_18 = arith.constant 0 : index
    %c0_19 = arith.constant 0 : index
    %38 = vector.load %arg8[%c0_18, %c0_19] : memref<8x128xf32, #tpu.memory_space<vmem>>, vector<8x128xf32>
    tpu.vector_store %arg8[%c0_18, %c0_19], %37 {strides = array<i32>} : memref<8x128xf32, #tpu.memory_space<vmem>>, vector<8x128xf32>,
    return
  }
  func.func @transform_0(%arg0: i32) -> (i32, i32) {
    %c0_i32 = arith.constant 0 : i32
    %c0_i32_0 = arith.constant 0 : i32
    return %arg0, %c0_i32 : i32, i32
  }
  func.func @transform_1(%arg0: i32) -> (i32, i32) {
    %c0_i32 = arith.constant 0 : i32
    %c0_i32_0 = arith.constant 0 : i32
    return %arg0, %c0_i32 : i32, i32
  }
  func.func @transform_2(%arg0: i32) -> (i32, i32) {
    %c0_i32 = arith.constant 0 : i32
    %c0_i32_0 = arith.constant 0 : i32
    return %arg0, %c0_i32 : i32, i32
  }
  func.func @transform_3(%arg0: i32) -> (i32, i32) {
    %c0_i32 = arith.constant 0 : i32
    %c0_i32_0 = arith.constant 0 : i32
    return %arg0, %c0_i32 : i32, i32
  }
  func.func @transform_4(%arg0: i32) -> (i32, i32) {
    %c0_i32 = arith.constant 0 : i32
    %c0_i32_0 = arith.constant 0 : i32
    %c0_i32_1 = arith.constant 0 : i32
    return %c0_i32, %c0_i32_0 : i32, i32
  }
  func.func @transform_5(%arg0: i32) -> (i32, i32) {
    %c0_i32 = arith.constant 0 : i32
    %c0_i32_0 = arith.constant 0 : i32
    %c0_i32_1 = arith.constant 0 : i32
    return %c0_i32, %c0_i32_0 : i32, i32
  }
  func.func @transform_6(%arg0: i32) -> (i32, i32) {
    %c0_i32 = arith.constant 0 : i32
    %c0_i32_0 = arith.constant 0 : i32
    %c0_i32_1 = arith.constant 0 : i32
    return %c0_i32, %c0_i32_0 : i32, i32
  }
  func.func @transform_7(%arg0: i32) -> (i32, i32) {
    %c0_i32 = arith.constant 0 : i32
    %c0_i32_0 = arith.constant 0 : i32
    return %arg0, %c0_i32 : i32, i32
  }
}

module attributes {stable_mosaic.version = 11 : i64} {
  func.func @_dense_layer_kernel(%arg0: i32, %arg1: memref<1x4x128xf32, #tpu.memory_space<vmem>>, %arg2: memref<1x128xf32, #tpu.memory_space<vmem>>, %arg3: memref<1x128xf32, #tpu.memory_space<vmem>>, %arg4: memref<128x128xbf16, #tpu.memory_space<vmem>>, %arg5: memref<1x128xf32, #tpu.memory_space<vmem>>, %arg6: memref<9x128x8xbf16, #tpu.memory_space<vmem>>, %arg7: memref<2x4x1xf32, #tpu.memory_space<vmem>>, %arg8: memref<1x4x8xf32, #tpu.memory_space<vmem>>, %arg9: memref<20x128xbf16, #tpu.memory_space<vmem>>) attributes {dimension_semantics = [#tpu.dimension_semantics<parallel>], iteration_bounds = array<i64: 2>, scalar_prefetch = 0 : i64, scratch_operands = 1 : i64, tpu.core_type = #tpu.core_type<tc>, window_params = [{transform_indices = @transform_0, window_bounds = array<i64: 1, 4, 128>}, {pipeline_mode = #tpu.pipeline_mode<synchronous>, transform_indices = @transform_1, window_bounds = array<i64: 1, 128>}, {pipeline_mode = #tpu.pipeline_mode<synchronous>, transform_indices = @transform_2, window_bounds = array<i64: 1, 128>}, {pipeline_mode = #tpu.pipeline_mode<synchronous>, transform_indices = @transform_3, window_bounds = array<i64: 128, 128>}, {pipeline_mode = #tpu.pipeline_mode<synchronous>, transform_indices = @transform_4, window_bounds = array<i64: 1, 128>}, {pipeline_mode = #tpu.pipeline_mode<synchronous>, transform_indices = @transform_5, window_bounds = array<i64: 9, 128, 8>}, {pipeline_mode = #tpu.pipeline_mode<synchronous>, transform_indices = @transform_6, window_bounds = array<i64: 2, 4, 1>}, {transform_indices = @transform_7, window_bounds = array<i64: 1, 4, 8>}]} {
    %c0 = arith.constant 0 : index
    %c0_0 = arith.constant 0 : index
    %c0_1 = arith.constant 0 : index
    %0 = vector.load %arg1[%c0, %c0_0, %c0_1] : memref<1x4x128xf32, #tpu.memory_space<vmem>>, vector<1x4x128xf32>
    %1 = vector.shape_cast %0 : vector<1x4x128xf32> to vector<4x128xf32>
    %c0_2 = arith.constant 0 : index
    %c0_3 = arith.constant 0 : index
    %2 = vector.load %arg2[%c0_2, %c0_3] : memref<1x128xf32, #tpu.memory_space<vmem>>, vector<1x128xf32>
    %3 = vector.broadcast %2 : vector<1x128xf32> to vector<4x128xf32>
    %4 = arith.mulf %1, %3 : vector<4x128xf32>
    %c0_4 = arith.constant 0 : index
    %c0_5 = arith.constant 0 : index
    %5 = vector.load %arg3[%c0_4, %c0_5] : memref<1x128xf32, #tpu.memory_space<vmem>>, vector<1x128xf32>
    %6 = vector.broadcast %5 : vector<1x128xf32> to vector<4x128xf32>
    %7 = arith.addf %4, %6 : vector<4x128xf32>
    %cst = arith.constant 0.000000e+00 : f32
    %8 = vector.broadcast %cst : f32 to vector<4x128xf32>
    %9 = arith.maximumf %7, %8 : vector<4x128xf32>
    %10 = arith.truncf %9 : vector<4x128xf32> to vector<4x128xbf16>
    %c0_6 = arith.constant 0 : index
    %c0_7 = arith.constant 0 : index
    %11 = vector.load %arg4[%c0_6, %c0_7] : memref<128x128xbf16, #tpu.memory_space<vmem>>, vector<128x128xbf16>
    %cst_8 = arith.constant dense<0.000000e+00> : vector<4x128xf32>
    %12 = tpu.matmul %10, %11, %cst_8 {dimension_numbers = #tpu.dot_dimension_numbers<[1], [0], [0], [1], [0, 0, 1, 1], [], []>} : vector<4x128xbf16>, vector<128x128xbf16>, vector<4x128xf32> -> vector<4x128xf32>
    %c0_9 = arith.constant 0 : index
    %c0_10 = arith.constant 0 : index
    %13 = vector.load %arg5[%c0_9, %c0_10] : memref<1x128xf32, #tpu.memory_space<vmem>>, vector<1x128xf32>
    %14 = vector.broadcast %13 : vector<1x128xf32> to vector<4x128xf32>
    %15 = arith.addf %12, %14 : vector<4x128xf32>
    %cst_11 = arith.constant 0.000000e+00 : f32
    %16 = vector.broadcast %cst_11 : f32 to vector<4x128xf32>
    %17 = arith.maximumf %15, %16 : vector<4x128xf32>
    %18 = arith.truncf %17 : vector<4x128xf32> to vector<4x128xbf16>
    %cst_12 = arith.constant 0.000000e+00 : bf16
    %19 = vector.broadcast %cst_12 : bf16 to vector<20x128xbf16>
    %c0_13 = arith.constant 0 : index
    %c0_14 = arith.constant 0 : index
    %20 = vector.load %arg9[%c0_13, %c0_14] : memref<20x128xbf16, #tpu.memory_space<vmem>>, vector<20x128xbf16>
    tpu.vector_store %arg9[%c0_13, %c0_14], %19 {strides = array<i32>} : memref<20x128xbf16, #tpu.memory_space<vmem>>, vector<20x128xbf16>,
    %c8 = arith.constant 8 : index
    %c0_15 = arith.constant 0 : index
    %21 = vector.load %arg9[%c8, %c0_15] : memref<20x128xbf16, #tpu.memory_space<vmem>>, vector<4x128xbf16>
    tpu.vector_store %arg9[%c8, %c0_15], %18 {strides = array<i32>} : memref<20x128xbf16, #tpu.memory_space<vmem>>, vector<4x128xbf16>,
    %c0_16 = arith.constant 0 : index
    %c0_17 = arith.constant 0 : index
    %22 = vector.load %arg9[%c0_16, %c0_17] : memref<20x128xbf16, #tpu.memory_space<vmem>>, vector<20x128xbf16>
    %c0_18 = arith.constant 0 : index
    %c0_19 = arith.constant 0 : index
    %c0_20 = arith.constant 0 : index
    %23 = vector.load %arg7[%c0_18, %c0_19, %c0_20] : memref<2x4x1xf32, #tpu.memory_space<vmem>>, vector<1x4x1xf32>
    %24 = vector.shape_cast %23 : vector<1x4x1xf32> to vector<4x1xf32>
    %c1 = arith.constant 1 : index
    %c0_21 = arith.constant 0 : index
    %c0_22 = arith.constant 0 : index
    %25 = vector.load %arg7[%c1, %c0_21, %c0_22] : memref<2x4x1xf32, #tpu.memory_space<vmem>>, vector<1x4x1xf32>
    %26 = vector.shape_cast %25 : vector<1x4x1xf32> to vector<4x1xf32>
    %cst_23 = arith.constant 0.000000e+00 : f32
    %27 = vector.broadcast %cst_23 : f32 to vector<4x8xf32>
    %28 = vector.extract_strided_slice %22 {offsets = [5, 0], sizes = [4, 128], strides = [1, 1]} : vector<20x128xbf16> to vector<4x128xbf16>
    %c0_24 = arith.constant 0 : index
    %c0_25 = arith.constant 0 : index
    %c0_26 = arith.constant 0 : index
    %29 = vector.load %arg6[%c0_24, %c0_25, %c0_26] : memref<9x128x8xbf16, #tpu.memory_space<vmem>>, vector<1x128x8xbf16>
    %30 = vector.shape_cast %29 : vector<1x128x8xbf16> to vector<128x8xbf16>
    %cst_27 = arith.constant dense<0.000000e+00> : vector<4x8xf32>
    %31 = tpu.matmul %28, %30, %cst_27 {dimension_numbers = #tpu.dot_dimension_numbers<[1], [0], [0], [1], [0, 0, 1, 1], [], []>} : vector<4x128xbf16>, vector<128x8xbf16>, vector<4x8xf32> -> vector<4x8xf32>
    %32 = vector.broadcast %24 : vector<4x1xf32> to vector<4x8xf32>
    %33 = arith.mulf %31, %32 : vector<4x8xf32>
    %34 = arith.addf %27, %33 : vector<4x8xf32>
    %35 = vector.extract_strided_slice %22 {offsets = [6, 0], sizes = [4, 128], strides = [1, 1]} : vector<20x128xbf16> to vector<4x128xbf16>
    %c1_28 = arith.constant 1 : index
    %c0_29 = arith.constant 0 : index
    %c0_30 = arith.constant 0 : index
    %36 = vector.load %arg6[%c1_28, %c0_29, %c0_30] : memref<9x128x8xbf16, #tpu.memory_space<vmem>>, vector<1x128x8xbf16>
    %37 = vector.shape_cast %36 : vector<1x128x8xbf16> to vector<128x8xbf16>
    %cst_31 = arith.constant dense<0.000000e+00> : vector<4x8xf32>
    %38 = tpu.matmul %35, %37, %cst_31 {dimension_numbers = #tpu.dot_dimension_numbers<[1], [0], [0], [1], [0, 0, 1, 1], [], []>} : vector<4x128xbf16>, vector<128x8xbf16>, vector<4x8xf32> -> vector<4x8xf32>
    %39 = arith.addf %34, %38 : vector<4x8xf32>
    %40 = vector.extract_strided_slice %22 {offsets = [7, 0], sizes = [4, 128], strides = [1, 1]} : vector<20x128xbf16> to vector<4x128xbf16>
    %c2 = arith.constant 2 : index
    %c0_32 = arith.constant 0 : index
    %c0_33 = arith.constant 0 : index
    %41 = vector.load %arg6[%c2, %c0_32, %c0_33] : memref<9x128x8xbf16, #tpu.memory_space<vmem>>, vector<1x128x8xbf16>
    %42 = vector.shape_cast %41 : vector<1x128x8xbf16> to vector<128x8xbf16>
    %cst_34 = arith.constant dense<0.000000e+00> : vector<4x8xf32>
    %43 = tpu.matmul %40, %42, %cst_34 {dimension_numbers = #tpu.dot_dimension_numbers<[1], [0], [0], [1], [0, 0, 1, 1], [], []>} : vector<4x128xbf16>, vector<128x8xbf16>, vector<4x8xf32> -> vector<4x8xf32>
    %44 = vector.broadcast %26 : vector<4x1xf32> to vector<4x8xf32>
    %45 = arith.mulf %43, %44 : vector<4x8xf32>
    %46 = arith.addf %39, %45 : vector<4x8xf32>
    %47 = vector.extract_strided_slice %22 {offsets = [7, 0], sizes = [4, 128], strides = [1, 1]} : vector<20x128xbf16> to vector<4x128xbf16>
    %c3 = arith.constant 3 : index
    %c0_35 = arith.constant 0 : index
    %c0_36 = arith.constant 0 : index
    %48 = vector.load %arg6[%c3, %c0_35, %c0_36] : memref<9x128x8xbf16, #tpu.memory_space<vmem>>, vector<1x128x8xbf16>
    %49 = vector.shape_cast %48 : vector<1x128x8xbf16> to vector<128x8xbf16>
    %cst_37 = arith.constant dense<0.000000e+00> : vector<4x8xf32>
    %50 = tpu.matmul %47, %49, %cst_37 {dimension_numbers = #tpu.dot_dimension_numbers<[1], [0], [0], [1], [0, 0, 1, 1], [], []>} : vector<4x128xbf16>, vector<128x8xbf16>, vector<4x8xf32> -> vector<4x8xf32>
    %51 = vector.broadcast %24 : vector<4x1xf32> to vector<4x8xf32>
    %52 = arith.mulf %50, %51 : vector<4x8xf32>
    %53 = arith.addf %46, %52 : vector<4x8xf32>
    %54 = vector.extract_strided_slice %22 {offsets = [8, 0], sizes = [4, 128], strides = [1, 1]} : vector<20x128xbf16> to vector<4x128xbf16>
    %c4 = arith.constant 4 : index
    %c0_38 = arith.constant 0 : index
    %c0_39 = arith.constant 0 : index
    %55 = vector.load %arg6[%c4, %c0_38, %c0_39] : memref<9x128x8xbf16, #tpu.memory_space<vmem>>, vector<1x128x8xbf16>
    %56 = vector.shape_cast %55 : vector<1x128x8xbf16> to vector<128x8xbf16>
    %cst_40 = arith.constant dense<0.000000e+00> : vector<4x8xf32>
    %57 = tpu.matmul %54, %56, %cst_40 {dimension_numbers = #tpu.dot_dimension_numbers<[1], [0], [0], [1], [0, 0, 1, 1], [], []>} : vector<4x128xbf16>, vector<128x8xbf16>, vector<4x8xf32> -> vector<4x8xf32>
    %58 = arith.addf %53, %57 : vector<4x8xf32>
    %59 = vector.extract_strided_slice %22 {offsets = [9, 0], sizes = [4, 128], strides = [1, 1]} : vector<20x128xbf16> to vector<4x128xbf16>
    %c5 = arith.constant 5 : index
    %c0_41 = arith.constant 0 : index
    %c0_42 = arith.constant 0 : index
    %60 = vector.load %arg6[%c5, %c0_41, %c0_42] : memref<9x128x8xbf16, #tpu.memory_space<vmem>>, vector<1x128x8xbf16>
    %61 = vector.shape_cast %60 : vector<1x128x8xbf16> to vector<128x8xbf16>
    %cst_43 = arith.constant dense<0.000000e+00> : vector<4x8xf32>
    %62 = tpu.matmul %59, %61, %cst_43 {dimension_numbers = #tpu.dot_dimension_numbers<[1], [0], [0], [1], [0, 0, 1, 1], [], []>} : vector<4x128xbf16>, vector<128x8xbf16>, vector<4x8xf32> -> vector<4x8xf32>
    %63 = vector.broadcast %26 : vector<4x1xf32> to vector<4x8xf32>
    %64 = arith.mulf %62, %63 : vector<4x8xf32>
    %65 = arith.addf %58, %64 : vector<4x8xf32>
    %66 = vector.extract_strided_slice %22 {offsets = [9, 0], sizes = [4, 128], strides = [1, 1]} : vector<20x128xbf16> to vector<4x128xbf16>
    %c6 = arith.constant 6 : index
    %c0_44 = arith.constant 0 : index
    %c0_45 = arith.constant 0 : index
    %67 = vector.load %arg6[%c6, %c0_44, %c0_45] : memref<9x128x8xbf16, #tpu.memory_space<vmem>>, vector<1x128x8xbf16>
    %68 = vector.shape_cast %67 : vector<1x128x8xbf16> to vector<128x8xbf16>
    %cst_46 = arith.constant dense<0.000000e+00> : vector<4x8xf32>
    %69 = tpu.matmul %66, %68, %cst_46 {dimension_numbers = #tpu.dot_dimension_numbers<[1], [0], [0], [1], [0, 0, 1, 1], [], []>} : vector<4x128xbf16>, vector<128x8xbf16>, vector<4x8xf32> -> vector<4x8xf32>
    %70 = vector.broadcast %24 : vector<4x1xf32> to vector<4x8xf32>
    %71 = arith.mulf %69, %70 : vector<4x8xf32>
    %72 = arith.addf %65, %71 : vector<4x8xf32>
    %73 = vector.extract_strided_slice %22 {offsets = [10, 0], sizes = [4, 128], strides = [1, 1]} : vector<20x128xbf16> to vector<4x128xbf16>
    %c7 = arith.constant 7 : index
    %c0_47 = arith.constant 0 : index
    %c0_48 = arith.constant 0 : index
    %74 = vector.load %arg6[%c7, %c0_47, %c0_48] : memref<9x128x8xbf16, #tpu.memory_space<vmem>>, vector<1x128x8xbf16>
    %75 = vector.shape_cast %74 : vector<1x128x8xbf16> to vector<128x8xbf16>
    %cst_49 = arith.constant dense<0.000000e+00> : vector<4x8xf32>
    %76 = tpu.matmul %73, %75, %cst_49 {dimension_numbers = #tpu.dot_dimension_numbers<[1], [0], [0], [1], [0, 0, 1, 1], [], []>} : vector<4x128xbf16>, vector<128x8xbf16>, vector<4x8xf32> -> vector<4x8xf32>
    %77 = arith.addf %72, %76 : vector<4x8xf32>
    %78 = vector.extract_strided_slice %22 {offsets = [11, 0], sizes = [4, 128], strides = [1, 1]} : vector<20x128xbf16> to vector<4x128xbf16>
    %c8_50 = arith.constant 8 : index
    %c0_51 = arith.constant 0 : index
    %c0_52 = arith.constant 0 : index
    %79 = vector.load %arg6[%c8_50, %c0_51, %c0_52] : memref<9x128x8xbf16, #tpu.memory_space<vmem>>, vector<1x128x8xbf16>
    %80 = vector.shape_cast %79 : vector<1x128x8xbf16> to vector<128x8xbf16>
    %cst_53 = arith.constant dense<0.000000e+00> : vector<4x8xf32>
    %81 = tpu.matmul %78, %80, %cst_53 {dimension_numbers = #tpu.dot_dimension_numbers<[1], [0], [0], [1], [0, 0, 1, 1], [], []>} : vector<4x128xbf16>, vector<128x8xbf16>, vector<4x8xf32> -> vector<4x8xf32>
    %82 = vector.broadcast %26 : vector<4x1xf32> to vector<4x8xf32>
    %83 = arith.mulf %81, %82 : vector<4x8xf32>
    %84 = arith.addf %77, %83 : vector<4x8xf32>
    %c0_54 = arith.constant 0 : index
    %c0_55 = arith.constant 0 : index
    %c0_56 = arith.constant 0 : index
    %85 = vector.load %arg8[%c0_54, %c0_55, %c0_56] : memref<1x4x8xf32, #tpu.memory_space<vmem>>, vector<1x4x8xf32>
    %86 = vector.shape_cast %85 : vector<1x4x8xf32> to vector<4x8xf32>
    %87 = vector.shape_cast %84 : vector<4x8xf32> to vector<1x4x8xf32>
    tpu.vector_store %arg8[%c0_54, %c0_55, %c0_56], %87 {strides = array<i32>} : memref<1x4x8xf32, #tpu.memory_space<vmem>>, vector<1x4x8xf32>,
    return
  }
  func.func @transform_0(%arg0: i32) -> (i32, i32, i32) {
    %c0_i32 = arith.constant 0 : i32
    %c0_i32_0 = arith.constant 0 : i32
    %c0_i32_1 = arith.constant 0 : i32
    return %arg0, %c0_i32, %c0_i32_0 : i32, i32, i32
  }
  func.func @transform_1(%arg0: i32) -> (i32, i32) {
    %c0_i32 = arith.constant 0 : i32
    %c0_i32_0 = arith.constant 0 : i32
    %c0_i32_1 = arith.constant 0 : i32
    return %c0_i32, %c0_i32_0 : i32, i32
  }
  func.func @transform_2(%arg0: i32) -> (i32, i32) {
    %c0_i32 = arith.constant 0 : i32
    %c0_i32_0 = arith.constant 0 : i32
    %c0_i32_1 = arith.constant 0 : i32
    return %c0_i32, %c0_i32_0 : i32, i32
  }
  func.func @transform_3(%arg0: i32) -> (i32, i32) {
    %c0_i32 = arith.constant 0 : i32
    %c0_i32_0 = arith.constant 0 : i32
    %c0_i32_1 = arith.constant 0 : i32
    return %c0_i32, %c0_i32_0 : i32, i32
  }
  func.func @transform_4(%arg0: i32) -> (i32, i32) {
    %c0_i32 = arith.constant 0 : i32
    %c0_i32_0 = arith.constant 0 : i32
    %c0_i32_1 = arith.constant 0 : i32
    return %c0_i32, %c0_i32_0 : i32, i32
  }
  func.func @transform_5(%arg0: i32) -> (i32, i32, i32) {
    %c0_i32 = arith.constant 0 : i32
    %c0_i32_0 = arith.constant 0 : i32
    %c0_i32_1 = arith.constant 0 : i32
    %c0_i32_2 = arith.constant 0 : i32
    return %c0_i32, %c0_i32_0, %c0_i32_1 : i32, i32, i32
  }
  func.func @transform_6(%arg0: i32) -> (i32, i32, i32) {
    %c0_i32 = arith.constant 0 : i32
    %c0_i32_0 = arith.constant 0 : i32
    %c0_i32_1 = arith.constant 0 : i32
    %c0_i32_2 = arith.constant 0 : i32
    return %c0_i32, %c0_i32_0, %c0_i32_1 : i32, i32, i32
  }
  func.func @transform_7(%arg0: i32) -> (i32, i32, i32) {
    %c0_i32 = arith.constant 0 : i32
    %c0_i32_0 = arith.constant 0 : i32
    %c0_i32_1 = arith.constant 0 : i32
    return %arg0, %c0_i32, %c0_i32_0 : i32, i32, i32
  }
}

module attributes {stable_mosaic.version = 11 : i64} {
  func.func @_gap_fc_kernel(%arg0: i32, %arg1: memref<2x4x128xf32, #tpu.memory_space<vmem>>, %arg2: memref<128x10xbf16, #tpu.memory_space<vmem>>, %arg3: memref<1x10xf32, #tpu.memory_space<vmem>>, %arg4: memref<2x10xf32, #tpu.memory_space<vmem>>) attributes {dimension_semantics = [#tpu.dimension_semantics<arbitrary>], iteration_bounds = array<i64: 1>, scalar_prefetch = 0 : i64, scratch_operands = 0 : i64, tpu.core_type = #tpu.core_type<tc>, window_params = [{pipeline_mode = #tpu.pipeline_mode<synchronous>, transform_indices = @transform_0, window_bounds = array<i64: 2, 4, 128>}, {pipeline_mode = #tpu.pipeline_mode<synchronous>, transform_indices = @transform_1, window_bounds = array<i64: 128, 10>}, {pipeline_mode = #tpu.pipeline_mode<synchronous>, transform_indices = @transform_2, window_bounds = array<i64: 1, 10>}, {pipeline_mode = #tpu.pipeline_mode<synchronous>, transform_indices = @transform_3, window_bounds = array<i64: 2, 10>}]} {
    %c0 = arith.constant 0 : index
    %c0_0 = arith.constant 0 : index
    %c0_1 = arith.constant 0 : index
    %0 = vector.load %arg1[%c0, %c0_0, %c0_1] : memref<2x4x128xf32, #tpu.memory_space<vmem>>, vector<2x4x128xf32>
    %cst = arith.constant dense<0.000000e+00> : vector<2x128xf32>
    %1 = vector.multi_reduction <add>, %0, %cst [1] : vector<2x4x128xf32> to vector<2x128xf32>
    %cst_2 = arith.constant 4.000000e+00 : f32
    %2 = vector.broadcast %cst_2 : f32 to vector<2x128xf32>
    %3 = arith.divf %1, %2 : vector<2x128xf32>
    %4 = arith.truncf %3 : vector<2x128xf32> to vector<2x128xbf16>
    %c0_3 = arith.constant 0 : index
    %c0_4 = arith.constant 0 : index
    %5 = vector.load %arg2[%c0_3, %c0_4] : memref<128x10xbf16, #tpu.memory_space<vmem>>, vector<128x10xbf16>
    %cst_5 = arith.constant dense<0.000000e+00> : vector<2x10xf32>
    %6 = tpu.matmul %4, %5, %cst_5 {dimension_numbers = #tpu.dot_dimension_numbers<[1], [0], [0], [1], [0, 0, 1, 1], [], []>} : vector<2x128xbf16>, vector<128x10xbf16>, vector<2x10xf32> -> vector<2x10xf32>
    %c0_6 = arith.constant 0 : index
    %c0_7 = arith.constant 0 : index
    %7 = vector.load %arg3[%c0_6, %c0_7] : memref<1x10xf32, #tpu.memory_space<vmem>>, vector<1x10xf32>
    %8 = vector.broadcast %7 : vector<1x10xf32> to vector<2x10xf32>
    %9 = arith.addf %6, %8 : vector<2x10xf32>
    %c0_8 = arith.constant 0 : index
    %c0_9 = arith.constant 0 : index
    %10 = vector.load %arg4[%c0_8, %c0_9] : memref<2x10xf32, #tpu.memory_space<vmem>>, vector<2x10xf32>
    tpu.vector_store %arg4[%c0_8, %c0_9], %9 {strides = array<i32>} : memref<2x10xf32, #tpu.memory_space<vmem>>, vector<2x10xf32>,
    return
  }
  func.func @transform_0(%arg0: i32) -> (i32, i32, i32) {
    %c0_i32 = arith.constant 0 : i32
    %c0_i32_0 = arith.constant 0 : i32
    %c0_i32_1 = arith.constant 0 : i32
    %c0_i32_2 = arith.constant 0 : i32
    return %c0_i32, %c0_i32_0, %c0_i32_1 : i32, i32, i32
  }
  func.func @transform_1(%arg0: i32) -> (i32, i32) {
    %c0_i32 = arith.constant 0 : i32
    %c0_i32_0 = arith.constant 0 : i32
    %c0_i32_1 = arith.constant 0 : i32
    return %c0_i32, %c0_i32_0 : i32, i32
  }
  func.func @transform_2(%arg0: i32) -> (i32, i32) {
    %c0_i32 = arith.constant 0 : i32
    %c0_i32_0 = arith.constant 0 : i32
    %c0_i32_1 = arith.constant 0 : i32
    return %c0_i32, %c0_i32_0 : i32, i32
  }
  func.func @transform_3(%arg0: i32) -> (i32, i32) {
    %c0_i32 = arith.constant 0 : i32
    %c0_i32_0 = arith.constant 0 : i32
    %c0_i32_1 = arith.constant 0 : i32
    return %c0_i32, %c0_i32_0 : i32, i32
  }
}

</mosaic_0001>

<bundles_post_ra>
// kernel: densenet_forward.12
= control target key start
LH: loop header
LB: loop body
LE: loop exit
PB: predicated region body
PF: predicated region fallthrough
CT: control target
= control target key end

     0   :  { %s631_s15 = smov 0   ;;  %s778_s0 = inlined_call_operand.vmem [shape: f32[2,9,9,128], index: 0, kind: input, shape index: {}]   ;;  %s779_s1 = inlined_call_operand.vmem [shape: f32[2,9,9,128], index: 1, kind: input, shape index: {}]   ;;  %s780_s2 = inlined_call_operand.vmem [shape: f32[2,9,9,128], index: 2, kind: input, shape index: {}]   ;;  %s781_s3 = inlined_call_operand.vmem [shape: f32[2,9,9,128], index: 3, kind: input, shape index: {}]   ;;  %s782_s4 = inlined_call_operand.vmem [shape: f32[2,8,8,128], index: 4, kind: output, shape index: {}]  }
   0x1 LB: > { %s575_s16 = sadd.s32 4294967295, %s604_s15   ;;  %p579_p0 = scmp.ge.s32.totalorder %s604_s15, 1  ;;  %s604_s15 = sphi %s631_s15, %s14_s15  }
   0x2   : > { %p192_p1 = scmp.lt.s32.totalorder %s604_s15, 3 }
   0x4   : > { %p193_p2 = pnand %p579_p0, %p192_p1 }
   0x5   : > { %p233_p3 = scmp.lt.s32.totalorder (!%p193_p2), %s575_s16, 1 }
   0x6   : > { %196 = sbr.rel (%p193_p2) target bundleno = 56 (0x38), region = 36 }
   0xb   : > { %s784_s16 = smov (!%p233_p3, %s575_s16), 1  ;;  %vm325_vm0 = vcmask 1046528  }
   0xc   : > { %s642_s17 = smul.u32 144, %s784_s16  ;;  %s588_s30 = sshll.u32 %s784_s16, 6 }
   0xd   : > { %s736_s7 = scalar_lea.vmem %s782_s4, %s588_s30 }
   0xe   : > { %s648_s20 = scalar_lea.vmem %s778_s0, %s642_s17  ;;  %s654_s23 = scalar_lea.vmem %s780_s2, %s642_s17 }
   0xf   : > { %v258_v0 = vld [vmem:[%s648_s20] sm:$0xff]  ;;  %v259_v1 = vld [vmem:[%s648_s20 + $0x8] sm:$0x1]  ;;  %v260_v2 = vld [vmem:[%s648_s20 + $0x10] sm:$0xff]  ;;  %s672_s26 = scalar_lea.vmem %s779_s1, %s642_s17  ;;  %s717_s29 = scalar_lea.vmem %s781_s3, %s642_s17 }
  0x10   : > { %v261_v3 = vld [vmem:[%s648_s20 + $0x18] sm:$0x1]  ;;  %v326_v4 = vrot.slane %v258_v0, 1  ;;  %v327_v5 = vrot.slane %v259_v1, 1  ;;  %v661_v6 = vld [vmem:[%s654_s23] sm:$0xff]  ;;  %v329_v8 = vrot.slane %v260_v2, 1 }
  0x11   : > { %v286_v7 = vld [vmem:[%s654_s23 + $0x8] sm:$0x1]  ;;  %v330_v9 = vrot.slane %v261_v3, 1  ;;  %v428_v11 = vrot.slane %v661_v6, 1  ;;  %v262_v13 = vld [vmem:[%s648_s20 + $0x20] sm:$0xff]  ;;  %v676_v17 = vld [vmem:[%s654_s23 + $0x10] sm:$0xff] }
  0x12   : > { %v328_v10 = vsel %vm325_vm0, %v326_v4, %v327_v5  ;;  %v429_v12 = vrot.slane %v286_v7, 1  ;;  %v263_v14 = vld [vmem:[%s648_s20 + $0x28] sm:$0x1]  ;;  %v288_v18 = vld [vmem:[%s654_s23 + $0x18] sm:$0x1]  ;;  %v332_v19 = vrot.slane %v262_v13, 1 }
  0x13   : > { %v331_v15 = vsel %vm325_vm0, %v329_v8, %v330_v9  ;;  %v358_v16 = vmax.f32 %v258_v0, %v328_v10  ;;  %v333_v20 = vrot.slane %v263_v14, 1  ;;  %v431_v23 = vrot.slane %v676_v17, 1  ;;  %v264_v25 = vld [vmem:[%s648_s20 + $0x30] sm:$0xff]  ;;  %v265_v26 = vld [vmem:[%s648_s20 + $0x38] sm:$0x1]  ;;  %v687_v29 = vld [vmem:[%s654_s23 + $0x20] sm:$0xff] }
  0x14   : > { %v359_v21 = vmax.f32 %v260_v2, %v331_v15  ;;  %v680_v22 = vsel %vm325_vm0, %v428_v11, %v429_v12  ;;  %v432_v24 = vrot.slane %v288_v18, 1  ;;  %v290_v30 = vld [vmem:[%s654_s23 + $0x28] sm:$0x1]  ;;  %v335_v31 = vrot.slane %v264_v25, 1  ;;  %v276_v33 = vld [vmem:[%s672_s26] sm:$0xff]  ;;  %v277_v40 = vld [vmem:[%s672_s26 + $0x10] sm:$0xff] }
  0x15   : > { %v366_v27 = vmax.f32 %v358_v16, %v260_v2  ;;  %v334_v28 = vsel %vm325_vm0, %v332_v19, %v333_v20  ;;  %v336_v32 = vrot.slane %v265_v26, 1  ;;  %v434_v37 = vrot.slane %v687_v29, 1  ;;  %v266_v38 = vld [vmem:[%s648_s20 + $0x40] sm:$0xff]  ;;  %v267_v39 = vld [vmem:[%s648_s20 + $0x48] sm:$0x1]  ;;  %v700_v44 = vld [vmem:[%s654_s23 + $0x30] sm:$0xff] }
  0x16   : > { %v360_v34 = vmax.f32 %v262_v13, %v334_v28  ;;  %v367_v35 = vmax.f32 %v359_v21, %v262_v13  ;;  %v692_v36 = vsel %vm325_vm0, %v431_v23, %v432_v24  ;;  %v435_v43 = vrot.slane %v290_v30, 1  ;;  %v292_v45 = vld [vmem:[%s654_s23 + $0x38] sm:$0x1]  ;;  %v268_v51 = vld [vmem:[%s648_s20 + $0x50] sm:$0xff]  ;;  %v278_v53 = vld [vmem:[%s672_s26 + $0x20] sm:$0xff] }
  0x17   : > { %v380_v41 = vmax.f32 %v366_v27, %v331_v15  ;;  %v337_v42 = vsel %vm325_vm0, %v335_v31, %v336_v32  ;;  %v338_v46 = vrot.slane %v266_v38, 1  ;;  %v339_v50 = vrot.slane %v267_v39, 1  ;;  %v269_v57 = vld [vmem:[%s648_s20 + $0x58] sm:$0x1]  ;;  %v293_v62 = vld [vmem:[%s654_s23 + $0x40] sm:$0xff]  ;;  %v279_v1 = vld [vmem:[%s672_s26 + $0x30] sm:$0xff] }
  0x18   : > { %v381_v47 = vmax.f32 %v367_v35, %v334_v28  ;;  %v361_v48 = vmax.f32 %v264_v25, %v337_v42  ;;  %v368_v49 = vmax.f32 %v360_v34, %v264_v25  ;;  %v706_v54 = vsel %vm325_vm0, %v434_v37, %v435_v43  ;;  %v294_v63 = vld [vmem:[%s654_s23 + $0x48] sm:$0x1]  ;;  %v270_v14 = vld [vmem:[%s648_s20 + $0x60] sm:$0xff]  ;;  %v295_v28 = vld [vmem:[%s654_s23 + $0x50] sm:$0xff] }
  0x19   : > { %v388_v52 = vmax.f32 %v380_v41, %v276_v33  ;;  %v437_v55 = vrot.slane %v700_v44, 1  ;;  %v438_v56 = vrot.slane %v292_v45, 1  ;;  %v340_v60 = vsel %vm325_vm0, %v338_v46, %v339_v50  ;;  %v301_v15 = vld [vmem:[%s717_s29] sm:$0xff]  ;;  %v271_v23 = vld [vmem:[%s648_s20 + $0x68] sm:$0x1]  ;;  %v272_v33 = vld [vmem:[%s648_s20 + $0x70] sm:$0xff] }
  0x1a   : > { %v389_v58 = vmax.f32 %v381_v47, %v277_v40  ;;  %v382_v59 = vmax.f32 %v368_v49, %v337_v42  ;;  %v369_v61 = vmax.f32 %v361_v48, %v266_v38  ;;  %v362_v2 = vmax.f32 %v266_v38, %v340_v60  ;;  %v280_v19 = vld [vmem:[%s672_s26 + $0x40] sm:$0xff]  ;;  %v273_v43 = vld [vmem:[%s648_s20 + $0x78] sm:$0x1]  ;;  %v304_v45 = vld [vmem:[%s717_s29 + $0x30] sm:$0xff] }
  0x1b   : > { %v396_v0 = vmax.f32 %v388_v52, %v277_v40  ;;  %v439_v3 = vsel %vm325_vm0, %v437_v55, %v438_v56  ;;  %v341_v4 = vrot.slane %v268_v51, 1  ;;  %v342_v9 = vrot.slane %v269_v57, 1  ;;  %v303_v35 = vld [vmem:[%s717_s29 + $0x20] sm:$0xff] }
  0x1c   : > { %v397_v5 = vmax.f32 %v389_v58, %v278_v53  ;;  %v390_v7 = vmax.f32 %v382_v59, %v278_v53  ;;  %v383_v8 = vmax.f32 %v369_v61, %v340_v60  ;;  %v370_v11 = vmax.f32 %v362_v2, %v268_v51  ;;  %v274_v53 = vld [vmem:[%s648_s20 + $0x80] sm:$0xff]  ;;  %v298_v61 = vld [vmem:[%s654_s23 + $0x68] sm:$0x1] }
  0x1d   : > { %v404_v10 = vmax.f32 %v396_v0, %v661_v6  ;;  %v440_v12 = vrot.slane %v293_v62, 1  ;;  %v441_v13 = vrot.slane %v294_v63, 1  ;;  %v343_v21 = vsel %vm325_vm0, %v341_v4, %v342_v9  ;;  %v302_v6 = vld [vmem:[%s717_s29 + $0x10] sm:$0xff]  ;;  %v305_v58 = vld [vmem:[%s717_s29 + $0x40] sm:$0xff] }
  0x1e   : > { %v405_v16 = vmax.f32 %v397_v5, %v676_v17  ;;  %v398_v18 = vmax.f32 %v390_v7, %v279_v1  ;;  %v391_v20 = vmax.f32 %v383_v8, %v279_v1  ;;  %v363_v25 = vmax.f32 %v268_v51, %v343_v21  ;;  %v297_v60 = vld [vmem:[%s654_s23 + $0x60] sm:$0xff] }
  0x1f   : > { %v460_v24 = vmax.f32 %v404_v10, %v680_v22  ;;  %v384_v26 = vmax.f32 %v370_v11, %v343_v21  ;;  %v442_v27 = vsel %vm325_vm0, %v440_v12, %v441_v13  ;;  %v296_v22 = vld [vmem:[%s654_s23 + $0x58] sm:$0x1]  ;;  %v344_v32 = vrot.slane %v270_v14, 1  ;;  %v282_v1 = vld [vmem:[%s672_s26 + $0x60] sm:$0xff] }
  0x20   : > { %v461_v17 = vmax.f32 %v405_v16, %v692_v36  ;;  %v406_v30 = vmax.f32 %v398_v18, %v687_v29  ;;  %v399_v31 = vmax.f32 %v391_v20, %v280_v19  ;;  %v345_v38 = vrot.slane %v271_v23, 1  ;;  %v281_v29 = vld [vmem:[%s672_s26 + $0x50] sm:$0xff]  ;;  %v300_v16 = vld [vmem:[%s654_s23 + $0x78] sm:$0x1] }
  0x21   : > { %v468_v34 = vmax.f32 %v460_v24, %v301_v15  ;;  %v392_v37 = vmax.f32 %v384_v26, %v280_v19  ;;  %v371_v39 = vmax.f32 %v363_v25, %v270_v14  ;;  %v443_v42 = vrot.slane %v295_v28, 1  ;;  %v299_v15 = vld [vmem:[%s654_s23 + $0x70] sm:$0xff]  ;;  %v284_v25 = vld [vmem:[%s672_s26 + $0x80] sm:$0xff] }
  0x22   : > { %v469_v40 = vmax.f32 %v461_v17, %v302_v6  ;;  %v462_v41 = vmax.f32 %v406_v30, %v706_v54  ;;  %v407_v36 = vmax.f32 %v399_v31, %v700_v44  ;;  %v346_v47 = vsel %vm325_vm0, %v344_v32, %v345_v38  ;;  %v275_v54 = vld [vmem:[%s648_s20 + $0x88] sm:$0x1]  ;;  %v306_v19 = vld [vmem:[%s717_s29 + $0x50] sm:$0xff]  ;;  %v307_v31 = vld [vmem:[%s717_s29 + $0x60] sm:$0xff] }
  0x23   : > { %476 = vst [vmem:[%s736_s7] sm:$0xff] %v468_v34  ;;  %v400_v46 = vmax.f32 %v392_v37, %v281_v29  ;;  %v444_v48 = vrot.slane %v296_v22, 1  ;;  %v347_v49 = vrot.slane %v272_v33, 1  ;;  %v364_v44 = vmax.f32 %v270_v14, %v346_v47  ;;  %v283_v20 = vld [vmem:[%s672_s26 + $0x70] sm:$0xff] }
  0x24   : > { %477 = vst [vmem:[%s736_s7 + $0x8] sm:$0xff] %v469_v40  ;;  %v470_v50 = vmax.f32 %v462_v41, %v303_v35  ;;  %v463_v51 = vmax.f32 %v407_v36, %v439_v3  ;;  %v385_v52 = vmax.f32 %v371_v39, %v346_v47  ;;  %v348_v56 = vrot.slane %v273_v43, 1  ;;  %v308_v37 = vld [vmem:[%s717_s29 + $0x70] sm:$0xff] }
  0x25   : > { %v408_v55 = vmax.f32 %v400_v46, %v293_v62  ;;  %v372_v63 = vmax.f32 %v364_v44, %v272_v33  ;;  %v376_v3 = vrot.slane %v274_v53, 1  ;;  %v377_v4 = vrot.slane %v275_v54, 1 }
  0x26   : > { %478 = vst [vmem:[%s736_s7 + $0x10] sm:$0xff] %v470_v50  ;;  %v471_v57 = vmax.f32 %v463_v51, %v304_v45  ;;  %v393_v59 = vmax.f32 %v385_v52, %v281_v29  ;;  %v349_v2 = vsel %vm325_vm0, %v347_v49, %v348_v56  ;;  %v445_v5 = vsel %vm325_vm0, %v443_v42, %v444_v48 }
  0x27   : > { %v464_v0 = vmax.f32 %v408_v55, %v442_v27  ;;  %v365_v7 = vmax.f32 %v272_v33, %v349_v2  ;;  %v386_v8 = vmax.f32 %v372_v63, %v349_v2  ;;  %v446_v10 = vrot.slane %v297_v60, 1 }
  0x28   : > { %479 = vst [vmem:[%s736_s7 + $0x18] sm:$0xff] %v471_v57  ;;  %v401_v62 = vmax.f32 %v393_v59, %v282_v1  ;;  %v447_v11 = vrot.slane %v298_v61, 1  ;;  %v378_v12 = vsel %vm325_vm0, %v376_v3, %v377_v4  ;;  %v449_v26 = vrot.slane %v299_v15, 1 }
  0x29   : > { %v472_v9 = vmax.f32 %v464_v0, %v305_v58  ;;  %v394_v14 = vmax.f32 %v386_v8, %v282_v1  ;;  %v373_v18 = vmax.f32 %v365_v7, %v274_v53  ;;  %v450_v27 = vrot.slane %v300_v16, 1 }
  0x2a   : > { %v409_v13 = vmax.f32 %v401_v62, %v295_v28  ;;  %v448_v6 = vsel %vm325_vm0, %v446_v10, %v447_v11 }
  0x2b   : > { %480 = vst [vmem:[%s736_s7 + $0x20] sm:$0xff] %v472_v9  ;;  %v402_v23 = vmax.f32 %v394_v14, %v283_v20  ;;  %v387_v24 = vmax.f32 %v373_v18, %v378_v12  ;;  %v451_v33 = vsel %vm325_vm0, %v449_v26, %v450_v27 }
  0x2c   : > { %v465_v21 = vmax.f32 %v409_v13, %v445_v5 }
  0x2d   : > { %v410_v17 = vmax.f32 %v402_v23, %v297_v60  ;;  %v395_v30 = vmax.f32 %v387_v24, %v283_v20 }
  0x2e   : > { %v473_v28 = vmax.f32 %v465_v21, %v306_v19 }
  0x2f   : > { %v466_v22 = vmax.f32 %v410_v17, %v448_v6  ;;  %v403_v32 = vmax.f32 %v395_v30, %v284_v25 }
  0x30   : > { %481 = vst [vmem:[%s736_s7 + $0x28] sm:$0xff] %v473_v28 }
  0x31   : > { %v474_v34 = vmax.f32 %v466_v22, %v307_v31  ;;  %v411_v35 = vmax.f32 %v403_v32, %v299_v15 }
  0x33   : > { %482 = vst [vmem:[%s736_s7 + $0x30] sm:$0xff] %v474_v34  ;;  %v467_v38 = vmax.f32 %v411_v35, %v451_v33 }
  0x35   : > { %v475_v39 = vmax.f32 %v467_v38, %v308_v37 }
  0x37   : > { %483 = vst [vmem:[%s736_s7 + $0x38] sm:$0xff] %v475_v39 }
  0x38 PF: > { %s14_s15 = sadd.s32 1, %s604_s15  }
  0x39   : > { %p11_p4 = scmp.ge.s32.totalorder %s14_s15, 4  }
  0x3b   :  { %13 = sbr.rel (!%p11_p4) target bundleno = 1 (0x1), region = 75 }

// kernel: densenet_forward.11
= control target key start
LH: loop header
LB: loop body
LE: loop exit
PB: predicated region body
PF: predicated region fallthrough
CT: control target
= control target key end

     0   :  { %vm384_vm0 = vcmask 1040384   ;;  %vm385_vm1 = vcmask 1041408   ;;  %v950_v2 = vmov 65535   ;;  %vm287_vm2 = vcmask 154624   ;;  %s1723_s1 = inlined_call_operand.vmem [shape: bf16[147,128], index: 1, kind: input, shape index: {}]   ;;  %s1724_s0 = inlined_call_operand.vmem [shape: f32[512,147], index: 0, kind: input, shape index: {}]   ;;  %s1725_s2 = inlined_call_operand.vmem [shape: f32[1,128], index: 2, kind: input, shape index: {}]   ;;  %s1726_s3 = inlined_call_operand.vmem [shape: f32[512,128], index: 3, kind: output, shape index: {}]  }
   0x1   :  { %v936_v0 = vld [vmem:[%s1723_s1 + $0x38] sm:$0xff]  ;;  %v225_v1 = vld [vmem:[%s1723_s1 + $0x48] sm:$0x3]  ;;  %v386_v3 = vsel %vm384_vm0, 4294967295, %v950_v2  ;;  %v935_v5 = vld [vmem:[%s1723_s1 + $0x30] sm:$0xff] }
   0x2   :  { %v267_v4 = vunpack.c.l.b16 %v225_v1  ;;  %391 = vmatpush.bf16.msra.mxu0 %v936_v0  ;;  %938 = vmatpush.bf16.msra.mxu2 %v936_v0  ;;  %v387_v6 = vsel %vm385_vm1, %v386_v3, 0  ;;  %v934_v9 = vld [vmem:[%s1723_s1 + $0x28] sm:$0xff]  ;;  %v937_v10 = vld [vmem:[%s1723_s1 + $0x40] sm:$0xff]  ;;  %v18_v12 = vld [vmem:[%s1724_s0 + $0x18] sm:$0xff] }
   0x3   :  { %v16_v11 = vld [vmem:[%s1724_s0 + $0x8] sm:$0xff]  ;;  %v86_v14 = vld [vmem:[%s1724_s0 + $0x238] sm:$0xff]  ;;  %v933_v16 = vld [vmem:[%s1723_s1 + $0x20] sm:$0xff] }
   0x4   :  { %v277_v7 = vpack.c.b16 %v267_v4, %v267_v4  ;;  %v84_v13 = vld [vmem:[%s1724_s0 + $0x228] sm:$0xff]  ;;  %v144_v15 = vpack.c.bf16 %v18_v12, %v16_v11  ;;  %v932_v18 = vld [vmem:[%s1723_s1 + $0x18] sm:$0xff]  ;;  %v931_v19 = vld [vmem:[%s1723_s1 + $0x10] sm:$0xff] }
   0x5   :  { %v178_v17 = vpack.c.bf16 %v86_v14, %v84_v13  ;;  %v930_v20 = vld [vmem:[%s1723_s1 + $0x8] sm:$0xff]  ;;  %v22_v22 = vld [vmem:[%s1724_s0 + $0x38] sm:$0xff]  ;;  %v929_v26 = vld [vmem:[%s1723_s1] sm:$0xff] }
   0x6   :  { %v389_v8 = vand.u32 %v387_v6, %v277_v7  ;;  %392 = vmatpush.bf16.msra.mxu0 %v935_v5  ;;  %939 = vmatpush.bf16.msra.mxu2 %v935_v5  ;;  %v20_v21 = vld [vmem:[%s1724_s0 + $0x28] sm:$0xff]  ;;  %v90_v24 = vld [vmem:[%s1724_s0 + $0x258] sm:$0xff]  ;;  %v15_v27 = vld [vmem:[%s1724_s0] sm:$0xff] }
   0x7   :  { %v88_v23 = vld [vmem:[%s1724_s0 + $0x248] sm:$0xff]  ;;  %v146_v25 = vpack.c.bf16 %v22_v22, %v20_v21  ;;  %v17_v28 = vld [vmem:[%s1724_s0 + $0x10] sm:$0xff]  ;;  %v79_v29 = vld [vmem:[%s1724_s0 + $0x200] sm:$0xff] }
   0x8   :  { %566 = vmatpush.bf16.msra.mxu1 %v389_v8  ;;  %946 = vmatpush.bf16.msra.mxu3 %v389_v8  ;;  %v81_v30 = vld [vmem:[%s1724_s0 + $0x210] sm:$0xff]  ;;  %v180_v31 = vpack.c.bf16 %v90_v24, %v88_v23  ;;  %v143_v32 = vpack.c.bf16 %v17_v28, %v15_v27  ;;  %v24_v34 = vld [vmem:[%s1724_s0 + $0x48] sm:$0xff]  ;;  %v26_v35 = vld [vmem:[%s1724_s0 + $0x58] sm:$0xff] }
   0x9   :  { %v175_v33 = vpack.c.bf16 %v81_v30, %v79_v29  ;;  %v92_v36 = vld [vmem:[%s1724_s0 + $0x268] sm:$0xff]  ;;  %v94_v37 = vld [vmem:[%s1724_s0 + $0x278] sm:$0xff]  ;;  %v148_v38 = vpack.c.bf16 %v26_v35, %v24_v34  ;;  %v19_v39 = vld [vmem:[%s1724_s0 + $0x20] sm:$0xff] }
   0xa   :  { %393 = vmatpush.bf16.msra.mxu0 %v934_v9  ;;  %940 = vmatpush.bf16.msra.mxu2 %v934_v9  ;;  %v21_v40 = vld [vmem:[%s1724_s0 + $0x30] sm:$0xff]  ;;  %v83_v41 = vld [vmem:[%s1724_s0 + $0x220] sm:$0xff]  ;;  %v182_v43 = vpack.c.bf16 %v94_v37, %v92_v36  ;;  %v28_v46 = vld [vmem:[%s1724_s0 + $0x68] sm:$0xff] }
   0xb   :  { %v85_v42 = vld [vmem:[%s1724_s0 + $0x230] sm:$0xff]  ;;  %v145_v44 = vpack.c.bf16 %v21_v40, %v19_v39  ;;  %v30_v47 = vld [vmem:[%s1724_s0 + $0x78] sm:$0xff]  ;;  %v96_v48 = vld [vmem:[%s1724_s0 + $0x288] sm:$0xff] }
   0xc   :  { %567 = vmatpush.bf16.msra.mxu1 %v937_v10  ;;  %947 = vmatpush.bf16.msra.mxu3 %v937_v10  ;;  %v177_v45 = vpack.c.bf16 %v85_v42, %v83_v41  ;;  %v98_v49 = vld [vmem:[%s1724_s0 + $0x298] sm:$0xff]  ;;  %v150_v50 = vpack.c.bf16 %v30_v47, %v28_v46  ;;  %v23_v51 = vld [vmem:[%s1724_s0 + $0x40] sm:$0xff]  ;;  %v25_v52 = vld [vmem:[%s1724_s0 + $0x50] sm:$0xff] }
   0xd   :  { %v87_v53 = vld [vmem:[%s1724_s0 + $0x240] sm:$0xff]  ;;  %v89_v54 = vld [vmem:[%s1724_s0 + $0x250] sm:$0xff]  ;;  %v184_v55 = vpack.c.bf16 %v98_v49, %v96_v48  ;;  %v147_v56 = vpack.c.bf16 %v25_v52, %v23_v51  ;;  %v32_v58 = vld [vmem:[%s1724_s0 + $0x88] sm:$0xff] }
   0xe   :  { %394 = vmatpush.bf16.msra.mxu0 %v933_v16  ;;  %941 = vmatpush.bf16.msra.mxu2 %v933_v16  ;;  %v179_v57 = vpack.c.bf16 %v89_v54, %v87_v53  ;;  %v34_v59 = vld [vmem:[%s1724_s0 + $0x98] sm:$0xff]  ;;  %v100_v60 = vld [vmem:[%s1724_s0 + $0x2a8] sm:$0xff]  ;;  %v27_v63 = vld [vmem:[%s1724_s0 + $0x60] sm:$0xff] }
   0xf   :  { %897 = vmatmul.msk.bf16.vlgmr.msra.gmra.mxu1 %vm287_vm2, %v144_v15  ;;  %914 = vmatmul.msk.bf16.vlgmr.msra.gmra.mxu3 %vm287_vm2, %v178_v17  ;;  %v102_v61 = vld [vmem:[%s1724_s0 + $0x2b8] sm:$0xff]  ;;  %v152_v62 = vpack.c.bf16 %v34_v59, %v32_v58  ;;  %v29_v0 = vld [vmem:[%s1724_s0 + $0x70] sm:$0xff]  ;;  %v91_v1 = vld [vmem:[%s1724_s0 + $0x260] sm:$0xff] }
  0x10   :  { %v93_v2 = vld [vmem:[%s1724_s0 + $0x270] sm:$0xff]  ;;  %v186_v3 = vpack.c.bf16 %v102_v61, %v100_v60  ;;  %v149_v4 = vpack.c.bf16 %v29_v0, %v27_v63  ;;  %v36_v6 = vld [vmem:[%s1724_s0 + $0xa8] sm:$0xff]  ;;  %v38_v7 = vld [vmem:[%s1724_s0 + $0xb8] sm:$0xff] }
  0x11   :  { %v181_v5 = vpack.c.bf16 %v93_v2, %v91_v1  ;;  %v104_v8 = vld [vmem:[%s1724_s0 + $0x2c8] sm:$0xff]  ;;  %v106_v9 = vld [vmem:[%s1724_s0 + $0x2d8] sm:$0xff]  ;;  %v154_v10 = vpack.c.bf16 %v38_v7, %v36_v6  ;;  %v31_v11 = vld [vmem:[%s1724_s0 + $0x80] sm:$0xff] }
  0x12   :  { %395 = vmatpush.bf16.msra.mxu0 %v932_v18  ;;  %942 = vmatpush.bf16.msra.mxu2 %v932_v18  ;;  %v33_v12 = vld [vmem:[%s1724_s0 + $0x90] sm:$0xff]  ;;  %v95_v13 = vld [vmem:[%s1724_s0 + $0x280] sm:$0xff]  ;;  %v188_v15 = vpack.c.bf16 %v106_v9, %v104_v8  ;;  %v40_v18 = vld [vmem:[%s1724_s0 + $0xc8] sm:$0xff] }
  0x13   :  { %v97_v14 = vld [vmem:[%s1724_s0 + $0x290] sm:$0xff]  ;;  %v151_v16 = vpack.c.bf16 %v33_v12, %v31_v11  ;;  %v110_v21 = vld [vmem:[%s1724_s0 + $0x2f8] sm:$0xff]  ;;  %v35_v23 = vld [vmem:[%s1724_s0 + $0xa0] sm:$0xff] }
  0x14   :  { %v183_v17 = vpack.c.bf16 %v97_v14, %v95_v13  ;;  %v37_v24 = vld [vmem:[%s1724_s0 + $0xb0] sm:$0xff]  ;;  %v44_v30 = vld [vmem:[%s1724_s0 + $0xe8] sm:$0xff]  ;;  %v39_v35 = vld [vmem:[%s1724_s0 + $0xc0] sm:$0xff] }
  0x15   :  { %v153_v28 = vpack.c.bf16 %v37_v24, %v35_v23  ;;  %v41_v36 = vld [vmem:[%s1724_s0 + $0xd0] sm:$0xff]  ;;  %v103_v37 = vld [vmem:[%s1724_s0 + $0x2c0] sm:$0xff]  ;;  %v48_v42 = vld [vmem:[%s1724_s0 + $0x108] sm:$0xff] }
  0x16   :  { %396 = vmatpush.bf16.msra.mxu0 %v931_v19  ;;  %943 = vmatpush.bf16.msra.mxu2 %v931_v19  ;;  %v42_v19 = vld [vmem:[%s1724_s0 + $0xd8] sm:$0xff]  ;;  %v155_v40 = vpack.c.bf16 %v41_v36, %v39_v35  ;;  %v43_v47 = vld [vmem:[%s1724_s0 + $0xe0] sm:$0xff]  ;;  %v45_v48 = vld [vmem:[%s1724_s0 + $0xf0] sm:$0xff] }
  0x17   :  { %v156_v22 = vpack.c.bf16 %v42_v19, %v40_v18  ;;  %v109_v51 = vld [vmem:[%s1724_s0 + $0x2f0] sm:$0xff]  ;;  %v157_v53 = vpack.c.bf16 %v45_v48, %v43_v47  ;;  %v54_v58 = vld [vmem:[%s1724_s0 + $0x138] sm:$0xff]  ;;  %v120_v59 = vld [vmem:[%s1724_s0 + $0x348] sm:$0xff] }
  0x18   :  { %v122_v60 = vld [vmem:[%s1724_s0 + $0x358] sm:$0xff]  ;;  %v49_v63 = vld [vmem:[%s1724_s0 + $0x110] sm:$0xff]  ;;  %v1248_v2 = vld [vmem:[%s1725_s2] ss:$0 sm:$0xff] }
  0x19   :  { %v58_v18 = vld [vmem:[%s1724_s0 + $0x158] sm:$0xff]  ;;  %v51_v23 = vld [vmem:[%s1724_s0 + $0x120] sm:$0xff]  ;;  %v53_v24 = vld [vmem:[%s1724_s0 + $0x130] sm:$0xff] }
  0x1a   :  { %397 = vmatpush.bf16.msra.mxu0 %v930_v20  ;;  %944 = vmatpush.bf16.msra.mxu2 %v930_v20  ;;  %v108_v20 = vld [vmem:[%s1724_s0 + $0x2e8] sm:$0xff] }
  0x1b   :  { %v190_v27 = vpack.c.bf16 %v110_v21, %v108_v20  ;;  %v124_v20 = vld [vmem:[%s1724_s0 + $0x368] sm:$0xff]  ;;  %v126_v21 = vld [vmem:[%s1724_s0 + $0x378] sm:$0xff] }
  0x1c   :  { %v128_v48 = vld [vmem:[%s1724_s0 + $0x388] sm:$0xff] }
  0x1e   :  { %398 = vmatpush.bf16.msra.mxu0 %v929_v26  ;;  %945 = vmatpush.bf16.msra.mxu2 %v929_v26  ;;  %v101_v26 = vld [vmem:[%s1724_s0 + $0x2b0] sm:$0xff] }
  0x1f   :  { %898 = vmatmul.msk.bf16.gmra.mxu1 %vm287_vm2, %v146_v25  ;;  %915 = vmatmul.msk.bf16.gmra.mxu3 %vm287_vm2, %v180_v31  ;;  %v99_v25 = vld [vmem:[%s1724_s0 + $0x2a0] sm:$0xff]  ;;  %v46_v31 = vld [vmem:[%s1724_s0 + $0xf8] sm:$0xff] }
  0x20   :  { %v185_v29 = vpack.c.bf16 %v101_v26, %v99_v25  ;;  %v158_v34 = vpack.c.bf16 %v46_v31, %v44_v30  ;;  %v198_v30 = vpack.c.bf16 %v126_v21, %v124_v20  ;;  %v134_v20 = vld [vmem:[%s1724_s0 + $0x3b8] sm:$0xff] }
  0x21   :  { %399 = vmatmul.bf16.vlgmr.msra.gmra.mxu0 %v143_v32  ;;  %479 = vmatmul.bf16.vlgmr.msra.gmra.mxu2 %v175_v33  ;;  %v112_v32 = vld [vmem:[%s1724_s0 + $0x308] sm:$0xff]  ;;  %v114_v33 = vld [vmem:[%s1724_s0 + $0x318] sm:$0xff] }
  0x22   :  { %v192_v39 = vpack.c.bf16 %v114_v33, %v112_v32  ;;  %v161_v32 = vpack.c.bf16 %v53_v24, %v51_v23  ;;  %v59_v23 = vld [vmem:[%s1724_s0 + $0x160] sm:$0xff]  ;;  %v61_v24 = vld [vmem:[%s1724_s0 + $0x170] sm:$0xff] }
  0x2f   :  { %899 = vmatmul.msk.bf16.gmra.mxu1 %vm287_vm2, %v148_v38  ;;  %916 = vmatmul.msk.bf16.gmra.mxu3 %vm287_vm2, %v182_v43  ;;  %v105_v38 = vld [vmem:[%s1724_s0 + $0x2d0] sm:$0xff]  ;;  %v50_v43 = vld [vmem:[%s1724_s0 + $0x118] sm:$0xff] }
  0x30   :  { %v187_v41 = vpack.c.bf16 %v105_v38, %v103_v37  ;;  %v160_v46 = vpack.c.bf16 %v50_v43, %v48_v42 }
  0x31   :  { %404 = vmatmul.bf16.gmra.mxu0 %v145_v44  ;;  %484 = vmatmul.bf16.gmra.mxu2 %v177_v45  ;;  %v116_v44 = vld [vmem:[%s1724_s0 + $0x328] sm:$0xff]  ;;  %v118_v45 = vld [vmem:[%s1724_s0 + $0x338] sm:$0xff] }
  0x32   :  { %v194_v52 = vpack.c.bf16 %v118_v45, %v116_v44  ;;  %v60_v44 = vld [vmem:[%s1724_s0 + $0x168] sm:$0xff]  ;;  %v62_v45 = vld [vmem:[%s1724_s0 + $0x178] sm:$0xff] }
  0x3f   :  { %900 = vmatmul.msk.bf16.gmra.mxu1 %vm287_vm2, %v150_v50  ;;  %917 = vmatmul.msk.bf16.gmra.mxu3 %vm287_vm2, %v184_v55  ;;  %v107_v50 = vld [vmem:[%s1724_s0 + $0x2e0] sm:$0xff] }
  0x40   :  { %v189_v54 = vpack.c.bf16 %v109_v51, %v107_v50  ;;  %v166_v51 = vpack.c.bf16 %v62_v45, %v60_v44 }
  0x41   :  { %409 = vmatmul.bf16.gmra.mxu0 %v147_v56  ;;  %489 = vmatmul.bf16.gmra.mxu2 %v179_v57  ;;  %v52_v57 = vld [vmem:[%s1724_s0 + $0x128] sm:$0xff] }
  0x42   :  { %v162_v61 = vpack.c.bf16 %v54_v58, %v52_v57  ;;  %v119_v57 = vld [vmem:[%s1724_s0 + $0x340] sm:$0xff]  ;;  %v121_v58 = vld [vmem:[%s1724_s0 + $0x350] sm:$0xff] }
  0x4f   :  { %901 = vmatmul.msk.bf16.gmra.mxu1 %vm287_vm2, %v152_v62  ;;  %918 = vmatmul.msk.bf16.gmra.mxu3 %vm287_vm2, %v186_v3  ;;  %v47_v62 = vld [vmem:[%s1724_s0 + $0x100] sm:$0xff] }
  0x50   :  { %v111_v3 = vld [vmem:[%s1724_s0 + $0x300] sm:$0xff]  ;;  %v159_v6 = vpack.c.bf16 %v49_v63, %v47_v62 }
  0x51   :  { %414 = vmatmul.bf16.gmra.mxu0 %v149_v4  ;;  %494 = vmatmul.bf16.gmra.mxu2 %v181_v5  ;;  %v113_v4 = vld [vmem:[%s1724_s0 + $0x310] sm:$0xff]  ;;  %v196_v5 = vpack.c.bf16 %v122_v60, %v120_v59 }
  0x52   :  { %v191_v8 = vpack.c.bf16 %v113_v4, %v111_v3 }
  0x5f   :  { %902 = vmatmul.msk.bf16.gmra.mxu1 %vm287_vm2, %v154_v10  ;;  %919 = vmatmul.msk.bf16.gmra.mxu3 %vm287_vm2, %v188_v15 }
  0x61   :  { %419 = vmatmul.bf16.gmra.mxu0 %v151_v16  ;;  %499 = vmatmul.bf16.gmra.mxu2 %v183_v17  ;;  %v56_v17 = vld [vmem:[%s1724_s0 + $0x148] sm:$0xff] }
  0x6f   :  { %903 = vmatmul.msk.bf16.gmra.mxu1 %vm287_vm2, %v156_v22  ;;  %920 = vmatmul.msk.bf16.gmra.mxu3 %vm287_vm2, %v190_v27  ;;  %v164_v22 = vpack.c.bf16 %v58_v18, %v56_v17 }
  0x71   :  { %424 = vmatmul.bf16.gmra.mxu0 %v153_v28  ;;  %504 = vmatmul.bf16.gmra.mxu2 %v185_v29  ;;  %v115_v28 = vld [vmem:[%s1724_s0 + $0x320] sm:$0xff]  ;;  %v117_v29 = vld [vmem:[%s1724_s0 + $0x330] sm:$0xff] }
  0x7f   :  { %904 = vmatmul.msk.bf16.gmra.mxu1 %vm287_vm2, %v158_v34  ;;  %921 = vmatmul.msk.bf16.gmra.mxu3 %vm287_vm2, %v192_v39  ;;  %v193_v34 = vpack.c.bf16 %v117_v29, %v115_v28  ;;  %v123_v28 = vld [vmem:[%s1724_s0 + $0x360] sm:$0xff]  ;;  %v125_v29 = vld [vmem:[%s1724_s0 + $0x370] sm:$0xff] }
  0x81   :  { %429 = vmatmul.bf16.gmra.mxu0 %v155_v40  ;;  %509 = vmatmul.bf16.gmra.mxu2 %v187_v41 }
  0x8c   :  { %v569_v49 = vpop.f32.mrf.mxu1 }
  0x8f   :  { %905 = vmatmul.msk.bf16.gmra.mxu1 %vm287_vm2, %v160_v46  ;;  %922 = vmatmul.msk.bf16.gmra.mxu3 %vm287_vm2, %v194_v52  ;;  %v55_v52 = vld [vmem:[%s1724_s0 + $0x140] sm:$0xff] }
  0x91   :  { %434 = vmatmul.bf16.gmra.mxu0 %v157_v53  ;;  %514 = vmatmul.bf16.gmra.mxu2 %v189_v54  ;;  %v57_v53 = vld [vmem:[%s1724_s0 + $0x150] sm:$0xff] }
  0x92   :  { %v1223_v55 = vpop.f32.mrf.mxu3 }
  0x94   :  { %v571_v56 = vpop.f32.mrf.mxu1 }
  0x9a   :  { %v1243_v0 = vpop.f32.mrf.mxu3 }
  0x9c   :  { %v574_v1 = vpop.f32.mrf.mxu1 }
  0x9e   :  { %v400_v7 = vpop.f32.mrf.mxu0 }
  0x9f   :  { %906 = vmatmul.msk.bf16.gmra.mxu1 %vm287_vm2, %v162_v61  ;;  %v401_v9 = vadd.f32 %v1248_v2, %v400_v7  ;;  %923 = vmatmul.msk.bf16.gmra.mxu3 %vm287_vm2, %v196_v5  ;;  %v163_v61 = vpack.c.bf16 %v57_v53, %v55_v52  ;;  %v136_v52 = vld [vmem:[%s1724_s0 + $0x3c8] sm:$0xff]  ;;  %v138_v53 = vld [vmem:[%s1724_s0 + $0x3d8] sm:$0xff] }
  0xa1   :  { %v570_v10 = vadd.f32 %v569_v49, %v401_v9  ;;  %439 = vmatmul.bf16.gmra.mxu0 %v159_v6  ;;  %519 = vmatmul.bf16.gmra.mxu2 %v191_v8  ;;  %v130_v49 = vld [vmem:[%s1724_s0 + $0x398] sm:$0xff] }
  0xa2   :  { %v1259_v11 = vpop.f32.mrf.mxu3  ;;  %v200_v59 = vpack.c.bf16 %v130_v49, %v128_v48  ;;  %v68_v48 = vld [vmem:[%s1724_s0 + $0x1a8] sm:$0xff]  ;;  %v70_v49 = vld [vmem:[%s1724_s0 + $0x1b8] sm:$0xff] }
  0xa3   :  { %v729_v12 = vmax.f32 %v570_v10, 0.0 }
  0xa4   :  { %v576_v13 = vpop.f32.mrf.mxu1  ;;  %v1264_v14 = vpop.f32.mrf.mxu2 }
  0xa5   :  { %793 = vst [vmem:[%s1726_s3] sm:$0xff] %v729_v12 }
  0xa6   :  { %v402_v15 = vpop.f32.mrf.mxu0 }
  0xa7   :  { %v403_v16 = vadd.f32 %v1248_v2, %v402_v15  ;;  %v64_v15 = vld [vmem:[%s1724_s0 + $0x188] sm:$0xff] }
  0xa9   :  { %v572_v19 = vadd.f32 %v571_v56, %v403_v16  ;;  %v66_v16 = vld [vmem:[%s1724_s0 + $0x198] sm:$0xff] }
  0xaa   :  { %v1285_v25 = vpop.f32.mrf.mxu3 }
  0xab   :  { %v730_v26 = vmax.f32 %v572_v19, 0.0  ;;  %v132_v19 = vld [vmem:[%s1724_s0 + $0x3a8] sm:$0xff] }
  0xac   :  { %v579_v27 = vpop.f32.mrf.mxu1  ;;  %v1296_v31 = vpop.f32.mrf.mxu2 }
  0xad   :  { %794 = vst [vmem:[%s1726_s3 + $0x8] sm:$0xff] %v730_v26 }
  0xae   :  { %v405_v33 = vpop.f32.mrf.mxu0 }
  0xaf   :  { %907 = vmatmul.msk.bf16.gmra.mxu1 %vm287_vm2, %v164_v22  ;;  %v406_v35 = vadd.f32 %v1248_v2, %v405_v33  ;;  %924 = vmatmul.msk.bf16.gmra.mxu3 %vm287_vm2, %v198_v30  ;;  %v168_v22 = vpack.c.bf16 %v66_v16, %v64_v15  ;;  %v202_v30 = vpack.c.bf16 %v134_v20, %v132_v19  ;;  %v72_v19 = vld [vmem:[%s1724_s0 + $0x1c8] sm:$0xff]  ;;  %v74_v20 = vld [vmem:[%s1724_s0 + $0x1d8] sm:$0xff] }
  0xb0   :  { %v165_v33 = vpack.c.bf16 %v61_v24, %v59_v23  ;;  %v140_v23 = vld [vmem:[%s1724_s0 + $0x3e8] sm:$0xff]  ;;  %v142_v24 = vld [vmem:[%s1724_s0 + $0x3f8] sm:$0xff] }
  0xb1   :  { %v575_v36 = vadd.f32 %v574_v1, %v406_v35  ;;  %444 = vmatmul.bf16.gmra.mxu0 %v161_v32  ;;  %524 = vmatmul.bf16.gmra.mxu2 %v193_v34  ;;  %v195_v1 = vpack.c.bf16 %v121_v58, %v119_v57  ;;  %v63_v57 = vld [vmem:[%s1724_s0 + $0x180] sm:$0xff]  ;;  %v65_v58 = vld [vmem:[%s1724_s0 + $0x190] sm:$0xff] }
  0xb2   :  { %v1301_v37 = vpop.f32.mrf.mxu3 }
  0xb3   :  { %v731_v38 = vmax.f32 %v575_v36, 0.0  ;;  %v197_v36 = vpack.c.bf16 %v125_v29, %v123_v28  ;;  %v67_v28 = vld [vmem:[%s1724_s0 + $0x1a0] sm:$0xff]  ;;  %v69_v29 = vld [vmem:[%s1724_s0 + $0x1b0] sm:$0xff] }
  0xb4   :  { %v581_v39 = vpop.f32.mrf.mxu1  ;;  %v485_v40 = vpop.f32.mrf.mxu2 }
  0xb5   :  { %795 = vst [vmem:[%s1726_s3 + $0x10] sm:$0xff] %v731_v38  ;;  %v486_v41 = vadd.f32 %v1248_v2, %v485_v40 }
  0xb6   :  { %v407_v42 = vpop.f32.mrf.mxu0 }
  0xb7   :  { %v408_v43 = vadd.f32 %v1248_v2, %v407_v42  ;;  %v655_v46 = vadd.f32 %v1223_v55, %v486_v41 }
  0xb9   :  { %v577_v47 = vadd.f32 %v576_v13, %v408_v43  ;;  %v763_v50 = vmax.f32 %v655_v46, 0.0 }
  0xba   :  { %v1327_v54 = vpop.f32.mrf.mxu3 }
  0xbb   :  { %v732_v55 = vmax.f32 %v577_v47, 0.0  ;;  %827 = vst [vmem:[%s1726_s3 + $0x110] sm:$0xff] %v763_v50 }
  0xbc   :  { %v584_v56 = vpop.f32.mrf.mxu1  ;;  %v487_v60 = vpop.f32.mrf.mxu2 }
  0xbd   :  { %796 = vst [vmem:[%s1726_s3 + $0x18] sm:$0xff] %v732_v55  ;;  %v488_v62 = vadd.f32 %v1248_v2, %v487_v60 }
  0xbe   :  { %v410_v63 = vpop.f32.mrf.mxu0 }
  0xbf   :  { %908 = vmatmul.msk.bf16.gmra.mxu1 %vm287_vm2, %v166_v51  ;;  %v411_v3 = vadd.f32 %v1248_v2, %v410_v63  ;;  %925 = vmatmul.msk.bf16.gmra.mxu3 %vm287_vm2, %v200_v59  ;;  %v657_v4 = vadd.f32 %v1243_v0, %v488_v62  ;;  %v129_v62 = vld [vmem:[%s1724_s0 + $0x390] sm:$0xff]  ;;  %v204_v63 = vpack.c.bf16 %v138_v53, %v136_v52  ;;  %v76_v52 = vld [vmem:[%s1724_s0 + $0x1e8] sm:$0xff]  ;;  %v78_v53 = vld [vmem:[%s1724_s0 + $0x1f8] sm:$0xff] }
  0xc1   :  { %v580_v5 = vadd.f32 %v579_v27, %v411_v3  ;;  %449 = vmatmul.bf16.gmra.mxu0 %v163_v61  ;;  %v764_v6 = vmax.f32 %v657_v4, 0.0  ;;  %529 = vmatmul.bf16.gmra.mxu2 %v195_v1  ;;  %v127_v61 = vld [vmem:[%s1724_s0 + $0x380] sm:$0xff]  ;;  %v167_v3 = vpack.c.bf16 %v65_v58, %v63_v57  ;;  %v174_v58 = vpack.c.bf16 %v78_v53, %v76_v52 }
  0xc2   :  { %v1346_v7 = vpop.f32.mrf.mxu3 }
  0xc3   :  { %v733_v8 = vmax.f32 %v580_v5, 0.0  ;;  %828 = vst [vmem:[%s1726_s3 + $0x118] sm:$0xff] %v764_v6  ;;  %v199_v6 = vpack.c.bf16 %v129_v62, %v127_v61 }
  0xc4   :  { %v586_v9 = vpop.f32.mrf.mxu1  ;;  %v490_v10 = vpop.f32.mrf.mxu2 }
  0xc5   :  { %797 = vst [vmem:[%s1726_s3 + $0x20] sm:$0xff] %v733_v8  ;;  %v491_v12 = vadd.f32 %v1248_v2, %v490_v10 }
  0xc6   :  { %v412_v0 = vpop.f32.mrf.mxu0 }
  0xc7   :  { %v413_v13 = vadd.f32 %v1248_v2, %v412_v0  ;;  %v660_v17 = vadd.f32 %v1259_v11, %v491_v12 }
  0xc9   :  { %v582_v18 = vadd.f32 %v581_v39, %v413_v13  ;;  %v765_v21 = vmax.f32 %v660_v17, 0.0 }
  0xca   :  { %v1375_v11 = vpop.f32.mrf.mxu3 }
  0xcb   :  { %v734_v26 = vmax.f32 %v582_v18, 0.0  ;;  %829 = vst [vmem:[%s1726_s3 + $0x120] sm:$0xff] %v765_v21 }
  0xcc   :  { %v589_v27 = vpop.f32.mrf.mxu1  ;;  %v492_v32 = vpop.f32.mrf.mxu2 }
  0xcd   :  { %798 = vst [vmem:[%s1726_s3 + $0x28] sm:$0xff] %v734_v26  ;;  %v493_v34 = vadd.f32 %v1248_v2, %v492_v32  ;;  %v131_v32 = vld [vmem:[%s1724_s0 + $0x3a0] sm:$0xff] }
  0xce   :  { %v415_v35 = vpop.f32.mrf.mxu0 }
  0xcf   :  { %909 = vmatmul.msk.bf16.gmra.mxu1 %vm287_vm2, %v168_v22  ;;  %v416_v38 = vadd.f32 %v1248_v2, %v415_v35  ;;  %926 = vmatmul.msk.bf16.gmra.mxu3 %vm287_vm2, %v202_v30  ;;  %v662_v39 = vadd.f32 %v1285_v25, %v493_v34  ;;  %v206_v35 = vpack.c.bf16 %v142_v24, %v140_v23 }
  0xd1   :  { %v585_v40 = vadd.f32 %v584_v56, %v416_v38  ;;  %454 = vmatmul.bf16.gmra.mxu0 %v165_v33  ;;  %v766_v41 = vmax.f32 %v662_v39, 0.0  ;;  %534 = vmatmul.bf16.gmra.mxu2 %v197_v36  ;;  %v170_v56 = vpack.c.bf16 %v70_v49, %v68_v48  ;;  %v133_v33 = vld [vmem:[%s1724_s0 + $0x3b0] sm:$0xff]  ;;  %v169_v38 = vpack.c.bf16 %v69_v29, %v67_v28 }
  0xd2   :  { %v1394_v42 = vpop.f32.mrf.mxu3  ;;  %v77_v28 = vld [vmem:[%s1724_s0 + $0x1f0] sm:$0xff] }
  0xd3   :  { %v735_v43 = vmax.f32 %v585_v40, 0.0  ;;  %830 = vst [vmem:[%s1726_s3 + $0x128] sm:$0xff] %v766_v41  ;;  %v201_v41 = vpack.c.bf16 %v133_v33, %v131_v32 }
  0xd4   :  { %v591_v44 = vpop.f32.mrf.mxu1  ;;  %v495_v45 = vpop.f32.mrf.mxu2 }
  0xd5   :  { %799 = vst [vmem:[%s1726_s3 + $0x30] sm:$0xff] %v735_v43  ;;  %v496_v46 = vadd.f32 %v1248_v2, %v495_v45 }
  0xd6   :  { %v417_v25 = vpop.f32.mrf.mxu0 }
  0xd7   :  { %v418_v47 = vadd.f32 %v1248_v2, %v417_v25  ;;  %v665_v50 = vadd.f32 %v1301_v37, %v496_v46 }
  0xd9   :  { %v587_v51 = vadd.f32 %v586_v9, %v418_v47  ;;  %v767_v55 = vmax.f32 %v665_v50, 0.0 }
  0xda   :  { %v1423_v37 = vpop.f32.mrf.mxu3 }
  0xdb   :  { %v736_v59 = vmax.f32 %v587_v51, 0.0  ;;  %831 = vst [vmem:[%s1726_s3 + $0x130] sm:$0xff] %v767_v55 }
  0xdc   :  { %v594_v60 = vpop.f32.mrf.mxu1  ;;  %v497_v1 = vpop.f32.mrf.mxu2 }
  0xdd   :  { %800 = vst [vmem:[%s1726_s3 + $0x38] sm:$0xff] %v736_v59  ;;  %v498_v4 = vadd.f32 %v1248_v2, %v497_v1  ;;  %v71_v59 = vld [vmem:[%s1724_s0 + $0x1c0] sm:$0xff] }
  0xde   :  { %v420_v5 = vpop.f32.mrf.mxu0 }
  0xdf   :  { %910 = vmatmul.msk.bf16.gmra.mxu1 %vm287_vm2, %v170_v56  ;;  %v421_v8 = vadd.f32 %v1248_v2, %v420_v5  ;;  %927 = vmatmul.msk.bf16.gmra.mxu3 %vm287_vm2, %v204_v63  ;;  %v667_v9 = vadd.f32 %v1327_v54, %v498_v4  ;;  %v135_v63 = vld [vmem:[%s1724_s0 + $0x3c0] sm:$0xff] }
  0xe1   :  { %v590_v10 = vadd.f32 %v589_v27, %v421_v8  ;;  %459 = vmatmul.bf16.gmra.mxu0 %v167_v3  ;;  %v768_v12 = vmax.f32 %v667_v9, 0.0  ;;  %539 = vmatmul.bf16.gmra.mxu2 %v199_v6  ;;  %v172_v27 = vpack.c.bf16 %v74_v20, %v72_v19  ;;  %v80_v19 = vld [vmem:[%s1724_s0 + $0x208] sm:$0xff]  ;;  %v82_v20 = vld [vmem:[%s1724_s0 + $0x218] sm:$0xff] }
  0xe2   :  { %v1442_v0 = vpop.f32.mrf.mxu3 }
  0xe3   :  { %v737_v13 = vmax.f32 %v590_v10, 0.0  ;;  %832 = vst [vmem:[%s1726_s3 + $0x138] sm:$0xff] %v768_v12 }
  0xe4   :  { %v596_v15 = vpop.f32.mrf.mxu1  ;;  %v500_v16 = vpop.f32.mrf.mxu2 }
  0xe5   :  { %801 = vst [vmem:[%s1726_s3 + $0x40] sm:$0xff] %v737_v13  ;;  %v501_v17 = vadd.f32 %v1248_v2, %v500_v16 }
  0xe6   :  { %v422_v54 = vpop.f32.mrf.mxu0 }
  0xe7   :  { %v423_v18 = vadd.f32 %v1248_v2, %v422_v54  ;;  %v670_v21 = vadd.f32 %v1346_v7, %v501_v17 }
  0xe9   :  { %v592_v22 = vadd.f32 %v591_v44, %v423_v18  ;;  %v769_v26 = vmax.f32 %v670_v21, 0.0 }
  0xea   :  { %v1477_v34 = vpop.f32.mrf.mxu3 }
  0xeb   :  { %v738_v7 = vmax.f32 %v592_v22, 0.0  ;;  %833 = vst [vmem:[%s1726_s3 + $0x140] sm:$0xff] %v769_v26  ;;  %v176_v26 = vpack.c.bf16 %v82_v20, %v80_v19 }
  0xec   :  { %v599_v30 = vpop.f32.mrf.mxu1  ;;  %v502_v36 = vpop.f32.mrf.mxu2 }
  0xed   :  { %802 = vst [vmem:[%s1726_s3 + $0x48] sm:$0xff] %v738_v7  ;;  %v503_v39 = vadd.f32 %v1248_v2, %v502_v36 }
  0xee   :  { %v425_v40 = vpop.f32.mrf.mxu0 }
  0xef   :  { %911 = vmatmul.msk.bf16.gmra.mxu1 %vm287_vm2, %v172_v27  ;;  %v426_v43 = vadd.f32 %v1248_v2, %v425_v40  ;;  %928 = vmatmul.msk.bf16.gmra.mxu3 %vm287_vm2, %v206_v35  ;;  %v672_v44 = vadd.f32 %v1375_v11, %v503_v39  ;;  %v75_v27 = vld [vmem:[%s1724_s0 + $0x1e0] sm:$0xff] }
  0xf0   :  { %v173_v33 = vpack.c.bf16 %v77_v28, %v75_v27 }
  0xf1   :  { %v595_v45 = vadd.f32 %v594_v60, %v426_v43  ;;  %464 = vmatmul.bf16.gmra.mxu0 %v169_v38  ;;  %v770_v46 = vmax.f32 %v672_v44, 0.0  ;;  %544 = vmatmul.bf16.gmra.mxu2 %v201_v41  ;;  %v73_v60 = vld [vmem:[%s1724_s0 + $0x1d0] sm:$0xff] }
  0xf2   :  { %v1496_v49 = vpop.f32.mrf.mxu3  ;;  %v171_v3 = vpack.c.bf16 %v73_v60, %v71_v59 }
  0xf3   :  { %v739_v25 = vmax.f32 %v595_v45, 0.0  ;;  %834 = vst [vmem:[%s1726_s3 + $0x148] sm:$0xff] %v770_v46 }
  0xf4   :  { %v601_v47 = vpop.f32.mrf.mxu1  ;;  %v505_v48 = vpop.f32.mrf.mxu2 }
  0xf5   :  { %803 = vst [vmem:[%s1726_s3 + $0x50] sm:$0xff] %v739_v25  ;;  %v506_v50 = vadd.f32 %v1248_v2, %v505_v48 }
  0xf6   :  { %v427_v11 = vpop.f32.mrf.mxu0 }
  0xf7   :  { %v428_v51 = vadd.f32 %v1248_v2, %v427_v11  ;;  %v675_v55 = vadd.f32 %v1394_v42, %v506_v50  ;;  %v137_v42 = vld [vmem:[%s1724_s0 + $0x3d0] sm:$0xff] }
  0xf8   :  { %v203_v6 = vpack.c.bf16 %v137_v42, %v135_v63 }
  0xf9   :  { %v597_v56 = vadd.f32 %v596_v15, %v428_v51  ;;  %v771_v57 = vmax.f32 %v675_v55, 0.0 }
  0xfa   :  { %v686_v9 = vpop.f32.mrf.mxu3 }
  0xfb   :  { %v740_v61 = vmax.f32 %v597_v56, 0.0  ;;  %835 = vst [vmem:[%s1726_s3 + $0x150] sm:$0xff] %v771_v57 }
  0xfc   :  { %v604_v62 = vpop.f32.mrf.mxu1  ;;  %v507_v1 = vpop.f32.mrf.mxu2 }
  0xfd   :  { %804 = vst [vmem:[%s1726_s3 + $0x58] sm:$0xff] %v740_v61  ;;  %v508_v4 = vadd.f32 %v1248_v2, %v507_v1 }
  0xfe   :  { %v430_v5 = vpop.f32.mrf.mxu0 }
  0xff   :  { %912 = vmatmul.msk.bf16.gmra.mxu1 %vm287_vm2, %v174_v58  ;;  %v431_v8 = vadd.f32 %v1248_v2, %v430_v5  ;;  %v677_v10 = vadd.f32 %v1423_v37, %v508_v4 }
 0x101   :  { %v600_v12 = vadd.f32 %v599_v30, %v431_v8  ;;  %469 = vmatmul.bf16.gmra.mxu0 %v171_v3  ;;  %v772_v13 = vmax.f32 %v677_v10, 0.0  ;;  %549 = vmatmul.bf16.gmra.mxu2 %v203_v6  ;;  %v139_v30 = vld [vmem:[%s1724_s0 + $0x3e0] sm:$0xff] }
 0x102   :  { %v689_v23 = vpop.f32.mrf.mxu3 }
 0x103   :  { %v741_v15 = vmax.f32 %v600_v12, 0.0  ;;  %836 = vst [vmem:[%s1726_s3 + $0x158] sm:$0xff] %v772_v13 }
 0x104   :  { %v606_v16 = vpop.f32.mrf.mxu1  ;;  %v510_v17 = vpop.f32.mrf.mxu2 }
 0x105   :  { %805 = vst [vmem:[%s1726_s3 + $0x60] sm:$0xff] %v741_v15  ;;  %v511_v54 = vadd.f32 %v1248_v2, %v510_v17 }
 0x106   :  { %v432_v18 = vpop.f32.mrf.mxu0 }
 0x107   :  { %v433_v37 = vadd.f32 %v1248_v2, %v432_v18  ;;  %v680_v21 = vadd.f32 %v1442_v0, %v511_v54  ;;  %v141_v0 = vld [vmem:[%s1724_s0 + $0x3f0] sm:$0xff] }
 0x108   :  { %v205_v38 = vpack.c.bf16 %v141_v0, %v139_v30 }
 0x109   :  { %v602_v22 = vadd.f32 %v601_v47, %v433_v37  ;;  %v773_v24 = vmax.f32 %v680_v21, 0.0 }
 0x10a   :  { %v691_v46 = vpop.f32.mrf.mxu3 }
 0x10b   :  { %v742_v29 = vmax.f32 %v602_v22, 0.0  ;;  %837 = vst [vmem:[%s1726_s3 + $0x160] sm:$0xff] %v773_v24 }
 0x10c   :  { %v609_v7 = vpop.f32.mrf.mxu1  ;;  %v512_v32 = vpop.f32.mrf.mxu2 }
 0x10d   :  { %806 = vst [vmem:[%s1726_s3 + $0x68] sm:$0xff] %v742_v29  ;;  %v513_v35 = vadd.f32 %v1248_v2, %v512_v32 }
 0x10e   :  { %v435_v36 = vpop.f32.mrf.mxu0 }
 0x10f   :  { %913 = vmatmul.msk.bf16.gmra.mxu1 %vm287_vm2, %v176_v26  ;;  %v436_v39 = vadd.f32 %v1248_v2, %v435_v36  ;;  %v682_v40 = vadd.f32 %v1477_v34, %v513_v35 }
 0x111   :  { %v605_v41 = vadd.f32 %v604_v62, %v436_v39  ;;  %474 = vmatmul.bf16.gmra.mxu0 %v173_v33  ;;  %v774_v43 = vmax.f32 %v682_v40, 0.0  ;;  %554 = vmatmul.bf16.gmra.mxu2 %v205_v38 }
 0x112   :  { %v694_v56 = vpop.f32.mrf.mxu3 }
 0x113   :  { %v743_v44 = vmax.f32 %v605_v41, 0.0  ;;  %838 = vst [vmem:[%s1726_s3 + $0x168] sm:$0xff] %v774_v43 }
 0x114   :  { %v611_v45 = vpop.f32.mrf.mxu1  ;;  %v515_v25 = vpop.f32.mrf.mxu2 }
 0x115   :  { %807 = vst [vmem:[%s1726_s3 + $0x70] sm:$0xff] %v743_v44  ;;  %v516_v47 = vadd.f32 %v1248_v2, %v515_v25 }
 0x116   :  { %v437_v48 = vpop.f32.mrf.mxu0 }
 0x117   :  { %v438_v34 = vadd.f32 %v1248_v2, %v437_v48  ;;  %v685_v50 = vadd.f32 %v1496_v49, %v516_v47 }
 0x119   :  { %v607_v11 = vadd.f32 %v606_v16, %v438_v34  ;;  %v775_v51 = vmax.f32 %v685_v50, 0.0 }
 0x11a   :  { %v696_v5 = vpop.f32.mrf.mxu3 }
 0x11b   :  { %v744_v52 = vmax.f32 %v607_v11, 0.0  ;;  %839 = vst [vmem:[%s1726_s3 + $0x170] sm:$0xff] %v775_v51 }
 0x11c   :  { %v614_v53 = vpop.f32.mrf.mxu1  ;;  %v517_v55 = vpop.f32.mrf.mxu2 }
 0x11d   :  { %808 = vst [vmem:[%s1726_s3 + $0x78] sm:$0xff] %v744_v52  ;;  %v518_v57 = vadd.f32 %v1248_v2, %v517_v55 }
 0x11e   :  { %v440_v58 = vpop.f32.mrf.mxu0 }
 0x11f   :  { %v441_v59 = vadd.f32 %v1248_v2, %v440_v58  ;;  %v687_v49 = vadd.f32 %v686_v9, %v518_v57 }
 0x121   :  { %v610_v60 = vadd.f32 %v609_v7, %v441_v59  ;;  %v776_v61 = vmax.f32 %v687_v49, 0.0 }
 0x122   :  { %v699_v37 = vpop.f32.mrf.mxu3 }
 0x123   :  { %v745_v62 = vmax.f32 %v610_v60, 0.0  ;;  %840 = vst [vmem:[%s1726_s3 + $0x178] sm:$0xff] %v776_v61 }
 0x124   :  { %v616_v63 = vpop.f32.mrf.mxu1  ;;  %v520_v42 = vpop.f32.mrf.mxu2 }
 0x125   :  { %809 = vst [vmem:[%s1726_s3 + $0x80] sm:$0xff] %v745_v62  ;;  %v521_v1 = vadd.f32 %v1248_v2, %v520_v42 }
 0x126   :  { %v442_v3 = vpop.f32.mrf.mxu0 }
 0x127   :  { %v443_v4 = vadd.f32 %v1248_v2, %v442_v3  ;;  %v690_v6 = vadd.f32 %v689_v23, %v521_v1 }
 0x129   :  { %v612_v8 = vadd.f32 %v611_v45, %v443_v4  ;;  %v777_v9 = vmax.f32 %v690_v6, 0.0 }
 0x12a   :  { %v701_v0 = vpop.f32.mrf.mxu3 }
 0x12b   :  { %v746_v10 = vmax.f32 %v612_v8, 0.0  ;;  %841 = vst [vmem:[%s1726_s3 + $0x180] sm:$0xff] %v777_v9 }
 0x12c   :  { %v619_v12 = vpop.f32.mrf.mxu1  ;;  %v522_v13 = vpop.f32.mrf.mxu2 }
 0x12d   :  { %810 = vst [vmem:[%s1726_s3 + $0x88] sm:$0xff] %v746_v10  ;;  %v523_v15 = vadd.f32 %v1248_v2, %v522_v13 }
 0x12e   :  { %v445_v16 = vpop.f32.mrf.mxu0 }
 0x12f   :  { %v446_v17 = vadd.f32 %v1248_v2, %v445_v16  ;;  %v692_v54 = vadd.f32 %v691_v46, %v523_v15 }
 0x131   :  { %v615_v18 = vadd.f32 %v614_v53, %v446_v17  ;;  %v778_v19 = vmax.f32 %v692_v54, 0.0 }
 0x132   :  { %v704_v45 = vpop.f32.mrf.mxu3 }
 0x133   :  { %v747_v20 = vmax.f32 %v615_v18, 0.0  ;;  %842 = vst [vmem:[%s1726_s3 + $0x188] sm:$0xff] %v778_v19 }
 0x134   :  { %v621_v21 = vpop.f32.mrf.mxu1  ;;  %v525_v22 = vpop.f32.mrf.mxu2 }
 0x135   :  { %811 = vst [vmem:[%s1726_s3 + $0x90] sm:$0xff] %v747_v20  ;;  %v526_v23 = vadd.f32 %v1248_v2, %v525_v22 }
 0x136   :  { %v447_v24 = vpop.f32.mrf.mxu0 }
 0x137   :  { %v448_v26 = vadd.f32 %v1248_v2, %v447_v24  ;;  %v695_v27 = vadd.f32 %v694_v56, %v526_v23 }
 0x139   :  { %v617_v28 = vadd.f32 %v616_v63, %v448_v26  ;;  %v779_v29 = vmax.f32 %v695_v27, 0.0 }
 0x13a   :  { %v706_v57 = vpop.f32.mrf.mxu3 }
 0x13b   :  { %v748_v7 = vmax.f32 %v617_v28, 0.0  ;;  %843 = vst [vmem:[%s1726_s3 + $0x190] sm:$0xff] %v779_v29 }
 0x13c   :  { %v624_v30 = vpop.f32.mrf.mxu1  ;;  %v527_v32 = vpop.f32.mrf.mxu2 }
 0x13d   :  { %812 = vst [vmem:[%s1726_s3 + $0x98] sm:$0xff] %v748_v7  ;;  %v528_v33 = vadd.f32 %v1248_v2, %v527_v32 }
 0x13e   :  { %v450_v35 = vpop.f32.mrf.mxu0 }
 0x13f   :  { %v451_v36 = vadd.f32 %v1248_v2, %v450_v35  ;;  %v697_v38 = vadd.f32 %v696_v5, %v528_v33 }
 0x141   :  { %v620_v39 = vadd.f32 %v619_v12, %v451_v36  ;;  %v780_v40 = vmax.f32 %v697_v38, 0.0 }
 0x142   :  { %v709_v5 = vpop.f32.mrf.mxu3 }
 0x143   :  { %v749_v41 = vmax.f32 %v620_v39, 0.0  ;;  %844 = vst [vmem:[%s1726_s3 + $0x198] sm:$0xff] %v780_v40 }
 0x144   :  { %v626_v43 = vpop.f32.mrf.mxu1  ;;  %v530_v44 = vpop.f32.mrf.mxu2 }
 0x145   :  { %813 = vst [vmem:[%s1726_s3 + $0xa0] sm:$0xff] %v749_v41  ;;  %v531_v46 = vadd.f32 %v1248_v2, %v530_v44 }
 0x146   :  { %v452_v25 = vpop.f32.mrf.mxu0 }
 0x147   :  { %v453_v47 = vadd.f32 %v1248_v2, %v452_v25  ;;  %v700_v48 = vadd.f32 %v699_v37, %v531_v46 }
 0x149   :  { %v622_v34 = vadd.f32 %v621_v21, %v453_v47  ;;  %v781_v50 = vmax.f32 %v700_v48, 0.0 }
 0x14a   :  { %v711_v19 = vpop.f32.mrf.mxu3 }
 0x14b   :  { %v750_v11 = vmax.f32 %v622_v34, 0.0  ;;  %845 = vst [vmem:[%s1726_s3 + $0x1a0] sm:$0xff] %v781_v50 }
 0x14c   :  { %v629_v51 = vpop.f32.mrf.mxu1  ;;  %v532_v52 = vpop.f32.mrf.mxu2 }
 0x14d   :  { %814 = vst [vmem:[%s1726_s3 + $0xa8] sm:$0xff] %v750_v11  ;;  %v533_v53 = vadd.f32 %v1248_v2, %v532_v52 }
 0x14e   :  { %v455_v55 = vpop.f32.mrf.mxu0 }
 0x14f   :  { %v456_v56 = vadd.f32 %v1248_v2, %v455_v55  ;;  %v702_v58 = vadd.f32 %v701_v0, %v533_v53 }
 0x151   :  { %v625_v59 = vadd.f32 %v624_v30, %v456_v56  ;;  %v782_v49 = vmax.f32 %v702_v58, 0.0 }
 0x152   :  { %v714_v30 = vpop.f32.mrf.mxu3 }
 0x153   :  { %v751_v60 = vmax.f32 %v625_v59, 0.0  ;;  %846 = vst [vmem:[%s1726_s3 + $0x1a8] sm:$0xff] %v782_v49 }
 0x154   :  { %v631_v61 = vpop.f32.mrf.mxu1  ;;  %v535_v62 = vpop.f32.mrf.mxu2 }
 0x155   :  { %815 = vst [vmem:[%s1726_s3 + $0xb0] sm:$0xff] %v751_v60  ;;  %v536_v63 = vadd.f32 %v1248_v2, %v535_v62 }
 0x156   :  { %v457_v42 = vpop.f32.mrf.mxu0 }
 0x157   :  { %v458_v1 = vadd.f32 %v1248_v2, %v457_v42  ;;  %v705_v3 = vadd.f32 %v704_v45, %v536_v63 }
 0x159   :  { %v627_v4 = vadd.f32 %v626_v43, %v458_v1  ;;  %v783_v6 = vmax.f32 %v705_v3, 0.0  ;;  %v481_v3 = vadd.f32 %v1248_v2, %v1264_v14 }
 0x15a   :  { %v716_v46 = vpop.f32.mrf.mxu3 }
 0x15b   :  { %v752_v8 = vmax.f32 %v627_v4, 0.0  ;;  %847 = vst [vmem:[%s1726_s3 + $0x1b0] sm:$0xff] %v783_v6 }
 0x15c   :  { %v634_v9 = vpop.f32.mrf.mxu1  ;;  %v537_v10 = vpop.f32.mrf.mxu2 }
 0x15d   :  { %816 = vst [vmem:[%s1726_s3 + $0xb8] sm:$0xff] %v752_v8  ;;  %v538_v12 = vadd.f32 %v1248_v2, %v537_v10 }
 0x15e   :  { %v460_v13 = vpop.f32.mrf.mxu0 }
 0x15f   :  { %v461_v15 = vadd.f32 %v1248_v2, %v460_v13  ;;  %v707_v16 = vadd.f32 %v706_v57, %v538_v12 }
 0x161   :  { %v630_v17 = vadd.f32 %v629_v51, %v461_v15  ;;  %v784_v54 = vmax.f32 %v707_v16, 0.0 }
 0x162   :  { %v719_v57 = vpop.f32.mrf.mxu3 }
 0x163   :  { %v753_v18 = vmax.f32 %v630_v17, 0.0  ;;  %848 = vst [vmem:[%s1726_s3 + $0x1b8] sm:$0xff] %v784_v54  ;;  %v483_v54 = vadd.f32 %v1248_v2, %v1296_v31 }
 0x164   :  { %v636_v37 = vpop.f32.mrf.mxu1  ;;  %v540_v20 = vpop.f32.mrf.mxu2 }
 0x165   :  { %817 = vst [vmem:[%s1726_s3 + $0xc0] sm:$0xff] %v753_v18  ;;  %v541_v21 = vadd.f32 %v1248_v2, %v540_v20 }
 0x166   :  { %v462_v22 = vpop.f32.mrf.mxu0 }
 0x167   :  { %v463_v23 = vadd.f32 %v1248_v2, %v462_v22  ;;  %v710_v24 = vadd.f32 %v709_v5, %v541_v21 }
 0x169   :  { %v632_v26 = vadd.f32 %v631_v61, %v463_v23  ;;  %v785_v27 = vmax.f32 %v710_v24, 0.0 }
 0x16a   :  { %v721_v6 = vpop.f32.mrf.mxu3 }
 0x16b   :  { %v754_v28 = vmax.f32 %v632_v26, 0.0  ;;  %849 = vst [vmem:[%s1726_s3 + $0x1c0] sm:$0xff] %v785_v27 }
 0x16c   :  { %v639_v29 = vpop.f32.mrf.mxu1  ;;  %v542_v7 = vpop.f32.mrf.mxu2 }
 0x16d   :  { %818 = vst [vmem:[%s1726_s3 + $0xc8] sm:$0xff] %v754_v28  ;;  %v543_v0 = vadd.f32 %v1248_v2, %v542_v7 }
 0x16e   :  { %v465_v32 = vpop.f32.mrf.mxu0 }
 0x16f   :  { %v466_v33 = vadd.f32 %v1248_v2, %v465_v32  ;;  %v712_v35 = vadd.f32 %v711_v19, %v543_v0 }
 0x171   :  { %v635_v36 = vadd.f32 %v634_v9, %v466_v33  ;;  %v786_v38 = vmax.f32 %v712_v35, 0.0 }
 0x172   :  { %v724_v21 = vpop.f32.mrf.mxu3 }
 0x173   :  { %v755_v39 = vmax.f32 %v635_v36, 0.0  ;;  %850 = vst [vmem:[%s1726_s3 + $0x1c8] sm:$0xff] %v786_v38 }
 0x174   :  { %v641_v40 = vpop.f32.mrf.mxu1  ;;  %v545_v41 = vpop.f32.mrf.mxu2 }
 0x175   :  { %819 = vst [vmem:[%s1726_s3 + $0xd0] sm:$0xff] %v755_v39  ;;  %v546_v43 = vadd.f32 %v1248_v2, %v545_v41 }
 0x176   :  { %v467_v44 = vpop.f32.mrf.mxu0 }
 0x177   :  { %v468_v45 = vadd.f32 %v1248_v2, %v467_v44  ;;  %v715_v25 = vadd.f32 %v714_v30, %v546_v43 }
 0x179   :  { %v637_v47 = vadd.f32 %v636_v37, %v468_v45  ;;  %v787_v48 = vmax.f32 %v715_v25, 0.0 }
 0x17a   :  { %v726_v32 = vpop.f32.mrf.mxu3 }
 0x17b   :  { %v756_v34 = vmax.f32 %v637_v47, 0.0  ;;  %851 = vst [vmem:[%s1726_s3 + $0x1d0] sm:$0xff] %v787_v48 }
 0x17c   :  { %v644_v50 = vpop.f32.mrf.mxu1  ;;  %v547_v11 = vpop.f32.mrf.mxu2 }
 0x17d   :  { %820 = vst [vmem:[%s1726_s3 + $0xd8] sm:$0xff] %v756_v34  ;;  %v548_v51 = vadd.f32 %v1248_v2, %v547_v11 }
 0x17e   :  { %v470_v52 = vpop.f32.mrf.mxu0 }
 0x17f   :  { %v471_v53 = vadd.f32 %v1248_v2, %v470_v52  ;;  %v717_v55 = vadd.f32 %v716_v46, %v548_v51 }
 0x181   :  { %v640_v56 = vadd.f32 %v639_v29, %v471_v53  ;;  %v788_v58 = vmax.f32 %v717_v55, 0.0 }
 0x183   :  { %v757_v59 = vmax.f32 %v640_v56, 0.0  ;;  %852 = vst [vmem:[%s1726_s3 + $0x1d8] sm:$0xff] %v788_v58 }
 0x184   :  { %v646_v49 = vpop.f32.mrf.mxu1  ;;  %v550_v60 = vpop.f32.mrf.mxu2 }
 0x185   :  { %821 = vst [vmem:[%s1726_s3 + $0xe0] sm:$0xff] %v757_v59  ;;  %v551_v61 = vadd.f32 %v1248_v2, %v550_v60 }
 0x186   :  { %v472_v62 = vpop.f32.mrf.mxu0 }
 0x187   :  { %v473_v63 = vadd.f32 %v1248_v2, %v472_v62  ;;  %v720_v42 = vadd.f32 %v719_v57, %v551_v61 }
 0x189   :  { %v642_v1 = vadd.f32 %v641_v40, %v473_v63  ;;  %v789_v4 = vmax.f32 %v720_v42, 0.0 }
 0x18b   :  { %v758_v5 = vmax.f32 %v642_v1, 0.0  ;;  %853 = vst [vmem:[%s1726_s3 + $0x1e0] sm:$0xff] %v789_v4 }
 0x18c   :  { %v649_v8 = vpop.f32.mrf.mxu1  ;;  %v552_v10 = vpop.f32.mrf.mxu2 }
 0x18d   :  { %v650_v9 = vadd.f32 %v649_v8, %v481_v3  ;;  %822 = vst [vmem:[%s1726_s3 + $0xe8] sm:$0xff] %v758_v5  ;;  %v553_v13 = vadd.f32 %v1248_v2, %v552_v10 }
 0x18e   :  { %v475_v15 = vpop.f32.mrf.mxu0 }
 0x18f   :  { %v761_v12 = vmax.f32 %v650_v9, 0.0  ;;  %v476_v14 = vadd.f32 %v1248_v2, %v475_v15  ;;  %v722_v16 = vadd.f32 %v721_v6, %v553_v13 }
 0x191   :  { %825 = vst [vmem:[%s1726_s3 + $0x100] sm:$0xff] %v761_v12  ;;  %v645_v17 = vadd.f32 %v644_v50, %v476_v14  ;;  %v790_v18 = vmax.f32 %v722_v16, 0.0 }
 0x193   :  { %v759_v37 = vmax.f32 %v645_v17, 0.0  ;;  %854 = vst [vmem:[%s1726_s3 + $0x1e8] sm:$0xff] %v790_v18 }
 0x194   :  { %v651_v19 = vpop.f32.mrf.mxu1  ;;  %v555_v22 = vpop.f32.mrf.mxu2 }
 0x195   :  { %v652_v20 = vadd.f32 %v651_v19, %v483_v54  ;;  %823 = vst [vmem:[%s1726_s3 + $0xf0] sm:$0xff] %v759_v37  ;;  %v556_v24 = vadd.f32 %v1248_v2, %v555_v22 }
 0x196   :  { %v477_v26 = vpop.f32.mrf.mxu0 }
 0x197   :  { %v762_v23 = vmax.f32 %v652_v20, 0.0  ;;  %v478_v31 = vadd.f32 %v1248_v2, %v477_v26  ;;  %v725_v27 = vadd.f32 %v724_v21, %v556_v24 }
 0x199   :  { %826 = vst [vmem:[%s1726_s3 + $0x108] sm:$0xff] %v762_v23  ;;  %v647_v28 = vadd.f32 %v646_v49, %v478_v31  ;;  %v791_v29 = vmax.f32 %v725_v27, 0.0 }
 0x19b   :  { %v760_v7 = vmax.f32 %v647_v28, 0.0  ;;  %855 = vst [vmem:[%s1726_s3 + $0x1f0] sm:$0xff] %v791_v29 }
 0x19c   :  { %v557_v30 = vpop.f32.mrf.mxu2 }
 0x19d   :  { %824 = vst [vmem:[%s1726_s3 + $0xf8] sm:$0xff] %v760_v7  ;;  %v558_v0 = vadd.f32 %v1248_v2, %v557_v30 }
 0x19f   :  { %v727_v33 = vadd.f32 %v726_v32, %v558_v0 }
 0x1a1   :  { %v792_v35 = vmax.f32 %v727_v33, 0.0 }
 0x1a3   :  { %856 = vst [vmem:[%s1726_s3 + $0x1f8] sm:$0xff] %v792_v35 }

// kernel: densenet_forward.13
= control target key start
LH: loop header
LB: loop body
LE: loop exit
PB: predicated region body
PF: predicated region fallthrough
CT: control target
= control target key end

     0   :  { %s2512_s24 = smov 0   ;;  %s3145_s0 = inlined_call_operand.vmem [shape: f32[2,64,128], index: 0, kind: input, shape index: {}]   ;;  %s3146_s1 = inlined_call_operand.vmem [shape: f32[1,128], index: 1, kind: input, shape index: {}]   ;;  %s3147_s2 = inlined_call_operand.vmem [shape: f32[1,128], index: 2, kind: input, shape index: {}]   ;;  %s3148_s3 = inlined_call_operand.vmem [shape: bf16[128,128], index: 3, kind: input, shape index: {}]   ;;  %s3149_s4 = inlined_call_operand.vmem [shape: f32[1,128], index: 4, kind: input, shape index: {}]   ;;  %s3150_s5 = inlined_call_operand.vmem [shape: bf16[9,128,8], index: 5, kind: input, shape index: {}]   ;;  %s3151_s6 = inlined_call_operand.vmem [shape: f32[2,64,1], index: 6, kind: input, shape index: {}]   ;;  %s3152_s7 = inlined_call_operand.vmem [shape: f32[2,64,8], index: 7, kind: output, shape index: {}]  }
   0x1 LB: > { %s1809_s25 = sadd.s32 4294967295, %s2469_s24   ;;  %p1813_p0 = scmp.ge.s32.totalorder %s2469_s24, 1  ;;  %s2469_s24 = sphi %s2512_s24, %s17_s24  }
   0x2   : > { %p237_p1 = scmp.lt.s32.totalorder %s2469_s24, 3 }
   0x4   : > { %p238_p2 = pnand %p1813_p0, %p237_p1 }
   0x6   : > { %241 = sbr.rel (%p238_p2) target bundleno = 499 (0x1f3), region = 48 }
   0xb   : > { %v2285_v0 = vld [vmem:[%s3148_s3 + $0x38] sm:$0xff]  ;;  %p269_p3 = scmp.lt.s32.totalorder %s1809_s25, 1  ;;  %v2284_v1 = vld [vmem:[%s3148_s3 + $0x30] sm:$0xff]  ;;  %v2283_v2 = vld [vmem:[%s3148_s3 + $0x28] sm:$0xff]  ;;  %v2471_v55 = vmov 0   ;;  %vm1745_vm2 = vcmask 64512  }
   0xc   : > { %392 = vmatpush.bf16.msra.mxu0 %v2285_v0  ;;  %2432 = vmatpush.bf16.msra.mxu2 %v2285_v0  ;;  %v2282_v3 = vld [vmem:[%s3148_s3 + $0x20] sm:$0xff]  ;;  %v2281_v4 = vld [vmem:[%s3148_s3 + $0x18] sm:$0xff]  ;;  %v2280_v16 = vld [vmem:[%s3148_s3 + $0x10] sm:$0xff]  ;;  %439 = vst [vmem:[#allocation2 + $0x8] sm:$0xf] %v2471_v55 }
   0xd   : > { %s3164_s25 = smov (!%p269_p3, %s1809_s25), 1  ;;  %v2460_v6 = vld [vmem:[%s3146_s1] ss:$0 sm:$0xff]  ;;  %v2293_v15 = vld [vmem:[%s3150_s5 + $0x38] sm:$0xff]  ;;  %v2279_v21 = vld [vmem:[%s3148_s3 + $0x8] sm:$0xff]  ;;  %2457 = vset.pattern.permute.xlu0 %v2471_v55  ;;  %2458 = vset.pattern.permute.xlu1 %v2471_v55 }
   0xe   : > { %s2276_s9 = sshll.u32 %s3164_s25, 6  ;;  %v2461_v12 = vld [vmem:[%s3147_s2] ss:$0 sm:$0xff]  ;;  %622 = vmatpush.bf16.msra.mxu1 %v2293_v15  ;;  %2440 = vmatpush.bf16.msra.mxu3 %v2293_v15  ;;  %v2301_v27 = vld [vmem:[%s3150_s5 + $0x78] sm:$0xff]  ;;  %v2300_v34 = vld [vmem:[%s3150_s5 + $0x70] sm:$0xff] }
   0xf   : > { %s2540_s14 = scalar_lea.vmem %s3145_s0, %s2276_s9  ;;  %v2278_v26 = vld [vmem:[%s3148_s3] sm:$0xff]  ;;  %v2292_v49 = vld [vmem:[%s3150_s5 + $0x30] sm:$0xff]  ;;  %v2291_v50 = vld [vmem:[%s3150_s5 + $0x28] sm:$0xff]  ;;  %440 = vst [vmem:[#allocation2 + $0xc] sm:$0xf] %v2471_v55  ;;  %2459 = vset.pattern.permute.xlu2 %v2471_v55  ;;  %s3079_s29 = scalar_lea.vmem %s3152_s7, %s2276_s9 }
  0x10   : > { %393 = vmatpush.bf16.msra.mxu0 %v2284_v1  ;;  %2433 = vmatpush.bf16.msra.mxu2 %v2284_v1  ;;  %v280_v5 = vld [vmem:[%s2540_s14] sm:$0xff]  ;;  %v281_v7 = vld [vmem:[%s2540_s14 + $0x8] sm:$0xff]  ;;  %v282_v30 = vld [vmem:[%s2540_s14 + $0x10] sm:$0xff]  ;;  %437 = vst [vmem:[#allocation2] sm:$0xf] %v2471_v55 }
  0x11   : > { %v284_v8 = vld [vmem:[%s2540_s14 + $0x20] sm:$0xff]  ;;  %v285_v9 = vld [vmem:[%s2540_s14 + $0x28] sm:$0xff]  ;;  %v292_v10 = vmul.f32 %v2460_v6, %v280_v5  ;;  %v293_v11 = vmul.f32 %v2460_v6, %v281_v7  ;;  %v283_v31 = vld [vmem:[%s2540_s14 + $0x18] sm:$0xff]  ;;  %v294_v35 = vmul.f32 %v2460_v6, %v282_v30  ;;  %438 = vst [vmem:[#allocation2 + $0x4] sm:$0xf] %v2471_v55 }
  0x12   : > { %v296_v13 = vmul.f32 %v2460_v6, %v284_v8  ;;  %v297_v14 = vmul.f32 %v2460_v6, %v285_v9  ;;  %v286_v32 = vld [vmem:[%s2540_s14 + $0x30] sm:$0xff]  ;;  %v287_v33 = vld [vmem:[%s2540_s14 + $0x38] sm:$0xff]  ;;  %v295_v36 = vmul.f32 %v2460_v6, %v283_v31  ;;  %623 = vmatpush.bf16.msra.mxu1 %v2292_v49  ;;  %2441 = vmatpush.bf16.msra.mxu3 %v2292_v49  ;;  %v2299_v51 = vld [vmem:[%s3150_s5 + $0x68] sm:$0xff]  ;;  %vm525_vm0 = vsmask.f32 4352 }
  0x13   : > { %v304_v17 = vadd.f32 %v2461_v12, %v292_v10  ;;  %v305_v18 = vadd.f32 %v2461_v12, %v293_v11  ;;  %v298_v37 = vmul.f32 %v2460_v6, %v286_v32  ;;  %v299_v38 = vmul.f32 %v2460_v6, %v287_v33  ;;  %v2290_v52 = vld [vmem:[%s3150_s5 + $0x20] sm:$0xff]  ;;  %v2289_v54 = vld [vmem:[%s3150_s5 + $0x18] sm:$0xff]  ;;  %v2288_v57 = vld [vmem:[%s3150_s5 + $0x10] sm:$0xff]  ;;  %441 = vst [vmem:[#allocation2 + $0x10] sm:$0xf] %v2471_v55 }
  0x14   : > { %394 = vmatpush.bf16.msra.mxu0 %v2283_v2  ;;  %2434 = vmatpush.bf16.msra.mxu2 %v2283_v2  ;;  %v308_v19 = vadd.f32 %v2461_v12, %v296_v13  ;;  %v309_v20 = vadd.f32 %v2461_v12, %v297_v14  ;;  %v306_v39 = vadd.f32 %v2461_v12, %v294_v35  ;;  %v2298_v53 = vld [vmem:[%s3150_s5 + $0x60] sm:$0xff]  ;;  %v2297_v56 = vld [vmem:[%s3150_s5 + $0x58] sm:$0xff]  ;;  %v2296_v58 = vld [vmem:[%s3150_s5 + $0x50] sm:$0xff]  ;;  %vm837_vm1 = vsmask.f32 7424 }
  0x15   : > { %v312_v22 = vmax.f32 %v304_v17, 0.0  ;;  %v313_v23 = vmax.f32 %v305_v18, 0.0  ;;  %v307_v40 = vadd.f32 %v2461_v12, %v295_v36  ;;  %v310_v41 = vadd.f32 %v2461_v12, %v298_v37  ;;  %442 = vst [vmem:[#allocation2 + $0x14] sm:$0xf] %v2471_v55  ;;  %v2287_v59 = vld [vmem:[%s3150_s5 + $0x8] sm:$0xff]  ;;  %v2317_v60 = vld [vmem:[%s3150_s5 + $0xf8] sm:$0xff] }
  0x16   : > { %v316_v24 = vmax.f32 %v308_v19, 0.0  ;;  %v317_v25 = vmax.f32 %v309_v20, 0.0  ;;  %v311_v42 = vadd.f32 %v2461_v12, %v299_v38  ;;  %v314_v43 = vmax.f32 %v306_v39, 0.0  ;;  %624 = vmatpush.bf16.msra.mxu1 %v2291_v50  ;;  %2442 = vmatpush.bf16.msra.mxu3 %v2291_v50  ;;  %443 = vst [vmem:[#allocation2 + $0x18] sm:$0xf] %v2471_v55  ;;  %v2295_v61 = vld [vmem:[%s3150_s5 + $0x48] sm:$0xff] }
  0x17   : > { %v320_v28 = vpack.c.bf16 %v313_v23, %v312_v22  ;;  %v315_v44 = vmax.f32 %v307_v40, 0.0  ;;  %v318_v45 = vmax.f32 %v310_v41, 0.0  ;;  %447 = vst [vmem:[#allocation2 + $0x28] sm:$0xf] %v2471_v55  ;;  %v2286_v62 = vld [vmem:[%s3150_s5] sm:$0xff]  ;;  %v2316_v63 = vld [vmem:[%s3150_s5 + $0xf0] sm:$0xff] }
  0x18   : > { %395 = vmatpush.bf16.msra.mxu0 %v2282_v3  ;;  %2435 = vmatpush.bf16.msra.mxu2 %v2282_v3  ;;  %v322_v29 = vpack.c.bf16 %v317_v25, %v316_v24  ;;  %v319_v46 = vmax.f32 %v311_v42, 0.0  ;;  %448 = vst [vmem:[#allocation2 + $0x2c] sm:$0xf] %v2471_v55  ;;  %v2294_v0 = vld [vmem:[%s3150_s5 + $0x40] sm:$0xff]  ;;  %v2325_v1 = vld [vmem:[%s3150_s5 + $0x138] sm:$0xff]  ;;  %v2315_v2 = vld [vmem:[%s3150_s5 + $0xe8] sm:$0xff] }
  0x19   : > { %v321_v47 = vpack.c.bf16 %v315_v44, %v314_v43  ;;  %v2324_v3 = vld [vmem:[%s3150_s5 + $0x130] sm:$0xff]  ;;  %v2323_v5 = vld [vmem:[%s3150_s5 + $0x128] sm:$0xff]  ;;  %v2313_v6 = vld [vmem:[%s3150_s5 + $0xd8] sm:$0xff] }
  0x1a   : > { %v323_v48 = vpack.c.bf16 %v319_v46, %v318_v45  ;;  %625 = vmatpush.bf16.msra.mxu1 %v2290_v52  ;;  %2443 = vmatpush.bf16.msra.mxu3 %v2290_v52  ;;  %v469_v8 = vld [vmem:[%s3151_s6] sm:$0xff]  ;;  %v2312_v10 = vld [vmem:[%s3150_s5 + $0xd0] sm:$0xff]  ;;  %v2309_v13 = vld [vmem:[%s3150_s5 + $0xb8] sm:$0xff] }
  0x1b   : > { %653 = vperm.xlu0 %2457, %v469_v8   ;;  %v2322_v9 = vld [vmem:[%s3150_s5 + $0x120] sm:$0xff]  ;;  %v2321_v14 = vld [vmem:[%s3150_s5 + $0x118] sm:$0xff]  ;;  %v470_v22 = vld [vmem:[%s3151_s6 + $0x8] sm:$0xff] }
  0x1c   : > { %396 = vmatpush.bf16.msra.mxu0 %v2281_v4  ;;  %2436 = vmatpush.bf16.msra.mxu2 %v2281_v4  ;;  %v2314_v4 = vld [vmem:[%s3150_s5 + $0xe0] sm:$0xff]  ;;  %v2308_v24 = vld [vmem:[%s3150_s5 + $0xb0] sm:$0xff]  ;;  %v2307_v32 = vld [vmem:[%s3150_s5 + $0xa8] sm:$0xff] }
  0x1d   : > { %v2652_v11 = vld [vmem:[%s3149_s4] ss:$0 sm:$0xff]  ;;  %v2320_v25 = vld [vmem:[%s3150_s5 + $0x110] sm:$0xff]  ;;  %v2319_v33 = vld [vmem:[%s3150_s5 + $0x108] sm:$0xff] }
  0x1e   : > { %626 = vmatpush.bf16.msra.mxu1 %v2289_v54  ;;  %2444 = vmatpush.bf16.msra.mxu3 %v2289_v54  ;;  %v2379_v12 = vld [vmem:[#allocation2] sm:$0xff]   ;;  %v471_v38 = vld [vmem:[%s3151_s6 + $0x10] sm:$0xff] }
  0x1f   : > { %v527_v19 = vshrl.u32 %v2379_v12, 16  ;;  %v530_v20 = vshll.u32 %v2379_v12, 16  ;;  %663 = vperm.xlu1 %2458, %v471_v38   ;;  %v2306_v45 = vld [vmem:[%s3150_s5 + $0xa0] sm:$0xff] }
  0x20   : > { %397 = vmatpush.bf16.msra.mxu0 %v2280_v16  ;;  %2437 = vmatpush.bf16.msra.mxu2 %v2280_v16  ;;  %v2311_v16 = vld [vmem:[%s3150_s5 + $0xc8] sm:$0xff]  ;;  %v2318_v46 = vld [vmem:[%s3150_s5 + $0x100] sm:$0xff] }
  0x22   : > { %627 = vmatpush.bf16.msra.mxu1 %v2288_v57  ;;  %2445 = vmatpush.bf16.msra.mxu3 %v2288_v57 }
  0x23   : > { %658 = vperm.xlu0 %2457, %v470_v22  }
  0x24   : > { %398 = vmatpush.bf16.msra.mxu0 %v2279_v21  ;;  %2438 = vmatpush.bf16.msra.mxu2 %v2279_v21  ;;  %v2310_v21 = vld [vmem:[%s3150_s5 + $0xc0] sm:$0xff] }
  0x26   : > { %628 = vmatpush.bf16.msra.mxu1 %v2287_v59  ;;  %2446 = vmatpush.bf16.msra.mxu3 %v2287_v59 }
  0x28   : > { %399 = vmatpush.bf16.msra.mxu0 %v2278_v26  ;;  %2439 = vmatpush.bf16.msra.mxu2 %v2278_v26 }
  0x2a   : > { %629 = vmatpush.bf16.msra.mxu1 %v2286_v62  ;;  %2447 = vmatpush.bf16.msra.mxu3 %v2286_v62 }
  0x2b   : > { %400 = vmatmul.bf16.vlgmr.msra.gmra.mxu0 %v320_v28  ;;  %410 = vmatmul.bf16.vlgmr.msra.gmra.mxu2 %v322_v29  ;;  %v529_v28 = vrot.slane %v527_v19, 3  ;;  %v532_v29 = vrot.slane %v530_v20, 4  ;;  %v2330_v19 = vld [vmem:[%s3150_s5 + $0x160] sm:$0xff] }
  0x2c   : > { %780 = vmatpush.bf16.msrb.mxu2 %v2301_v27  ;;  %1101 = vmatpush.bf16.msrb.mxu0 %v2317_v60 }
  0x2d   : > { %v533_v40 = vor.u32 %v532_v29, %v529_v28 }
  0x2e   : > { %1216 = vmatpush.bf16.msrb.mxu1 %v2325_v1  ;;  %926 = vmatpush.bf16.msrb.mxu3 %v2309_v13 }
  0x30   : > { %781 = vmatpush.bf16.msrb.mxu2 %v2300_v34  ;;  %1102 = vmatpush.bf16.msrb.mxu0 %v2316_v63  ;;  %v2332_v63 = vld [vmem:[%s3150_s5 + $0x170] sm:$0xff] }
  0x32   : > { %1217 = vmatpush.bf16.msrb.mxu1 %v2324_v3  ;;  %927 = vmatpush.bf16.msrb.mxu3 %v2308_v24 }
  0x34   : > { %782 = vmatpush.bf16.msrb.mxu2 %v2299_v51  ;;  %1103 = vmatpush.bf16.msrb.mxu0 %v2315_v2 }
  0x36   : > { %1218 = vmatpush.bf16.msrb.mxu1 %v2323_v5  ;;  %928 = vmatpush.bf16.msrb.mxu3 %v2307_v32 }
  0x38   : > { %783 = vmatpush.bf16.msrb.mxu2 %v2298_v53  ;;  %1104 = vmatpush.bf16.msrb.mxu0 %v2314_v4  ;;  %v2305_v53 = vld [vmem:[%s3150_s5 + $0x98] sm:$0xff] }
  0x3a   : > { %1219 = vmatpush.bf16.msrb.mxu1 %v2322_v9  ;;  %929 = vmatpush.bf16.msrb.mxu3 %v2306_v45 }
  0x3b   : > { %405 = vmatmul.bf16.gmra.mxu0 %v321_v47  ;;  %415 = vmatmul.bf16.gmra.mxu2 %v323_v48 }
  0x3c   : > { %784 = vmatpush.bf16.msrb.mxu2 %v2297_v56  ;;  %1105 = vmatpush.bf16.msrb.mxu0 %v2313_v6  ;;  %v2303_v6 = vld [vmem:[%s3150_s5 + $0x88] sm:$0xff] }
  0x3e   : > { %1220 = vmatpush.bf16.msrb.mxu1 %v2321_v14  ;;  %930 = vmatpush.bf16.msrb.mxu3 %v2305_v53  ;;  %v2331_v14 = vld [vmem:[%s3150_s5 + $0x168] sm:$0xff] }
  0x40   : > { %785 = vmatpush.bf16.msrb.mxu2 %v2296_v58  ;;  %1106 = vmatpush.bf16.msrb.mxu0 %v2312_v10  ;;  %v2333_v58 = vld [vmem:[%s3150_s5 + $0x178] sm:$0xff] }
  0x42   : > { %1221 = vmatpush.bf16.msrb.mxu1 %v2320_v25 }
  0x44   : > { %786 = vmatpush.bf16.msrb.mxu2 %v2295_v61  ;;  %1107 = vmatpush.bf16.msrb.mxu0 %v2311_v16  ;;  %v472_v61 = vld [vmem:[%s3151_s6 + $0x18] sm:$0xff] }
  0x45   : > { %668 = vperm.xlu1 %2458, %v472_v61   ;;  %v473_v61 = vld [vmem:[%s3151_s6 + $0x20] sm:$0xff] }
  0x46   : > { %1222 = vmatpush.bf16.msrb.mxu1 %v2319_v33  ;;  %673 = vperm.xlu2 %2459, %v473_v61  }
  0x48   : > { %787 = vmatpush.bf16.msrb.mxu2 %v2294_v0  ;;  %1108 = vmatpush.bf16.msrb.mxu0 %v2310_v21  ;;  %v2304_v0 = vld [vmem:[%s3150_s5 + $0x90] sm:$0xff] }
  0x49   : > { %931 = vmatpush.bf16.msrb.mxu3 %v2304_v0  ;;  %v476_v0 = vld [vmem:[%s3151_s6 + $0x38] sm:$0xff] }
  0x4a   : > { %1223 = vmatpush.bf16.msrb.mxu1 %v2318_v46 }
  0x4c   : > { %1346 = vmatpush.bf16.msra.mxu2 %v2333_v58  ;;  %v2327_v58 = vld [vmem:[%s3150_s5 + $0x148] sm:$0xff] }
  0x4d   : > { %932 = vmatpush.bf16.msrb.mxu3 %v2303_v6  ;;  %688 = vperm.xlu1 %2458, %v476_v0  }
  0x50   : > { %1347 = vmatpush.bf16.msra.mxu2 %v2332_v63  ;;  %v2326_v63 = vld [vmem:[%s3150_s5 + $0x140] sm:$0xff] }
  0x54   : > { %1348 = vmatpush.bf16.msra.mxu2 %v2331_v14  ;;  %v2347_v14 = vld [vmem:[%s3150_s5 + $0x1e8] sm:$0xff] }
  0x58   : > { %1349 = vmatpush.bf16.msra.mxu2 %v2330_v19 }
  0xa8   : > { %v401_v7 = vpop.f32.mrf.mxu0 }
  0xa9   : > { %v402_v17 = vadd.f32 %v2652_v11, %v401_v7 }
  0xab   : > { %v421_v26 = vmax.f32 %v402_v17, 0.0 }
  0xae   : > { %v411_v15 = vpop.f32.mrf.mxu2 }
  0xaf   : > { %v412_v30 = vadd.f32 %v2652_v11, %v411_v15 }
  0xb0   : > { %v403_v18 = vpop.f32.mrf.mxu0 }
  0xb1   : > { %v404_v23 = vadd.f32 %v2652_v11, %v403_v18  ;;  %v425_v41 = vmax.f32 %v412_v30, 0.0 }
  0xb3   : > { %v422_v27 = vmax.f32 %v404_v23, 0.0 }
  0xb5   : > { %v2678_v31 = vpack.c.bf16 %v422_v27, %v421_v26 }
  0xb6   : > { %v413_v34 = vpop.f32.mrf.mxu2 }
  0xb7   : > { %2402 = vst [vmem:[#allocation2 + $0x8] sm:$0xff] %v2678_v31   ;;  %v414_v35 = vadd.f32 %v2652_v11, %v413_v34  ;;  %v535_v36 = vshrl.u32 %v2678_v31, 16  ;;  %v538_v37 = vshll.u32 %v2678_v31, 16  ;;  %v2329_v34 = vld [vmem:[%s3150_s5 + $0x158] sm:$0xff] }
  0xb8   : > { %v406_v39 = vpop.f32.mrf.mxu0  ;;  %1350 = vmatpush.bf16.msra.mxu2 %v2329_v34  ;;  %v2355_v34 = vld [vmem:[%s3150_s5 + $0x228] sm:$0xff] }
  0xb9   : > { %v426_v42 = vmax.f32 %v414_v35, 0.0  ;;  %v537_v43 = vrot.slane %v535_v36, 3  ;;  %v540_v44 = vrot.slane %v538_v37, 4  ;;  %v1273_v47 = vrot.slane %v538_v37, 1  ;;  %v475_v35 = vld [vmem:[%s3151_s6 + $0x30] sm:$0xff] }
  0xba   : > { %v407_v56 = vadd.f32 %v2652_v11, %v406_v39  ;;  %683 = vperm.xlu0 %2457, %v475_v35   ;;  %v2344_v35 = vld [vmem:[%s3150_s5 + $0x1d0] sm:$0xff] }
  0xbb   : > { %v2699_v48 = vpack.c.bf16 %v426_v42, %v425_v41  ;;  %v541_v49 = vor.u32 %v540_v44, %v537_v43  ;;  %v2701_v50 = vor.u32 %v1273_v47, %v535_v36  ;;  %v2328_v43 = vld [vmem:[%s3150_s5 + $0x150] sm:$0xff] }
  0xbc   : > { %v423_v2 = vmax.f32 %v407_v56, 0.0  ;;  %1351 = vmatpush.bf16.msra.mxu2 %v2328_v43  ;;  %v2354_v43 = vld [vmem:[%s3150_s5 + $0x220] sm:$0xff] }
  0xbd   : > { %2404 = vst [vmem:[#allocation2 + $0x18] sm:$0xff] %v2699_v48   ;;  %v542_v51 = vsel %vm525_vm0, %v533_v40, %v541_v49  ;;  %v556_v52 = vshll.u32 %v2699_v48, 16  ;;  %v553_v57 = vshrl.u32 %v2699_v48, 16  ;;  %v2341_v40 = vld [vmem:[%s3150_s5 + $0x1b8] sm:$0xff] }
  0xbe   : > { %v416_v54 = vpop.f32.mrf.mxu2  ;;  %v2709_v55 = vld [vmem:[#allocation2 + $0x4] sm:$0xff]   ;;  %630 = vmatmul.bf16.vlgmr.msra.gmra.mxu1 %v542_v51 }
  0xbf   : > { %v1278_v59 = vrot.slane %v556_v52, 1  ;;  %788 = vmatmul.bf16.vlgmr.msrb.gmra.mxu2 %v2709_v55  ;;  %v417_v4 = vadd.f32 %v2652_v11, %v416_v54  ;;  %v555_v8 = vrot.slane %v553_v57, 3  ;;  %v558_v13 = vrot.slane %v556_v52, 4 }
  0xc0   : > { %v408_v60 = vpop.f32.mrf.mxu0  ;;  %v839_v25 = vshrl.u32 %v2709_v55, 16  ;;  %v841_v26 = vshll.u32 %v2709_v55, 16  ;;  %1352 = vmatpush.bf16.msra.mxu2 %v2327_v58  ;;  %v2343_v55 = vld [vmem:[%s3150_s5 + $0x1c8] sm:$0xff]  ;;  %v1850_v58 = vld [vmem:[%s3151_s6 + $0x40] sm:$0xff] }
  0xc1   : > { %v409_v62 = vadd.f32 %v2652_v11, %v408_v60  ;;  %v2727_v1 = vor.u32 %v1278_v59, %v553_v57  ;;  %v427_v15 = vmax.f32 %v417_v4, 0.0  ;;  %v2752_v23 = vor.u32 %v558_v13, %v555_v8  ;;  %v2349_v57 = vld [vmem:[%s3150_s5 + $0x1f8] sm:$0xff]  ;;  %v2340_v60 = vld [vmem:[%s3150_s5 + $0x1b0] sm:$0xff] }
  0xc2   : > { %v1028_v38 = vrot.slane %v839_v25, 3  ;;  %v1029_v39 = vrot.slane %v841_v26, 4  ;;  %1580 = vmatpush.bf16.msra.mxu0 %v2349_v57  ;;  %v2336_v57 = vld [vmem:[%s3150_s5 + $0x190] sm:$0xff] }
  0xc3   : > { %v424_v3 = vmax.f32 %v409_v62, 0.0 }
  0xc4   : > { %v1030_v46 = vor.u32 %v1029_v39, %v1028_v38  ;;  %1353 = vmatpush.bf16.msra.mxu2 %v2326_v63 }
  0xc5   : > { %v2730_v5 = vpack.c.bf16 %v424_v3, %v423_v2  ;;  %v2357_v2 = vld [vmem:[%s3150_s5 + $0x238] sm:$0xff] }
  0xc6   : > { %v418_v7 = vpop.f32.mrf.mxu2  ;;  %1700 = vmatpush.bf16.msra.mxu1 %v2357_v2 }
  0xc7   : > { %2403 = vst [vmem:[#allocation2 + $0x10] sm:$0xff] %v2730_v5   ;;  %v419_v9 = vadd.f32 %v2652_v11, %v418_v7  ;;  %v544_v10 = vshrl.u32 %v2730_v5, 16  ;;  %v547_v12 = vshll.u32 %v2730_v5, 16  ;;  %v2302_v11 = vld [vmem:[%s3150_s5 + $0x80] sm:$0xff] }
  0xc8   : > { %933 = vmatpush.bf16.msrb.mxu3 %v2302_v11 }
  0xc9   : > { %v428_v16 = vmax.f32 %v419_v9, 0.0  ;;  %v546_v17 = vrot.slane %v544_v10, 3  ;;  %v549_v18 = vrot.slane %v547_v12, 4  ;;  %v2748_v20 = vrot.slane %v547_v12, 1 }
  0xcb   : > { %v2750_v21 = vpack.c.bf16 %v428_v16, %v427_v15  ;;  %v550_v22 = vor.u32 %v549_v18, %v546_v17  ;;  %v1277_v24 = vor.u32 %v2748_v20, %v544_v10  ;;  %v474_v15 = vld [vmem:[%s3151_s6 + $0x28] sm:$0xff]  ;;  %v2346_v16 = vld [vmem:[%s3150_s5 + $0x1e0] sm:$0xff]  ;;  %v2393_v18 = vunpack.c.h.b16 %v2699_v48 }
  0xcc   : > { %678 = vperm.xlu2 %2459, %v474_v15   ;;  %v1853_v15 = vld [vmem:[%s3151_s6 + $0x58] sm:$0xff] }
  0xcd   : > { %v2758_v27 = vsel %vm525_vm0, %v541_v49, %v550_v22  ;;  %v2762_v28 = vsel %vm525_vm0, %v550_v22, %v2752_v23  ;;  %v2765_v29 = vunpack.c.l.b16 %v2750_v21  ;;  %v2772_v32 = vsel %vm837_vm1, %v1277_v24, %v1278_v59  ;;  %v2348_v59 = vld [vmem:[%s3150_s5 + $0x1f0] sm:$0xff]  ;;  %v2345_v24 = vld [vmem:[%s3150_s5 + $0x1d8] sm:$0xff] }
  0xce   : > { %v2767_v30 = vld [vmem:[#allocation2 + $0xc] sm:$0xff]   ;;  %635 = vmatmul.bf16.gmra.mxu1 %v2758_v27  ;;  %640 = vmatmul.bf16.vlgmr.msra.gmra.mxu3 %v2762_v28  ;;  %v1282_v52 = vshll.u32 %v2750_v21, 16  ;;  %v1286_v53 = vshrl.u32 %v2750_v21, 16  ;;  %v2802_v56 = vld [vmem:[#allocation2 + $0x14] sm:$0xff]  }
  0xcf   : > { %v524_v33 = vpack.c.b16 %v2765_v29, %v2765_v29  ;;  %793 = vmatmul.bf16.gmra.mxu2 %v2767_v30  ;;  %v846_v36 = vshll.u32 %v2767_v30, 16  ;;  %v850_v37 = vshrl.u32 %v2767_v30, 16  ;;  %1468 = vmatpush.bf16.msra.mxu3 %v2341_v40  ;;  %v854_v6 = vshll.u32 %v2802_v56, 16  ;;  %v2356_v22 = vld [vmem:[%s3150_s5 + $0x230] sm:$0xff] }
  0xd0   : > { %v1408_v3 = vrot.slane %v1286_v53, 3  ;;  %v1409_v4 = vrot.slane %v1282_v52, 4  ;;  %v858_v7 = vshrl.u32 %v2802_v56, 16  ;;  %1581 = vmatpush.bf16.msra.mxu0 %v2348_v59  ;;  %v2864_v11 = vpack.c.b16 %v2765_v29, %v2393_v18  ;;  %1701 = vmatpush.bf16.msra.mxu1 %v2356_v22  ;;  %v1851_v29 = vld [vmem:[%s3151_s6 + $0x48] sm:$0xff] }
  0xd1   : > { %v562_v41 = vshrl.u32 %v524_v33, 16  ;;  %v565_v42 = vshll.u32 %v524_v33, 16  ;;  %v1031_v44 = vrot.slane %v850_v37, 3  ;;  %v1032_v45 = vrot.slane %v846_v36, 4  ;;  %v2338_v33 = vld [vmem:[%s3150_s5 + $0x1a0] sm:$0xff]  ;;  %962 = vperm.xlu0 %2457, %v1851_v29   ;;  %v2351_v59 = vld [vmem:[%s3150_s5 + $0x208] sm:$0xff] }
  0xd2   : > { %v2834_v8 = vor.u32 %v1409_v4, %v1408_v3  ;;  %v1035_v10 = vrot.slane %v858_v7, 3  ;;  %v1036_v12 = vrot.slane %v854_v6, 4  ;;  %v862_v38 = vshll.u32 %v2864_v11, 16 }
  0xd3   : > { %v1033_v47 = vor.u32 %v1032_v45, %v1031_v44  ;;  %v564_v49 = vrot.slane %v562_v41, 3  ;;  %v567_v51 = vrot.slane %v565_v42, 4  ;;  %1469 = vmatpush.bf16.msra.mxu3 %v2340_v60  ;;  %v866_v39 = vshrl.u32 %v2864_v11, 16  ;;  %v2353_v44 = vld [vmem:[%s3150_s5 + $0x218] sm:$0xff] }
  0xd4   : > { %v2846_v13 = vsel %vm525_vm0, %v2752_v23, %v2834_v8  ;;  %1582 = vmatpush.bf16.msra.mxu0 %v2347_v14  ;;  %v1037_v17 = vor.u32 %v1036_v12, %v1035_v10  ;;  %1702 = vmatpush.bf16.msra.mxu1 %v2355_v34  ;;  %v1040_v42 = vrot.slane %v862_v38, 4  ;;  %v856_v63 = vrot.slane %v854_v6, 1  ;;  %v2335_v6 = vld [vmem:[%s3150_s5 + $0x188] sm:$0xff] }
  0xd5   : > { %v1034_v54 = vsel %vm525_vm0, %v1030_v46, %v1033_v47  ;;  %v568_v62 = vor.u32 %v567_v51, %v564_v49  ;;  %v2913_v46 = vunpack.c.h.b16 %v2750_v21  ;;  %957 = vperm.xlu2 %2459, %v1850_v58   ;;  %v1276_v4 = vsel %vm837_vm1, %v2701_v50, %v2748_v20  ;;  %v2334_v50 = vld [vmem:[%s3150_s5 + $0x180] sm:$0xff]  ;;  %v1855_v20 = vld [vmem:[%s3151_s6 + $0x68] sm:$0xff] }
  0xd6   : > { %1109 = vmatmul.bf16.vlgmr.msrb.gmra.mxu0 %v1034_v54  ;;  %v1038_v19 = vsel %vm525_vm0, %v1033_v47, %v1037_v17  ;;  %v2342_v47 = vld [vmem:[%s3150_s5 + $0x1c0] sm:$0xff]  ;;  %v2352_v54 = vld [vmem:[%s3150_s5 + $0x210] sm:$0xff]  ;;  %v860_v12 = vor.u32 %v858_v7, %v856_v63  ;;  %v864_v14 = vrot.slane %v862_v38, 1  ;;  %v1857_v7 = vld [vmem:[%s3151_s6 + $0x78] sm:$0xff] }
  0xd7   : > { %v569_v9 = vsel %vm525_vm0, %v2752_v23, %v568_v62  ;;  %v843_v23 = vrot.slane %v841_v26, 1  ;;  %v848_v26 = vrot.slane %v846_v36, 1  ;;  %v1039_v36 = vrot.slane %v866_v39, 3 }
  0xd8   : > { %1583 = vmatpush.bf16.msra.mxu0 %v2346_v16  ;;  %1703 = vmatpush.bf16.msra.mxu1 %v2354_v43  ;;  %v836_v51 = vpack.c.b16 %v2913_v46, %v2913_v46  ;;  %v868_v16 = vor.u32 %v866_v39, %v864_v14 }
  0xd9   : > { %v844_v40 = vor.u32 %v843_v23, %v839_v25  ;;  %v2337_v25 = vld [vmem:[%s3150_s5 + $0x198] sm:$0xff]  ;;  %v1041_v45 = vor.u32 %v1040_v42, %v1039_v36  ;;  %v852_v60 = vor.u32 %v850_v37, %v848_v26  ;;  %v2350_v37 = vld [vmem:[%s3150_s5 + $0x200] sm:$0xff] }
  0xda   : > { %v870_v61 = vshll.u32 %v836_v51, 16  ;;  %v1043_v62 = vshrl.u32 %v836_v51, 16 }
  0xdb   : > { %v849_v41 = vsel %vm837_vm1, %v844_v40, %v848_v26  ;;  %v1042_v49 = vsel %vm525_vm0, %v1037_v17, %v1041_v45  ;;  %v857_v0 = vsel %vm837_vm1, %v852_v60, %v856_v63  ;;  %v1284_v17 = vrot.slane %v1282_v52, 1  ;;  %v1856_v52 = vld [vmem:[%s3151_s6 + $0x70] sm:$0xff] }
  0xdc   : > { %1584 = vmatpush.bf16.msra.mxu0 %v2345_v24  ;;  %1704 = vmatpush.bf16.msra.mxu1 %v2353_v44  ;;  %v1045_v2 = vrot.slane %v1043_v62, 3  ;;  %v1046_v3 = vrot.slane %v870_v61, 4  ;;  %v872_v18 = vrot.slane %v870_v61, 1 }
  0xdd   : > { %972 = vperm.xlu2 %2459, %v1853_v15  }
  0xde   : > { %645 = vmatmul.bf16.gmra.mxu3 %v569_v9  ;;  %1224 = vmatmul.bf16.vlgmr.msrb.gmra.mxu1 %v2678_v31  ;;  %v2339_v31 = vld [vmem:[%s3150_s5 + $0x1a8] sm:$0xff]  ;;  %v1854_v9 = vld [vmem:[%s3151_s6 + $0x60] sm:$0xff] }
  0xdf   : > { %798 = vmatmul.bf16.gmra.mxu2 %v2802_v56  ;;  %1470 = vmatpush.bf16.msra.mxu3 %v2339_v31  ;;  %v865_v31 = vsel %vm837_vm1, %v860_v12, %v864_v14  ;;  %v654_v14 = vpop.permute.xlu0 %653 }
  0xe0   : > { %1585 = vmatpush.bf16.msra.mxu0 %v2344_v35  ;;  %1705 = vmatpush.bf16.msra.mxu1 %v2352_v54 }
  0xe1   : > { %977 = vperm.xlu0 %2457, %v1854_v9  }
  0xe3   : > { %1471 = vmatpush.bf16.msra.mxu3 %v2338_v33  ;;  %v1288_v33 = vor.u32 %v1286_v53, %v1284_v17 }
  0xe4   : > { %1586 = vmatpush.bf16.msra.mxu0 %v2343_v55  ;;  %1706 = vmatpush.bf16.msra.mxu1 %v2351_v59 }
  0xe5   : > { %987 = vperm.xlu2 %2459, %v1856_v52  }
  0xe6   : > { %1114 = vmatmul.bf16.gmra.mxu0 %v1038_v19  ;;  %v2410_v19 = vld [vmem:[#allocation2 + $0x28] sm:$0xff]  }
  0xe7   : > { %1472 = vmatpush.bf16.msra.mxu3 %v2337_v25  ;;  %v2400_v22 = vunpack.c.l.b16 %v2410_v19  ;;  %v2401_v35 = vunpack.c.h.b16 %v2410_v19 }
  0xe8   : > { %1587 = vmatpush.bf16.msra.mxu0 %v2342_v47  ;;  %1707 = vmatpush.bf16.msra.mxu1 %v2350_v37 }
  0xe9   : > { %992 = vperm.xlu0 %2457, %v1857_v7   ;;  %v1272_v23 = vpack.c.b16 %v2400_v22, %v2400_v22  ;;  %v1530_v34 = vpack.c.b16 %v2400_v22, %v2913_v46  ;;  %v1636_v38 = vpack.c.b16 %v2401_v35, %v2401_v35 }
  0xeb   : > { %1473 = vmatpush.bf16.msra.mxu3 %v2336_v57  ;;  %v1290_v24 = vshll.u32 %v1272_v23, 16  ;;  %v1646_v39 = vshll.u32 %v1636_v38, 16  ;;  %v1642_v40 = vshrl.u32 %v1530_v34, 16 }
  0xed   : > { %v1292_v29 = vrot.slane %v1290_v24, 1  ;;  %v1648_v36 = vrot.slane %v1646_v39, 1  ;;  %v1415_v44 = vrot.slane %v1290_v24, 4 }
  0xee   : > { %934 = vmatmul.bf16.vlgmr.msrb.gmra.mxu3 %v849_v41  ;;  %1229 = vmatmul.bf16.gmra.mxu1 %v2730_v5  ;;  %v1852_v5 = vld [vmem:[%s3151_s6 + $0x50] sm:$0xff] }
  0xef   : > { %803 = vmatmul.bf16.gmra.mxu2 %v2864_v11  ;;  %967 = vperm.xlu1 %2458, %v1852_v5  }
  0xf0   : > { %1474 = vmatpush.bf16.msra.mxu3 %v2335_v6 }
  0xf4   : > { %1475 = vmatpush.bf16.msra.mxu3 %v2334_v50 }
  0xf6   : > { %1119 = vmatmul.bf16.gmra.mxu0 %v1042_v49 }
  0xf7   : > { %982 = vperm.xlu1 %2458, %v1855_v20  }
  0xfe   : > { %939 = vmatmul.bf16.gmra.mxu3 %v857_v0  ;;  %1234 = vmatmul.bf16.gmra.mxu1 %v2699_v48  ;;  %v1047_v48 = vor.u32 %v1046_v3, %v1045_v2 }
  0xff   : > { %1354 = vmatmul.bf16.vlgmr.msra.gmra.mxu2 %v1276_v4 }
 0x100   : > { %v1048_v10 = vsel %vm525_vm0, %v1041_v45, %v1047_v48 }
 0x106   : > { %1124 = vmatmul.bf16.gmra.mxu0 %v1048_v10 }
 0x10e   : > { %944 = vmatmul.bf16.gmra.mxu3 %v865_v31  ;;  %1239 = vmatmul.bf16.gmra.mxu1 %v2750_v21 }
 0x10f   : > { %1359 = vmatmul.bf16.gmra.mxu2 %v2772_v32  ;;  %v873_v32 = vsel %vm837_vm1, %v868_v16, %v872_v18  ;;  %v3049_v18 = vpop.permute.xlu1 %663 }
 0x116   : > { %1588 = vmatmul.bf16.vlgmr.msra.gmra.mxu0 %v2767_v30  ;;  %v1285_v30 = vsel %vm837_vm1, %v2727_v1, %v1284_v17  ;;  %v1293_v1 = vsel %vm837_vm1, %v1288_v33, %v1292_v29 }
 0x117   : > { %v3059_v33 = vpop.permute.xlu1 %668 }
 0x11e   : > { %949 = vmatmul.bf16.gmra.mxu3 %v873_v32  ;;  %1708 = vmatmul.bf16.vlgmr.msra.gmra.mxu1 %v857_v0  ;;  %v659_v32 = vpop.permute.xlu0 %658 }
 0x11f   : > { %1364 = vmatmul.bf16.gmra.mxu2 %v1285_v30  ;;  %v3066_v39 = vpop.permute.xlu1 %688 }
 0x126   : > { %1593 = vmatmul.bf16.gmra.mxu0 %v2802_v56  ;;  %v1638_v56 = vshll.u32 %v1530_v34, 16 }
 0x128   : > { %v1640_v21 = vrot.slane %v1638_v56, 1 }
 0x12a   : > { %v1641_v53 = vsel %vm837_vm1, %v868_v16, %v1640_v21  ;;  %v1644_v41 = vor.u32 %v1642_v40, %v1640_v21 }
 0x12c   : > { %v1649_v43 = vsel %vm837_vm1, %v1644_v41, %v1648_v36  ;;  %v3061_v29 = vpop.permute.xlu0 %683 }
 0x12e   : > { %1476 = vmatmul.bf16.vlgmr.msra.gmra.mxu3 %v2758_v27  ;;  %1713 = vmatmul.bf16.gmra.mxu1 %v865_v31  ;;  %v3039_v31 = vpop.permute.xlu2 %673 }
 0x12f   : > { %1369 = vmatmul.bf16.gmra.mxu2 %v1293_v1 }
 0x136   : > { %1598 = vmatmul.bf16.gmra.mxu0 %v2864_v11  ;;  %v3051_v19 = vpop.permute.xlu2 %678 }
 0x13b   : > { %v2987_v26 = vpop.f32.mrf.mxu1 }
 0x13e   : > { %1481 = vmatmul.bf16.gmra.mxu3 %v2762_v28  ;;  %1718 = vmatmul.bf16.gmra.mxu1 %v1641_v53  ;;  %v1412_v28 = vshrl.u32 %v1272_v23, 16  ;;  %v958_v52 = vpop.permute.xlu2 %957 }
 0x140   : > { %v1414_v5 = vrot.slane %v1412_v28, 3 }
 0x142   : > { %v789_v11 = vpop.f32.mrf.mxu2  ;;  %v1416_v49 = vor.u32 %v1415_v44, %v1414_v5 }
 0x143   : > { %v2991_v27 = vpop.f32.mrf.mxu1  ;;  %v963_v41 = vpop.permute.xlu0 %962 }
 0x144   : > { %v1417_v54 = vsel %vm525_vm0, %v2834_v8, %v1416_v49  ;;  %v692_v28 = vmul.f32 %v659_v32, %v2991_v27 }
 0x146   : > { %1603 = vmatmul.bf16.gmra.mxu0 %v1530_v34  ;;  %v691_v34 = vmul.f32 %v654_v14, %v2987_v26 }
 0x148   : > { %v809_v53 = vadd.f32 %v789_v11, %v691_v34 }
 0x14a   : > { %v791_v45 = vpop.f32.mrf.mxu2 }
 0x14b   : > { %v2993_v42 = vpop.f32.mrf.mxu1  ;;  %v810_v49 = vadd.f32 %v791_v45, %v692_v28 }
 0x14e   : > { %1486 = vmatmul.bf16.gmra.mxu3 %v2846_v13  ;;  %1723 = vmatmul.bf16.gmra.mxu1 %v1649_v43 }
 0x151   : > { %v2997_v55 = vpop.f32.mrf.mxu3 }
 0x152   : > { %v3005_v57 = vpop.f32.mrf.mxu2 }
 0x153   : > { %v2999_v25 = vpop.f32.mrf.mxu1  ;;  %v1110_v46 = vpop.f32.mrf.mxu0 }
 0x154   : > { %v1130_v43 = vmul.f32 %v1110_v46, %v654_v14  ;;  %v693_v46 = vmul.f32 %v3049_v18, %v2993_v42  ;;  %v973_v42 = vpop.permute.xlu2 %972 }
 0x156   : > { %v811_v45 = vadd.f32 %v3005_v57, %v693_v46 }
 0x159   : > { %v3001_v47 = vpop.f32.mrf.mxu3 }
 0x15a   : > { %v3013_v61 = vpop.f32.mrf.mxu2 }
 0x15b   : > { %v1225_v51 = vpop.f32.mrf.mxu1  ;;  %v1112_v13 = vpop.f32.mrf.mxu0 }
 0x15e   : > { %1491 = vmatmul.bf16.gmra.mxu3 %v1417_v54 }
 0x161   : > { %v3007_v58 = vpop.f32.mrf.mxu3  ;;  %v968_v11 = vpop.permute.xlu1 %967 }
 0x162   : > { %v3021_v8 = vpop.f32.mrf.mxu2 }
 0x163   : > { %v3009_v59 = vpop.f32.mrf.mxu1  ;;  %v3015_v62 = vpop.f32.mrf.mxu0 }
 0x164   : > { %v1132_v57 = vmul.f32 %v3015_v62, %v3049_v18 }
 0x169   : > { %v3011_v60 = vpop.f32.mrf.mxu3 }
 0x16a   : > { %v3027_v6 = vpop.f32.mrf.mxu2 }
 0x16b   : > { %v3017_v63 = vpop.f32.mrf.mxu1  ;;  %v3023_v3 = vpop.f32.mrf.mxu0 }
 0x171   : > { %v935_v0 = vpop.f32.mrf.mxu3 }
 0x172   : > { %v3033_v50 = vpop.f32.mrf.mxu2  ;;  %v995_v56 = vmul.f32 %v958_v52, %v935_v0 }
 0x173   : > { %v3019_v2 = vpop.f32.mrf.mxu1  ;;  %v3029_v9 = vpop.f32.mrf.mxu0 }
 0x174   : > { %v1003_v40 = vadd.f32 %v995_v56, %v809_v53 }
 0x176   : > { %v1138_v5 = vadd.f32 %v1130_v43, %v1003_v40 }
 0x178   : > { %v1245_v0 = vadd.f32 %v1225_v51, %v1138_v5 }
 0x179   : > { %v937_v4 = vpop.f32.mrf.mxu3 }
 0x17a   : > { %v3045_v16 = vpop.f32.mrf.mxu2  ;;  %v996_v44 = vmul.f32 %v963_v41, %v937_v4 }
 0x17b   : > { %v3025_v37 = vpop.f32.mrf.mxu1  ;;  %v3035_v20 = vpop.f32.mrf.mxu0  ;;  %3154 = vst [vmem:[#allocation4_spill] sm:$0xff] %v3045_v16  ;;  %v1131_v16 = vmul.f32 %v1112_v13, %v659_v32 }
 0x17c   : > { %v1004_v26 = vadd.f32 %v996_v44, %v810_v49 }
 0x181   : > { %v940_v48 = vpop.f32.mrf.mxu3 }
 0x182   : > { %v1355_v23 = vpop.f32.mrf.mxu2  ;;  %v997_v27 = vmul.f32 %v968_v11, %v940_v48 }
 0x183   : > { %v3031_v10 = vpop.f32.mrf.mxu1  ;;  %v3047_v17 = vpop.f32.mrf.mxu0  ;;  %v1375_v54 = vmul.f32 %v1355_v23, %v958_v52 }
 0x184   : > { %v1005_v51 = vadd.f32 %v997_v27, %v811_v45 }
 0x185   : > { %v1383_v56 = vadd.f32 %v1375_v54, %v1245_v0 }
 0x186   : > { %v1140_v28 = vadd.f32 %v1132_v57, %v1005_v51 }
 0x189   : > { %v3037_v12 = vpop.f32.mrf.mxu3 }
 0x18a   : > { %v1357_v35 = vpop.f32.mrf.mxu2 }
 0x18b   : > { %v3041_v15 = vpop.f32.mrf.mxu1  ;;  %v3057_v24 = vpop.f32.mrf.mxu0  ;;  %v1376_v4 = vmul.f32 %v1357_v35, %v963_v41 }
 0x18c   : > { %3153 = vst [vmem:[#allocation3_spill] sm:$0xff] %v3041_v15 }
 0x18d   : > { %3156 = vst [vmem:[#allocation6_spill] sm:$0xff] %v3057_v24 }
 0x191   : > { %v3043_v7 = vpop.f32.mrf.mxu3 }
 0x192   : > { %v1360_v34 = vpop.f32.mrf.mxu2 }
 0x193   : > { %v3055_v22 = vpop.f32.mrf.mxu1  ;;  %v1589_v38 = vpop.f32.mrf.mxu0  ;;  %v1377_v44 = vmul.f32 %v1360_v34, %v968_v11 }
 0x194   : > { %3155 = vst [vmem:[#allocation5_spill] sm:$0xff] %v3055_v22 }
 0x199   : > { %v3053_v30 = vpop.f32.mrf.mxu3 }
 0x19b   : > { %v1709_v21 = vpop.f32.mrf.mxu1  ;;  %v1591_v24 = vpop.f32.mrf.mxu0 }
 0x19c   : > { %v1729_v23 = vmul.f32 %v1709_v21, %v958_v52  ;;  %v1362_v52 = vpop.f32.mrf.mxu2 }
 0x1a1   : > { %v3063_v1 = vpop.f32.mrf.mxu3 }
 0x1a3   : > { %v1711_v22 = vpop.f32.mrf.mxu1  ;;  %v1594_v35 = vpop.f32.mrf.mxu0 }
 0x1a4   : > { %v1730_v49 = vmul.f32 %v1711_v22, %v963_v41 }
 0x1a9   : > { %v3068_v36 = vpop.f32.mrf.mxu3 }
 0x1aa   : > { %3157 = vst [vmem:[#allocation7_spill] sm:$0xff] %v3068_v36  ;;  %v1139_v36 = vadd.f32 %v1131_v16, %v1004_v26  ;;  %v1247_v26 = vadd.f32 %v3017_v63, %v1140_v28  ;;  %v1365_v63 = vpop.f32.mrf.mxu2  ;;  %v988_v28 = vpop.permute.xlu2 %987 }
 0x1ab   : > { %v1714_v48 = vpop.f32.mrf.mxu1  ;;  %v1596_v34 = vpop.f32.mrf.mxu0 }
 0x1ac   : > { %v1246_v13 = vadd.f32 %v3009_v59, %v1139_v36  ;;  %v998_v59 = vmul.f32 %v973_v42, %v3037_v12  ;;  %v1385_v46 = vadd.f32 %v1377_v44, %v1247_v26 }
 0x1ae   : > { %v1384_v16 = vadd.f32 %v1376_v4, %v1246_v13 }
 0x1b1   : > { %v1477_v15 = vpop.f32.mrf.mxu3 }
 0x1b2   : > { %v1497_v53 = vmul.f32 %v1477_v15, %v654_v14 }
 0x1b3   : > { %v1716_v12 = vpop.f32.mrf.mxu1 }
 0x1b4   : > { %v1505_v40 = vadd.f32 %v1497_v53, %v1383_v56  ;;  %v978_v56 = vpop.permute.xlu0 %977  ;;  %v1133_v53 = vmul.f32 %v3023_v3, %v3059_v33  ;;  %v1731_v3 = vmul.f32 %v1714_v48, %v968_v11 }
 0x1b5   : > { %v1379_v57 = vmul.f32 %v1365_v63, %v978_v56 }
 0x1b6   : > { %v1609_v43 = vadd.f32 %v1589_v38, %v1505_v40  ;;  %v694_v38 = vmul.f32 %v3059_v33, %v2999_v25  ;;  %v1378_v40 = vmul.f32 %v1362_v52, %v973_v42  ;;  %v1732_v52 = vmul.f32 %v1716_v12, %v973_v42 }
 0x1b8   : > { %v1737_v14 = vadd.f32 %v1729_v23, %v1609_v43  ;;  %v812_v5 = vadd.f32 %v3013_v61, %v694_v38  ;;  %v695_v61 = vmul.f32 %v3039_v31, %v2997_v55  ;;  %v983_v43 = vpop.permute.xlu1 %982  ;;  %v1134_v55 = vmul.f32 %v3029_v9, %v3039_v31 }
 0x1b9   : > { %v1479_v15 = vpop.f32.mrf.mxu3  ;;  %v1000_v11 = vmul.f32 %v983_v43, %v3053_v30 }
 0x1ba   : > { %1746 = vst.msk [vmem:[%s3079_s29] sm:$0xff] %vm1745_vm2, %v1737_v14  ;;  %v1498_v21 = vmul.f32 %v1479_v15, %v659_v32  ;;  %v1006_v62 = vadd.f32 %v998_v59, %v812_v5  ;;  %v813_v27 = vadd.f32 %v3021_v8, %v695_v61  ;;  %v696_v8 = vmul.f32 %v3051_v19, %v3001_v47  ;;  %v3158_v61 = vld [vmem:[#allocation7_spill] sm:$0xff] }
 0x1bb   : > { %v1135_v47 = vmul.f32 %v3035_v20, %v3051_v19  ;;  %v1001_v5 = vmul.f32 %v988_v28, %v3063_v1 }
 0x1bc   : > { %v1506_v36 = vadd.f32 %v1498_v21, %v1384_v16  ;;  %v1141_v22 = vadd.f32 %v1133_v53, %v1006_v62  ;;  %v814_v15 = vadd.f32 %v3027_v6, %v696_v8  ;;  %v1367_v16 = vpop.f32.mrf.mxu2  ;;  %v1599_v21 = vpop.f32.mrf.mxu0  ;;  %v697_v6 = vmul.f32 %v3061_v29, %v3007_v58 }
 0x1bd   : > { %v1136_v58 = vmul.f32 %v3047_v17, %v3061_v29  ;;  %v3160_v17 = vld [vmem:[#allocation3_spill] sm:$0xff] }
 0x1be   : > { %v1610_v54 = vadd.f32 %v1591_v24, %v1506_v36  ;;  %v999_v24 = vmul.f32 %v978_v56, %v3043_v7  ;;  %v1248_v23 = vadd.f32 %v3019_v2, %v1141_v22  ;;  %v1719_v2 = vpop.f32.mrf.mxu1 }
 0x1c0   : > { %v1738_v0 = vadd.f32 %v1730_v49, %v1610_v54  ;;  %v1007_v4 = vadd.f32 %v999_v24, %v813_v27  ;;  %v1386_v13 = vadd.f32 %v1378_v40, %v1248_v23  ;;  %v1380_v49 = vmul.f32 %v1367_v16, %v983_v43  ;;  %v3159_v24 = vld [vmem:[#allocation4_spill] sm:$0xff] }
 0x1c1   : > { %v1482_v32 = vpop.f32.mrf.mxu3  ;;  %v1733_v54 = vmul.f32 %v1719_v2, %v978_v56  ;;  %v698_v56 = vmul.f32 %v3066_v39, %v3011_v60 }
 0x1c2   : > { %1747 = vst.msk [vmem:[%s3079_s29 + $0x8] sm:$0xff] %vm1745_vm2, %v1738_v0  ;;  %v1499_v25 = vmul.f32 %v1482_v32, %v3049_v18  ;;  %v1142_v14 = vadd.f32 %v1134_v55, %v1007_v4  ;;  %v993_v32 = vpop.permute.xlu0 %992 }
 0x1c3   : > { %v816_v63 = vadd.f32 %v3159_v24, %v698_v56 }
 0x1c4   : > { %v1507_v41 = vadd.f32 %v1499_v25, %v1385_v46  ;;  %v1249_v38 = vadd.f32 %v3025_v37, %v1142_v14  ;;  %v815_v37 = vadd.f32 %v3033_v50, %v697_v6  ;;  %v1370_v53 = vpop.f32.mrf.mxu2  ;;  %v1601_v46 = vpop.f32.mrf.mxu0 }
 0x1c6   : > { %v1611_v45 = vadd.f32 %v1594_v35, %v1507_v41  ;;  %v1008_v35 = vadd.f32 %v1000_v11, %v814_v15  ;;  %v1387_v30 = vadd.f32 %v1379_v57, %v1249_v38  ;;  %v1721_v26 = vpop.f32.mrf.mxu1  ;;  %v1009_v20 = vadd.f32 %v1001_v5, %v815_v37 }
 0x1c7   : > { %v1381_v41 = vmul.f32 %v1370_v53, %v988_v28 }
 0x1c8   : > { %v1739_v18 = vadd.f32 %v1731_v3, %v1611_v45  ;;  %v1143_v42 = vadd.f32 %v1135_v47, %v1008_v35  ;;  %v1144_v12 = vadd.f32 %v1136_v58, %v1009_v20 }
 0x1c9   : > { %v1484_v51 = vpop.f32.mrf.mxu3 }
 0x1ca   : > { %1748 = vst.msk [vmem:[%s3079_s29 + $0x10] sm:$0xff] %vm1745_vm2, %v1739_v18  ;;  %v1500_v7 = vmul.f32 %v1484_v51, %v3059_v33  ;;  %v1250_v0 = vadd.f32 %v3031_v10, %v1143_v42  ;;  %v1002_v10 = vmul.f32 %v993_v32, %v3158_v61  ;;  %v1251_v3 = vadd.f32 %v3160_v17, %v1144_v12 }
 0x1cc   : > { %v1508_v48 = vadd.f32 %v1500_v7, %v1386_v13  ;;  %v1388_v1 = vadd.f32 %v1380_v49, %v1250_v0  ;;  %v1010_v40 = vadd.f32 %v1002_v10, %v816_v63  ;;  %v1389_v60 = vadd.f32 %v1381_v41, %v1251_v3  ;;  %v1372_v55 = vpop.f32.mrf.mxu2  ;;  %v1604_v13 = vpop.f32.mrf.mxu0 }
 0x1cd   : > { %v1382_v8 = vmul.f32 %v1372_v55, %v993_v32 }
 0x1ce   : > { %v1612_v9 = vadd.f32 %v1596_v34, %v1508_v48  ;;  %v1734_v34 = vmul.f32 %v1721_v26, %v983_v43  ;;  %v1724_v4 = vpop.f32.mrf.mxu1  ;;  %v3162_v48 = vld [vmem:[#allocation5_spill] sm:$0xff] }
 0x1cf   : > { %v1735_v14 = vmul.f32 %v1724_v4, %v988_v28 }
 0x1d0   : > { %v1740_v33 = vadd.f32 %v1732_v52, %v1612_v9 }
 0x1d1   : > { %v1487_v59 = vpop.f32.mrf.mxu3 }
 0x1d2   : > { %1749 = vst.msk [vmem:[%s3079_s29 + $0x18] sm:$0xff] %vm1745_vm2, %v1740_v33  ;;  %v1501_v36 = vmul.f32 %v1487_v59, %v3039_v31 }
 0x1d4   : > { %v1509_v44 = vadd.f32 %v1501_v36, %v1387_v30 }
 0x1d6   : > { %v1613_v62 = vadd.f32 %v1599_v21, %v1509_v44  ;;  %v1726_v9 = vpop.f32.mrf.mxu1 }
 0x1d7   : > { %v1736_v35 = vmul.f32 %v1726_v9, %v993_v32 }
 0x1d8   : > { %v1741_v31 = vadd.f32 %v1733_v54, %v1613_v62 }
 0x1d9   : > { %v1489_v25 = vpop.f32.mrf.mxu3 }
 0x1da   : > { %1750 = vst.msk [vmem:[%s3079_s29 + $0x20] sm:$0xff] %vm1745_vm2, %v1741_v31  ;;  %v1502_v50 = vmul.f32 %v1489_v25, %v3051_v19  ;;  %v3161_v19 = vld [vmem:[#allocation6_spill] sm:$0xff] }
 0x1db   : > { %v1137_v18 = vmul.f32 %v3161_v19, %v3066_v39 }
 0x1dc   : > { %v1510_v22 = vadd.f32 %v1502_v50, %v1388_v1 }
 0x1dd   : > { %v1145_v7 = vadd.f32 %v1137_v18, %v1010_v40 }
 0x1de   : > { %v1614_v27 = vadd.f32 %v1601_v46, %v1510_v22 }
 0x1df   : > { %v1252_v2 = vadd.f32 %v3162_v48, %v1145_v7 }
 0x1e0   : > { %v1742_v45 = vadd.f32 %v1734_v34, %v1614_v27 }
 0x1e1   : > { %v1492_v23 = vpop.f32.mrf.mxu3  ;;  %v1390_v16 = vadd.f32 %v1382_v8, %v1252_v2 }
 0x1e2   : > { %1751 = vst.msk [vmem:[%s3079_s29 + $0x28] sm:$0xff] %vm1745_vm2, %v1742_v45  ;;  %v1503_v51 = vmul.f32 %v1492_v23, %v3061_v29  ;;  %v1606_v29 = vpop.f32.mrf.mxu0 }
 0x1e4   : > { %v1511_v43 = vadd.f32 %v1503_v51, %v1389_v60 }
 0x1e6   : > { %v1615_v11 = vadd.f32 %v1604_v13, %v1511_v43 }
 0x1e8   : > { %v1743_v15 = vadd.f32 %v1735_v14, %v1615_v11 }
 0x1e9   : > { %v1494_v57 = vpop.f32.mrf.mxu3 }
 0x1ea   : > { %1752 = vst.msk [vmem:[%s3079_s29 + $0x30] sm:$0xff] %vm1745_vm2, %v1743_v15  ;;  %v1504_v52 = vmul.f32 %v1494_v57, %v3066_v39 }
 0x1ec   : > { %v1512_v21 = vadd.f32 %v1504_v52, %v1390_v16 }
 0x1ee   : > { %v1616_v38 = vadd.f32 %v1606_v29, %v1512_v21 }
 0x1f0   : > { %v1744_v33 = vadd.f32 %v1736_v35, %v1616_v38 }
 0x1f2   : > { %1753 = vst.msk [vmem:[%s3079_s29 + $0x38] sm:$0xff] %vm1745_vm2, %v1744_v33 }
 0x1f3 PF: > { %s17_s24 = sadd.s32 1, %s2469_s24  }
 0x1f4   : > { %p14_p4 = scmp.ge.s32.totalorder %s17_s24, 4  }
 0x1f6   :  { %16 = sbr.rel (!%p14_p4) target bundleno = 1 (0x1), region = 87 }

// kernel: densenet_forward.15
= control target key start
LH: loop header
LB: loop body
LE: loop exit
PB: predicated region body
PF: predicated region fallthrough
CT: control target
= control target key end

     0   :  { %s423_s6 = inlined_call_operand.vmem [shape: bf16[128,128], index: 6, kind: input, shape index: {}]   ;;  %s424_s0 = inlined_call_operand.vmem [shape: f32[32,128], index: 0, kind: input, shape index: {}]   ;;  %s425_s1 = inlined_call_operand.vmem [shape: f32[32,128], index: 1, kind: input, shape index: {}]   ;;  %s426_s4 = inlined_call_operand.vmem [shape: f32[1,128], index: 4, kind: input, shape index: {}]   ;;  %s427_s5 = inlined_call_operand.vmem [shape: f32[1,128], index: 5, kind: input, shape index: {}]   ;;  %s428_s2 = inlined_call_operand.vmem [shape: f32[32,128], index: 2, kind: input, shape index: {}]   ;;  %s429_s3 = inlined_call_operand.vmem [shape: f32[32,128], index: 3, kind: input, shape index: {}]   ;;  %s430_s7 = inlined_call_operand.vmem [shape: f32[32,128], index: 7, kind: output, shape index: {}]  }
   0x1   :  { %v246_v0 = vld [vmem:[%s423_s6 + $0x38] sm:$0xff]  ;;  %v245_v1 = vld [vmem:[%s423_s6 + $0x30] sm:$0xff]  ;;  %v28_v2 = vld [vmem:[%s424_s0] sm:$0xff] }
   0x2   :  { %180 = vmatpush.bf16.msra.mxu0 %v246_v0  ;;  %247 = vmatpush.bf16.msra.mxu1 %v246_v0  ;;  %v29_v3 = vld [vmem:[%s424_s0 + $0x8] sm:$0xff]  ;;  %v312_v4 = vld [vmem:[%s426_s4] ss:$0 sm:$0xff]  ;;  %v30_v28 = vld [vmem:[%s424_s0 + $0x10] sm:$0xff] }
   0x3   :  { %v317_v5 = vld [vmem:[%s427_s5] ss:$0 sm:$0xff]  ;;  %v51_v7 = vld [vmem:[%s425_s1 + $0x8] sm:$0xff]  ;;  %v35_v11 = vmul.f32 %v312_v4, %v28_v2  ;;  %v36_v12 = vmul.f32 %v312_v4, %v29_v3  ;;  %v31_v29 = vld [vmem:[%s424_s0 + $0x18] sm:$0xff]  ;;  %v37_v42 = vmul.f32 %v312_v4, %v30_v28 }
   0x4   :  { %v50_v6 = vld [vmem:[%s425_s1] sm:$0xff]  ;;  %v71_v9 = vld [vmem:[%s428_s2 + $0x8] sm:$0xff]  ;;  %v55_v16 = vmul.f32 %v312_v4, %v51_v7  ;;  %v52_v34 = vld [vmem:[%s425_s1 + $0x10] sm:$0xff]  ;;  %v38_v43 = vmul.f32 %v312_v4, %v31_v29 }
   0x5   :  { %v70_v8 = vld [vmem:[%s428_s2] sm:$0xff]  ;;  %v244_v10 = vld [vmem:[%s423_s6 + $0x28] sm:$0xff]  ;;  %v54_v13 = vmul.f32 %v312_v4, %v50_v6  ;;  %v75_v18 = vmul.f32 %v312_v4, %v71_v9  ;;  %v42_v20 = vadd.f32 %v317_v5, %v35_v11  ;;  %v43_v21 = vadd.f32 %v317_v5, %v36_v12  ;;  %v53_v35 = vld [vmem:[%s425_s1 + $0x18] sm:$0xff] }
   0x6   :  { %181 = vmatpush.bf16.msra.mxu0 %v245_v1  ;;  %248 = vmatpush.bf16.msra.mxu1 %v245_v1  ;;  %v90_v14 = vld [vmem:[%s429_s3] sm:$0xff]  ;;  %v91_v15 = vld [vmem:[%s429_s3 + $0x8] sm:$0xff]  ;;  %v74_v17 = vmul.f32 %v312_v4, %v70_v8  ;;  %v59_v25 = vadd.f32 %v317_v5, %v55_v16  ;;  %v72_v36 = vld [vmem:[%s428_s2 + $0x10] sm:$0xff]  ;;  %v56_v46 = vmul.f32 %v312_v4, %v52_v34 }
   0x7   :  { %v94_v19 = vmul.f32 %v312_v4, %v90_v14  ;;  %v58_v22 = vadd.f32 %v317_v5, %v54_v13  ;;  %v95_v23 = vmul.f32 %v312_v4, %v91_v15  ;;  %v243_v24 = vld [vmem:[%s423_s6 + $0x20] sm:$0xff]  ;;  %v79_v27 = vadd.f32 %v317_v5, %v75_v18  ;;  %v73_v44 = vld [vmem:[%s428_s2 + $0x18] sm:$0xff]  ;;  %v92_v57 = vld [vmem:[%s429_s3 + $0x10] sm:$0xff] }
   0x8   :  { %v78_v26 = vadd.f32 %v317_v5, %v74_v17  ;;  %v46_v30 = vmax.f32 %v42_v20, 0.0  ;;  %v47_v31 = vmax.f32 %v43_v21, 0.0  ;;  %v63_v37 = vmax.f32 %v59_v25, 0.0  ;;  %v242_v49 = vld [vmem:[%s423_s6 + $0x18] sm:$0xff]  ;;  %v241_v3 = vld [vmem:[%s423_s6 + $0x10] sm:$0xff]  ;;  %v240_v18 = vld [vmem:[%s423_s6 + $0x8] sm:$0xff] }
   0x9   :  { %v62_v32 = vmax.f32 %v58_v22, 0.0  ;;  %v98_v33 = vadd.f32 %v317_v5, %v94_v19  ;;  %v99_v39 = vadd.f32 %v317_v5, %v95_v23  ;;  %v83_v41 = vmax.f32 %v79_v27, 0.0  ;;  %v93_v58 = vld [vmem:[%s429_s3 + $0x18] sm:$0xff] }
   0xa   :  { %182 = vmatpush.bf16.msra.mxu0 %v244_v10  ;;  %249 = vmatpush.bf16.msra.mxu1 %v244_v10  ;;  %v82_v38 = vmax.f32 %v78_v26, 0.0  ;;  %v67_v45 = vadd.f32 %v63_v37, %v47_v31  ;;  %v57_v47 = vmul.f32 %v312_v4, %v53_v35  ;;  %v76_v48 = vmul.f32 %v312_v4, %v72_v36 }
   0xb   :  { %v66_v40 = vadd.f32 %v62_v32, %v46_v30  ;;  %v102_v50 = vmax.f32 %v98_v33, 0.0  ;;  %v44_v51 = vadd.f32 %v317_v5, %v37_v42  ;;  %v45_v52 = vadd.f32 %v317_v5, %v38_v43 }
   0xc   :  { %v103_v53 = vmax.f32 %v99_v39, 0.0  ;;  %v60_v54 = vadd.f32 %v317_v5, %v56_v46  ;;  %v61_v55 = vadd.f32 %v317_v5, %v57_v47  ;;  %v77_v56 = vmul.f32 %v312_v4, %v73_v44 }
   0xd   :  { %v86_v59 = vadd.f32 %v82_v38, %v66_v40  ;;  %v48_v60 = vmax.f32 %v44_v51, 0.0  ;;  %v49_v61 = vmax.f32 %v45_v52, 0.0  ;;  %v80_v62 = vadd.f32 %v317_v5, %v76_v48 }
   0xe   :  { %183 = vmatpush.bf16.msra.mxu0 %v243_v24  ;;  %250 = vmatpush.bf16.msra.mxu1 %v243_v24  ;;  %v87_v63 = vadd.f32 %v83_v41, %v67_v45  ;;  %v64_v0 = vmax.f32 %v60_v54, 0.0  ;;  %v65_v1 = vmax.f32 %v61_v55, 0.0  ;;  %v81_v2 = vadd.f32 %v317_v5, %v77_v56 }
   0xf   :  { %v84_v6 = vmax.f32 %v80_v62, 0.0  ;;  %v96_v7 = vmul.f32 %v312_v4, %v92_v57  ;;  %v97_v8 = vmul.f32 %v312_v4, %v93_v58  ;;  %v106_v14 = vadd.f32 %v102_v50, %v86_v59 }
  0x10   :  { %v68_v9 = vadd.f32 %v64_v0, %v48_v60  ;;  %v69_v10 = vadd.f32 %v65_v1, %v49_v61  ;;  %v85_v11 = vmax.f32 %v81_v2, 0.0  ;;  %v107_v15 = vadd.f32 %v103_v53, %v87_v63 }
  0x11   :  { %v100_v12 = vadd.f32 %v317_v5, %v96_v7  ;;  %v101_v13 = vadd.f32 %v317_v5, %v97_v8  ;;  %v110_v22 = vmul.f32 0.25, %v106_v14  ;;  %v239_v5 = vld [vmem:[%s423_s6] sm:$0xff] }
  0x12   :  { %184 = vmatpush.bf16.msra.mxu0 %v242_v49  ;;  %251 = vmatpush.bf16.msra.mxu1 %v242_v49  ;;  %v88_v16 = vadd.f32 %v84_v6, %v68_v9  ;;  %v89_v17 = vadd.f32 %v85_v11, %v69_v10  ;;  %v111_v23 = vmul.f32 0.25, %v107_v15 }
  0x13   :  { %v104_v19 = vmax.f32 %v100_v12, 0.0  ;;  %v105_v20 = vmax.f32 %v101_v13, 0.0 }
  0x14   :  { %v114_v26 = vpack.c.bf16 %v111_v23, %v110_v22 }
  0x15   :  { %v108_v4 = vadd.f32 %v104_v19, %v88_v16  ;;  %v109_v21 = vadd.f32 %v105_v20, %v89_v17 }
  0x16   :  { %185 = vmatpush.bf16.msra.mxu0 %v241_v3  ;;  %252 = vmatpush.bf16.msra.mxu1 %v241_v3 }
  0x17   :  { %v112_v24 = vmul.f32 0.25, %v108_v4  ;;  %v113_v25 = vmul.f32 0.25, %v109_v21 }
  0x19   :  { %v115_v27 = vpack.c.bf16 %v113_v25, %v112_v24 }
  0x1a   :  { %186 = vmatpush.bf16.msra.mxu0 %v240_v18  ;;  %253 = vmatpush.bf16.msra.mxu1 %v240_v18 }
  0x1e   :  { %187 = vmatpush.bf16.msra.mxu0 %v239_v5  ;;  %254 = vmatpush.bf16.msra.mxu1 %v239_v5 }
  0x21   :  { %188 = vmatmul.bf16.vlgmr.msra.gmra.mxu0 %v114_v26  ;;  %193 = vmatmul.bf16.vlgmr.msra.gmra.mxu1 %v115_v27 }
  0x9e   :  { %v189_v28 = vpop.f32.mrf.mxu0  ;;  %v194_v29 = vpop.f32.mrf.mxu1 }
  0x9f   :  { %199 = vst [vmem:[%s430_s7] sm:$0xff] %v189_v28 }
  0xa0   :  { %201 = vst [vmem:[%s430_s7 + $0x10] sm:$0xff] %v194_v29 }
  0xa6   :  { %v191_v30 = vpop.f32.mrf.mxu0  ;;  %v196_v31 = vpop.f32.mrf.mxu1 }
  0xa7   :  { %200 = vst [vmem:[%s430_s7 + $0x8] sm:$0xff] %v191_v30 }
  0xa8   :  { %202 = vst [vmem:[%s430_s7 + $0x18] sm:$0xff] %v196_v31 }

// kernel: densenet_forward.16
= control target key start
LH: loop header
LB: loop body
LE: loop exit
PB: predicated region body
PF: predicated region fallthrough
CT: control target
= control target key end

     0   :  { %s1922_s24 = smov 0   ;;  %s2213_s0 = inlined_call_operand.vmem [shape: f32[2,16,128], index: 0, kind: input, shape index: {}]   ;;  %s2214_s1 = inlined_call_operand.vmem [shape: f32[1,128], index: 1, kind: input, shape index: {}]   ;;  %s2215_s2 = inlined_call_operand.vmem [shape: f32[1,128], index: 2, kind: input, shape index: {}]   ;;  %s2216_s3 = inlined_call_operand.vmem [shape: bf16[128,128], index: 3, kind: input, shape index: {}]   ;;  %s2217_s4 = inlined_call_operand.vmem [shape: f32[1,128], index: 4, kind: input, shape index: {}]   ;;  %s2218_s5 = inlined_call_operand.vmem [shape: bf16[9,128,8], index: 5, kind: input, shape index: {}]   ;;  %s2219_s6 = inlined_call_operand.vmem [shape: f32[2,16,1], index: 6, kind: input, shape index: {}]   ;;  %s2220_s7 = inlined_call_operand.vmem [shape: f32[2,16,8], index: 7, kind: output, shape index: {}]  }
   0x1 LB: > { %s1307_s25 = sadd.s32 4294967295, %s1879_s24   ;;  %p1311_p0 = scmp.ge.s32.totalorder %s1879_s24, 1  ;;  %s1879_s24 = sphi %s1922_s24, %s17_s24  }
   0x2   : > { %p237_p1 = scmp.lt.s32.totalorder %s1879_s24, 3 }
   0x4   : > { %p238_p2 = pnand %p1311_p0, %p237_p1 }
   0x5   : > { %p269_p3 = scmp.lt.s32.totalorder (!%p238_p2), %s1307_s25, 1 }
   0x6   : > { %241 = sbr.rel (%p238_p2) target bundleno = 374 (0x176), region = 48 }
   0xb   : > { %v1777_v0 = vld [vmem:[%s2216_s3 + $0x38] sm:$0xff]  ;;  %v1776_v1 = vld [vmem:[%s2216_s3 + $0x30] sm:$0xff]  ;;  %s2222_s25 = smov (!%p269_p3, %s1307_s25), 1  ;;  %v1775_v4 = vld [vmem:[%s2216_s3 + $0x28] sm:$0xff]  ;;  %v1881_v44 = vmov 0   ;;  %vm534_vm0 = vcmask 1045504  }
   0xc   : > { %365 = vmatpush.bf16.msra.mxu0 %v1777_v0  ;;  %v1785_v2 = vld [vmem:[%s2218_s5 + $0x38] sm:$0xff]  ;;  %v1784_v5 = vld [vmem:[%s2218_s5 + $0x30] sm:$0xff]  ;;  %s1768_s19 = sshll.u32 %s2222_s25, 4  ;;  %v1774_v9 = vld [vmem:[%s2216_s3 + $0x20] sm:$0xff]  ;;  %383 = vst [vmem:[#allocation2] sm:$0xf] %v1881_v44  ;;  %1868 = vset.pattern.permute.xlu0 %v1881_v44 }
   0xd   : > { %v1793_v3 = vld [vmem:[%s2218_s5 + $0x78] sm:$0xff]  ;;  %489 = vmatpush.bf16.msra.mxu1 %v1785_v2  ;;  %v1792_v7 = vld [vmem:[%s2218_s5 + $0x70] sm:$0xff]  ;;  %v1783_v10 = vld [vmem:[%s2218_s5 + $0x28] sm:$0xff]  ;;  %s273_s30 = scalar_lea.vmem %s2213_s0, %s1768_s19  ;;  %384 = vst [vmem:[#allocation2 + $0x4] sm:$0xf] %v1881_v44  ;;  %1869 = vset.pattern.permute.xlu1 %v1881_v44  ;;  %s278_s23 = scalar_lea.vmem %s2220_s7, %s1768_s19  ;;  %vm1249_vm5 = vcmask 64512  }
   0xe   : > { %v1801_v6 = vld [vmem:[%s2218_s5 + $0xb8] sm:$0xff]  ;;  %587 = vmatpush.bf16.msra.mxu2 %v1793_v3  ;;  %v1800_v8 = vld [vmem:[%s2218_s5 + $0xb0] sm:$0xff]  ;;  %v1791_v11 = vld [vmem:[%s2218_s5 + $0x68] sm:$0xff]  ;;  %386 = vst [vmem:[#allocation2 + $0xc] sm:$0xf] %v1881_v44 }
   0xf   : > { %677 = vmatpush.bf16.msra.mxu3 %v1801_v6  ;;  %v1799_v12 = vld [vmem:[%s2218_s5 + $0xa8] sm:$0xff]  ;;  %v1773_v13 = vld [vmem:[%s2216_s3 + $0x18] sm:$0xff]  ;;  %v1870_v14 = vld [vmem:[%s2214_s1] ss:$0 sm:$0xff]  ;;  %385 = vst [vmem:[#allocation2 + $0x8] sm:$0xf] %v1881_v44 }
  0x10   : > { %366 = vmatpush.bf16.msra.mxu0 %v1776_v1  ;;  %v280_v15 = vld [vmem:[%s273_s30] sm:$0xff]  ;;  %v281_v16 = vld [vmem:[%s273_s30 + $0x8] sm:$0xff]  ;;  %v1772_v22 = vld [vmem:[%s2216_s3 + $0x10] sm:$0xff]  ;;  %vm422_vm1 = vsmask.f32 6400 }
  0x11   : > { %490 = vmatpush.bf16.msra.mxu1 %v1784_v5  ;;  %v1782_v17 = vld [vmem:[%s2218_s5 + $0x20] sm:$0xff]  ;;  %v286_v19 = vmul.f32 %v1870_v14, %v280_v15  ;;  %v287_v20 = vmul.f32 %v1870_v14, %v281_v16  ;;  %v1781_v23 = vld [vmem:[%s2218_s5 + $0x18] sm:$0xff]  ;;  %v1771_v26 = vld [vmem:[%s2216_s3 + $0x8] sm:$0xff]  ;;  %vm620_vm2 = vsmask.f32 5376 }
  0x12   : > { %588 = vmatpush.bf16.msra.mxu2 %v1792_v7  ;;  %v1790_v18 = vld [vmem:[%s2218_s5 + $0x60] sm:$0xff]  ;;  %v1780_v27 = vld [vmem:[%s2218_s5 + $0x10] sm:$0xff]  ;;  %v1809_v31 = vld [vmem:[%s2218_s5 + $0xf8] sm:$0xff]  ;;  %vm722_vm3 = vsmask.f32 4352 }
  0x13   : > { %678 = vmatpush.bf16.msra.mxu3 %v1800_v8  ;;  %v1871_v21 = vld [vmem:[%s2215_s2] ss:$0 sm:$0xff]  ;;  %v1808_v33 = vld [vmem:[%s2218_s5 + $0xf0] sm:$0xff]  ;;  %v1807_v34 = vld [vmem:[%s2218_s5 + $0xe8] sm:$0xff]  ;;  %vm900_vm4 = vsmask.f32 7424 }
  0x14   : > { %367 = vmatpush.bf16.msra.mxu0 %v1775_v4  ;;  %v292_v24 = vadd.f32 %v1871_v21, %v286_v19  ;;  %v293_v25 = vadd.f32 %v1871_v21, %v287_v20  ;;  %v1770_v30 = vld [vmem:[%s2216_s3] sm:$0xff]  ;;  %v1779_v35 = vld [vmem:[%s2218_s5 + $0x8] sm:$0xff]  ;;  %v1789_v36 = vld [vmem:[%s2218_s5 + $0x58] sm:$0xff] }
  0x15   : > { %491 = vmatpush.bf16.msra.mxu1 %v1783_v10  ;;  %v1798_v37 = vld [vmem:[%s2218_s5 + $0xa0] sm:$0xff]  ;;  %v1788_v40 = vld [vmem:[%s2218_s5 + $0x50] sm:$0xff]  ;;  %v1797_v41 = vld [vmem:[%s2218_s5 + $0x98] sm:$0xff] }
  0x16   : > { %589 = vmatpush.bf16.msra.mxu2 %v1791_v11  ;;  %v294_v28 = vmax.f32 %v292_v24, 0.0  ;;  %v295_v29 = vmax.f32 %v293_v25, 0.0  ;;  %v1806_v38 = vld [vmem:[%s2218_s5 + $0xe0] sm:$0xff]  ;;  %v1805_v42 = vld [vmem:[%s2218_s5 + $0xd8] sm:$0xff]  ;;  %v1787_v45 = vld [vmem:[%s2218_s5 + $0x48] sm:$0xff] }
  0x17   : > { %679 = vmatpush.bf16.msra.mxu3 %v1799_v12  ;;  %v1778_v39 = vld [vmem:[%s2218_s5] sm:$0xff]  ;;  %v1817_v43 = vld [vmem:[%s2218_s5 + $0x138] sm:$0xff]  ;;  %v1796_v46 = vld [vmem:[%s2218_s5 + $0x90] sm:$0xff] }
  0x18   : > { %368 = vmatpush.bf16.msra.mxu0 %v1774_v9  ;;  %v296_v32 = vpack.c.bf16 %v295_v29, %v294_v28  ;;  %v1804_v47 = vld [vmem:[%s2218_s5 + $0xd0] sm:$0xff]  ;;  %v1786_v49 = vld [vmem:[%s2218_s5 + $0x40] sm:$0xff]  ;;  %v1795_v50 = vld [vmem:[%s2218_s5 + $0x88] sm:$0xff] }
  0x19   : > { %492 = vmatpush.bf16.msra.mxu1 %v1782_v17  ;;  %v1816_v48 = vld [vmem:[%s2218_s5 + $0x130] sm:$0xff]  ;;  %v1803_v51 = vld [vmem:[%s2218_s5 + $0xc8] sm:$0xff]  ;;  %v1825_v53 = vld [vmem:[%s2218_s5 + $0x178] sm:$0xff] }
  0x1a   : > { %590 = vmatpush.bf16.msra.mxu2 %v1790_v18  ;;  %v1815_v52 = vld [vmem:[%s2218_s5 + $0x128] sm:$0xff]  ;;  %v1794_v54 = vld [vmem:[%s2218_s5 + $0x80] sm:$0xff]  ;;  %v1824_v57 = vld [vmem:[%s2218_s5 + $0x170] sm:$0xff] }
  0x1b   : > { %680 = vmatpush.bf16.msra.mxu3 %v1798_v37  ;;  %v1802_v55 = vld [vmem:[%s2218_s5 + $0xc0] sm:$0xff]  ;;  %v1833_v58 = vld [vmem:[%s2218_s5 + $0x1b8] sm:$0xff]  ;;  %v1823_v61 = vld [vmem:[%s2218_s5 + $0x168] sm:$0xff] }
  0x1c   : > { %369 = vmatpush.bf16.msra.mxu0 %v1773_v13  ;;  %v1814_v56 = vld [vmem:[%s2218_s5 + $0x120] sm:$0xff]  ;;  %v1841_v59 = vld [vmem:[%s2218_s5 + $0x1f8] sm:$0xff]  ;;  %v1832_v62 = vld [vmem:[%s2218_s5 + $0x1b0] sm:$0xff] }
  0x1d   : > { %493 = vmatpush.bf16.msra.mxu1 %v1781_v23  ;;  %v1813_v60 = vld [vmem:[%s2218_s5 + $0x118] sm:$0xff]  ;;  %v1840_v63 = vld [vmem:[%s2218_s5 + $0x1f0] sm:$0xff]  ;;  %v1822_v1 = vld [vmem:[%s2218_s5 + $0x160] sm:$0xff] }
  0x1e   : > { %591 = vmatpush.bf16.msra.mxu2 %v1789_v36  ;;  %v1812_v0 = vld [vmem:[%s2218_s5 + $0x110] sm:$0xff]  ;;  %v1831_v2 = vld [vmem:[%s2218_s5 + $0x1a8] sm:$0xff]  ;;  %v1872_v4 = vld [vmem:[%s2217_s4] ss:$0 sm:$0xff] }
  0x1f   : > { %681 = vmatpush.bf16.msra.mxu3 %v1797_v41  ;;  %v1839_v3 = vld [vmem:[%s2218_s5 + $0x1e8] sm:$0xff]  ;;  %v1821_v6 = vld [vmem:[%s2218_s5 + $0x158] sm:$0xff]  ;;  %v1830_v7 = vld [vmem:[%s2218_s5 + $0x1a0] sm:$0xff] }
  0x20   : > { %370 = vmatpush.bf16.msra.mxu0 %v1772_v22  ;;  %v1811_v5 = vld [vmem:[%s2218_s5 + $0x108] sm:$0xff]  ;;  %v1838_v8 = vld [vmem:[%s2218_s5 + $0x1e0] sm:$0xff]  ;;  %v1820_v12 = vld [vmem:[%s2218_s5 + $0x150] sm:$0xff] }
  0x21   : > { %494 = vmatpush.bf16.msra.mxu1 %v1780_v27  ;;  %v1810_v11 = vld [vmem:[%s2218_s5 + $0x100] sm:$0xff]  ;;  %v1829_v13 = vld [vmem:[%s2218_s5 + $0x198] sm:$0xff]  ;;  %v1819_v16 = vld [vmem:[%s2218_s5 + $0x148] sm:$0xff] }
  0x22   : > { %592 = vmatpush.bf16.msra.mxu2 %v1788_v40  ;;  %v1837_v14 = vld [vmem:[%s2218_s5 + $0x1d8] sm:$0xff]  ;;  %v1828_v17 = vld [vmem:[%s2218_s5 + $0x190] sm:$0xff]  ;;  %v1818_v21 = vld [vmem:[%s2218_s5 + $0x140] sm:$0xff] }
  0x23   : > { %682 = vmatpush.bf16.msra.mxu3 %v1796_v46  ;;  %v1836_v19 = vld [vmem:[%s2218_s5 + $0x1d0] sm:$0xff]  ;;  %v1827_v22 = vld [vmem:[%s2218_s5 + $0x188] sm:$0xff]  ;;  %v1826_v28 = vld [vmem:[%s2218_s5 + $0x180] sm:$0xff] }
  0x24   : > { %371 = vmatpush.bf16.msra.mxu0 %v1771_v26  ;;  %v1835_v24 = vld [vmem:[%s2218_s5 + $0x1c8] sm:$0xff]  ;;  %v393_v26 = vld [vmem:[%s2219_s6] sm:$0xff] }
  0x25   : > { %495 = vmatpush.bf16.msra.mxu1 %v1779_v35  ;;  %505 = vperm.xlu0 %1868, %v393_v26   ;;  %v1834_v29 = vld [vmem:[%s2218_s5 + $0x1c0] sm:$0xff] }
  0x26   : > { %593 = vmatpush.bf16.msra.mxu2 %v1787_v45 }
  0x27   : > { %683 = vmatpush.bf16.msra.mxu3 %v1795_v50 }
  0x28   : > { %372 = vmatpush.bf16.msra.mxu0 %v1770_v30 }
  0x29   : > { %496 = vmatpush.bf16.msra.mxu1 %v1778_v39 }
  0x2a   : > { %594 = vmatpush.bf16.msra.mxu2 %v1786_v49 }
  0x2b   : > { %373 = vmatmul.bf16.vlgmr.msra.gmra.mxu0 %v296_v32  ;;  %684 = vmatpush.bf16.msra.mxu3 %v1794_v54  ;;  %v394_v32 = vld [vmem:[%s2219_s6 + $0x8] sm:$0xff] }
  0x2c   : > { %779 = vmatpush.bf16.msrb.mxu0 %v1809_v31  ;;  %v1348_v31 = vld [vmem:[%s2219_s6 + $0x10] sm:$0xff] }
  0x2d   : > { %864 = vmatpush.bf16.msrb.mxu1 %v1817_v43  ;;  %693 = vperm.xlu1 %1869, %v1348_v31  }
  0x2e   : > { %962 = vmatpush.bf16.msrb.mxu2 %v1825_v53  ;;  %510 = vperm.xlu0 %1868, %v394_v32  }
  0x2f   : > { %1055 = vmatpush.bf16.msrb.mxu3 %v1833_v58 }
  0x30   : > { %780 = vmatpush.bf16.msrb.mxu0 %v1808_v33 }
  0x31   : > { %865 = vmatpush.bf16.msrb.mxu1 %v1816_v48 }
  0x32   : > { %963 = vmatpush.bf16.msrb.mxu2 %v1824_v57 }
  0x33   : > { %1056 = vmatpush.bf16.msrb.mxu3 %v1832_v62 }
  0x34   : > { %781 = vmatpush.bf16.msrb.mxu0 %v1807_v34 }
  0x35   : > { %866 = vmatpush.bf16.msrb.mxu1 %v1815_v52 }
  0x36   : > { %964 = vmatpush.bf16.msrb.mxu2 %v1823_v61 }
  0x37   : > { %1057 = vmatpush.bf16.msrb.mxu3 %v1831_v2 }
  0x38   : > { %782 = vmatpush.bf16.msrb.mxu0 %v1806_v38  ;;  %v1349_v38 = vld [vmem:[%s2219_s6 + $0x18] sm:$0xff] }
  0x39   : > { %867 = vmatpush.bf16.msrb.mxu1 %v1814_v56  ;;  %698 = vperm.xlu1 %1869, %v1349_v38  }
  0x3a   : > { %965 = vmatpush.bf16.msrb.mxu2 %v1822_v1  ;;  %v1849_v1 = vld [vmem:[%s2218_s5 + $0x238] sm:$0xff] }
  0x3b   : > { %1058 = vmatpush.bf16.msrb.mxu3 %v1830_v7  ;;  %v1848_v7 = vld [vmem:[%s2218_s5 + $0x230] sm:$0xff] }
  0x3c   : > { %783 = vmatpush.bf16.msrb.mxu0 %v1805_v42 }
  0x3d   : > { %868 = vmatpush.bf16.msrb.mxu1 %v1813_v60 }
  0x3e   : > { %966 = vmatpush.bf16.msrb.mxu2 %v1821_v6 }
  0x3f   : > { %1059 = vmatpush.bf16.msrb.mxu3 %v1829_v13 }
  0x40   : > { %784 = vmatpush.bf16.msrb.mxu0 %v1804_v47 }
  0x41   : > { %869 = vmatpush.bf16.msrb.mxu1 %v1812_v0 }
  0x42   : > { %967 = vmatpush.bf16.msrb.mxu2 %v1820_v12  ;;  %v1847_v12 = vld [vmem:[%s2218_s5 + $0x228] sm:$0xff] }
  0x43   : > { %1060 = vmatpush.bf16.msrb.mxu3 %v1828_v17 }
  0x44   : > { %785 = vmatpush.bf16.msrb.mxu0 %v1803_v51 }
  0x45   : > { %870 = vmatpush.bf16.msrb.mxu1 %v1811_v5 }
  0x46   : > { %968 = vmatpush.bf16.msrb.mxu2 %v1819_v16 }
  0x47   : > { %1061 = vmatpush.bf16.msrb.mxu3 %v1827_v22 }
  0x48   : > { %786 = vmatpush.bf16.msrb.mxu0 %v1802_v55 }
  0x49   : > { %871 = vmatpush.bf16.msrb.mxu1 %v1810_v11 }
  0x4a   : > { %969 = vmatpush.bf16.msrb.mxu2 %v1818_v21 }
  0x4b   : > { %1062 = vmatpush.bf16.msrb.mxu3 %v1826_v28  ;;  %v1844_v28 = vld [vmem:[%s2218_s5 + $0x210] sm:$0xff] }
  0x4c   : > { %1142 = vmatpush.bf16.msra.mxu0 %v1841_v59 }
  0x50   : > { %1143 = vmatpush.bf16.msra.mxu0 %v1840_v63 }
  0x54   : > { %1144 = vmatpush.bf16.msra.mxu0 %v1839_v3 }
  0x58   : > { %1145 = vmatpush.bf16.msra.mxu0 %v1838_v8 }
  0x5c   : > { %1146 = vmatpush.bf16.msra.mxu0 %v1837_v14 }
  0x60   : > { %1147 = vmatpush.bf16.msra.mxu0 %v1836_v19  ;;  %v1846_v19 = vld [vmem:[%s2218_s5 + $0x220] sm:$0xff] }
  0x64   : > { %1148 = vmatpush.bf16.msra.mxu0 %v1835_v24 }
  0x68   : > { %1149 = vmatpush.bf16.msra.mxu0 %v1834_v29  ;;  %v1843_v29 = vld [vmem:[%s2218_s5 + $0x208] sm:$0xff] }
  0xa8   : > { %v374_v9 = vpop.f32.mrf.mxu0 }
  0xa9   : > { %v375_v10 = vadd.f32 %v1872_v4, %v374_v9 }
  0xab   : > { %v379_v15 = vmax.f32 %v375_v10, 0.0 }
  0xad   : > { %v381_v18 = vpack.c.bf16 %v379_v15, %v379_v15 }
  0xaf   : > { %387 = vst [vmem:[#allocation2 + $0x4] sm:$0xf] %v381_v18 }
  0xb0   : > { %v376_v20 = vpop.f32.mrf.mxu0 }
  0xb1   : > { %v377_v23 = vadd.f32 %v1872_v4, %v376_v20 }
  0xb3   : > { %v380_v25 = vmax.f32 %v377_v23, 0.0 }
  0xb5   : > { %v382_v27 = vpack.c.bf16 %v380_v25, %v380_v25  ;;  %v1845_v25 = vld [vmem:[%s2218_s5 + $0x218] sm:$0xff] }
  0xb6   : > { %v1851_v30 = vld [vmem:[#allocation2] sm:$0xff]  }
  0xb7   : > { %388 = vst [vmem:[#allocation2 + $0x8] sm:$0xf] %v382_v27  ;;  %v424_v34 = vshrl.u32 %v1851_v30, 16  ;;  %v427_v35 = vshll.u32 %v1851_v30, 16  ;;  %v1853_v39 = vunpack.c.h.b16 %v1851_v30  ;;  %v535_v40 = vrot.slane %v1851_v30, 2 }
  0xb9   : > { %v426_v41 = vrot.slane %v424_v34, 1  ;;  %v429_v42 = vrot.slane %v427_v35, 2  ;;  %v621_v46 = vrot.slane %v424_v34, 2  ;;  %v622_v48 = vrot.slane %v427_v35, 3 }
  0xba   : > { %v723_v49 = vrot.slane %v424_v34, 3  ;;  %v724_v50 = vrot.slane %v427_v35, 4  ;;  %v1842_v34 = vld [vmem:[%s2218_s5 + $0x200] sm:$0xff] }
  0xbb   : > { %v430_v59 = vor.u32 %v429_v42, %v426_v41  ;;  %v623_v61 = vor.u32 %v622_v48, %v621_v46  ;;  %v506_v42 = vpop.permute.xlu0 %505 }
  0xbc   : > { %v725_v63 = vor.u32 %v724_v50, %v723_v49 }
  0xbe   : > { %v1858_v33 = vld [vmem:[#allocation2 + $0x8] sm:$0xff]  }
  0xbf   : > { %v1856_v36 = vunpack.c.l.b16 %v1858_v33  ;;  %v1857_v55 = vunpack.c.h.b16 %v1858_v33 }
  0xc1   : > { %v421_v37 = vpack.c.b16 %v1856_v36, %v1856_v36  ;;  %v814_v47 = vpack.c.b16 %v1856_v36, %v1853_v39  ;;  %v899_v4 = vpack.c.b16 %v1857_v55, %v1857_v55 }
  0xc3   : > { %v536_v43 = vrot.slane %v421_v37, 2  ;;  %v432_v44 = vshrl.u32 %v421_v37, 16  ;;  %v435_v45 = vshll.u32 %v421_v37, 16  ;;  %v904_v3 = vshll.u32 %v814_v47, 16 }
  0xc4   : > { %v902_v9 = vshrl.u32 %v814_v47, 16  ;;  %v909_v10 = vshll.u32 %v899_v4, 16  ;;  %v1000_v11 = vshrl.u32 %v899_v4, 16  ;;  %v1090_v23 = vrot.slane %v814_v47, 2 }
  0xc5   : > { %v537_v51 = vsel %vm534_vm0, %v535_v40, %v536_v43  ;;  %v434_v52 = vrot.slane %v432_v44, 1  ;;  %v437_v53 = vrot.slane %v435_v45, 2  ;;  %v624_v54 = vrot.slane %v432_v44, 2 }
  0xc6   : > { %595 = vmatmul.bf16.vlgmr.msra.gmra.mxu2 %v537_v51  ;;  %v625_v56 = vrot.slane %v435_v45, 3  ;;  %v726_v57 = vrot.slane %v432_v44, 3  ;;  %v727_v58 = vrot.slane %v435_v45, 4  ;;  %v906_v8 = vrot.slane %v904_v3, 1  ;;  %v694_v45 = vpop.permute.xlu1 %693  ;;  %v511_v51 = vpop.permute.xlu0 %510 }
  0xc7   : > { %v438_v60 = vor.u32 %v437_v53, %v434_v52  ;;  %v997_v14 = vrot.slane %v902_v9, 1  ;;  %v998_v15 = vrot.slane %v904_v3, 2  ;;  %v1002_v16 = vrot.slane %v1000_v11, 1 }
  0xc8   : > { %v626_v62 = vor.u32 %v625_v56, %v624_v54  ;;  %v728_v0 = vor.u32 %v727_v58, %v726_v57  ;;  %v907_v13 = vor.u32 %v906_v8, %v902_v9  ;;  %v1003_v17 = vrot.slane %v909_v10, 2 }
  0xc9   : > { %v439_v2 = vsel %vm422_vm1, %v430_v59, %v438_v60  ;;  %v911_v18 = vrot.slane %v909_v10, 1  ;;  %v999_v21 = vor.u32 %v998_v15, %v997_v14  ;;  %v1091_v24 = vrot.slane %v899_v4, 2 }
  0xca   : > { %497 = vmatmul.bf16.vlgmr.msra.gmra.mxu1 %v439_v2  ;;  %v627_v5 = vsel %vm620_vm2, %v623_v61, %v626_v62  ;;  %v729_v6 = vsel %vm722_vm3, %v725_v63, %v728_v0  ;;  %v1004_v22 = vor.u32 %v1003_v17, %v1002_v16  ;;  %v1175_v30 = vrot.slane %v902_v9, 2 }
  0xcb   : > { %685 = vmatmul.bf16.vlgmr.msra.gmra.mxu3 %v627_v5  ;;  %787 = vmatmul.bf16.vlgmr.msrb.gmra.mxu0 %v729_v6  ;;  %v912_v20 = vsel %vm900_vm4, %v907_v13, %v911_v18  ;;  %v1092_v27 = vsel %vm534_vm0, %v1090_v23, %v1091_v24  ;;  %v1176_v31 = vrot.slane %v904_v3, 3  ;;  %v1178_v32 = vrot.slane %v1000_v11, 2 }
  0xcc   : > { %1231 = vmatpush.bf16.msra.mxu1 %v1849_v1  ;;  %v1005_v26 = vsel %vm422_vm1, %v999_v21, %v1004_v22  ;;  %v1179_v33 = vrot.slane %v909_v10, 3 }
  0xcd   : > { %v1177_v35 = vor.u32 %v1176_v31, %v1175_v30 }
  0xce   : > { %v1180_v36 = vor.u32 %v1179_v33, %v1178_v32  ;;  %v699_v55 = vpop.permute.xlu1 %698 }
  0xd0   : > { %1232 = vmatpush.bf16.msra.mxu1 %v1848_v7  ;;  %v1181_v37 = vsel %vm620_vm2, %v1177_v35, %v1180_v36 }
  0xd4   : > { %1233 = vmatpush.bf16.msra.mxu1 %v1847_v12 }
  0xd6   : > { %970 = vmatmul.bf16.vlgmr.msrb.gmra.mxu2 %v912_v20 }
  0xd8   : > { %1234 = vmatpush.bf16.msra.mxu1 %v1846_v19 }
  0xda   : > { %872 = vmatmul.bf16.vlgmr.msrb.gmra.mxu1 %v814_v47 }
  0xdb   : > { %1063 = vmatmul.bf16.vlgmr.msrb.gmra.mxu3 %v1005_v26  ;;  %1150 = vmatmul.bf16.vlgmr.msra.gmra.mxu0 %v1092_v27 }
  0xdc   : > { %1235 = vmatpush.bf16.msra.mxu1 %v1845_v25 }
  0xe0   : > { %1236 = vmatpush.bf16.msra.mxu1 %v1844_v28 }
  0xe4   : > { %1237 = vmatpush.bf16.msra.mxu1 %v1843_v29 }
  0xe8   : > { %1238 = vmatpush.bf16.msra.mxu1 %v1842_v34 }
  0xeb   : > { %1239 = vmatmul.bf16.vlgmr.msra.gmra.mxu1 %v1181_v37 }
 0x147   : > { %v498_v38 = vpop.f32.mrf.mxu1 }
 0x148   : > { %v788_v44 = vpop.f32.mrf.mxu0  ;;  %v513_v46 = vmul.f32 %v506_v42, %v498_v38 }
 0x149   : > { %v596_v39 = vpop.f32.mrf.mxu2  ;;  %v793_v56 = vmul.f32 %v788_v44, %v506_v42 }
 0x14a   : > { %v601_v50 = vadd.f32 %v596_v39, %v513_v46 }
 0x14e   : > { %v686_v40 = vpop.f32.mrf.mxu3 }
 0x14f   : > { %v500_v41 = vpop.f32.mrf.mxu1  ;;  %v701_v48 = vmul.f32 %v694_v45, %v686_v40 }
 0x150   : > { %v790_v54 = vpop.f32.mrf.mxu0  ;;  %v514_v57 = vmul.f32 %v511_v51, %v500_v41 }
 0x151   : > { %v598_v43 = vpop.f32.mrf.mxu2  ;;  %v703_v53 = vadd.f32 %v701_v48, %v601_v50  ;;  %v794_v5 = vmul.f32 %v790_v54, %v511_v51 }
 0x152   : > { %v602_v63 = vadd.f32 %v598_v43, %v514_v57 }
 0x153   : > { %v795_v60 = vadd.f32 %v793_v56, %v703_v53 }
 0x156   : > { %v688_v47 = vpop.f32.mrf.mxu3 }
 0x157   : > { %v873_v49 = vpop.f32.mrf.mxu1  ;;  %v702_v59 = vmul.f32 %v699_v55, %v688_v47 }
 0x158   : > { %v878_v0 = vadd.f32 %v873_v49, %v795_v60  ;;  %v1151_v7 = vpop.f32.mrf.mxu0 }
 0x159   : > { %v971_v52 = vpop.f32.mrf.mxu2  ;;  %v704_v2 = vadd.f32 %v702_v59, %v602_v63 }
 0x15a   : > { %v976_v61 = vmul.f32 %v971_v52, %v694_v45 }
 0x15b   : > { %v796_v9 = vadd.f32 %v794_v5, %v704_v2 }
 0x15c   : > { %v978_v3 = vadd.f32 %v976_v61, %v878_v0 }
 0x15e   : > { %v1064_v58 = vpop.f32.mrf.mxu3 }
 0x15f   : > { %v875_v62 = vpop.f32.mrf.mxu1  ;;  %v1069_v1 = vmul.f32 %v1064_v58, %v506_v42 }
 0x160   : > { %v879_v12 = vadd.f32 %v875_v62, %v796_v9  ;;  %v1153_v19 = vpop.f32.mrf.mxu0 }
 0x161   : > { %v973_v4 = vpop.f32.mrf.mxu2  ;;  %v1071_v6 = vadd.f32 %v1069_v1, %v978_v3 }
 0x162   : > { %v977_v10 = vmul.f32 %v973_v4, %v699_v55 }
 0x163   : > { %v1156_v14 = vadd.f32 %v1151_v7, %v1071_v6 }
 0x164   : > { %v979_v16 = vadd.f32 %v977_v10, %v879_v12 }
 0x166   : > { %v1066_v8 = vpop.f32.mrf.mxu3 }
 0x167   : > { %v1070_v13 = vmul.f32 %v1066_v8, %v511_v51 }
 0x168   : > { %v1240_v11 = vpop.f32.mrf.mxu1 }
 0x169   : > { %v1245_v15 = vmul.f32 %v1240_v11, %v694_v45  ;;  %v1072_v18 = vadd.f32 %v1070_v13, %v979_v16 }
 0x16b   : > { %v1247_v17 = vadd.f32 %v1245_v15, %v1156_v14  ;;  %v1157_v21 = vadd.f32 %v1153_v19, %v1072_v18 }
 0x16d   : > { %1250 = vst.msk [vmem:[%s278_s23] sm:$0xff] %vm1249_vm5, %v1247_v17 }
 0x170   : > { %v1242_v20 = vpop.f32.mrf.mxu1 }
 0x171   : > { %v1246_v22 = vmul.f32 %v1242_v20, %v699_v55 }
 0x173   : > { %v1248_v23 = vadd.f32 %v1246_v22, %v1157_v21 }
 0x175   : > { %1251 = vst.msk [vmem:[%s278_s23 + $0x8] sm:$0xff] %vm1249_vm5, %v1248_v23 }
 0x176 PF: > { %s17_s24 = sadd.s32 1, %s1879_s24  }
 0x177   : > { %p14_p4 = scmp.ge.s32.totalorder %s17_s24, 4  }
 0x179   :  { %16 = sbr.rel (!%p14_p4) target bundleno = 1 (0x1), region = 87 }

// kernel: densenet_forward.18
= control target key start
LH: loop header
LB: loop body
LE: loop exit
PB: predicated region body
PF: predicated region fallthrough
CT: control target
= control target key end

     0   :  { %s264_s6 = inlined_call_operand.vmem [shape: bf16[128,128], index: 6, kind: input, shape index: {}]   ;;  %s265_s0 = inlined_call_operand.vmem [shape: f32[8,128], index: 0, kind: input, shape index: {}]   ;;  %s266_s4 = inlined_call_operand.vmem [shape: f32[1,128], index: 4, kind: input, shape index: {}]   ;;  %s267_s1 = inlined_call_operand.vmem [shape: f32[8,128], index: 1, kind: input, shape index: {}]   ;;  %s268_s2 = inlined_call_operand.vmem [shape: f32[8,128], index: 2, kind: input, shape index: {}]   ;;  %s269_s5 = inlined_call_operand.vmem [shape: f32[1,128], index: 5, kind: input, shape index: {}]   ;;  %s270_s3 = inlined_call_operand.vmem [shape: f32[8,128], index: 3, kind: input, shape index: {}]   ;;  %s271_s7 = inlined_call_operand.vmem [shape: f32[8,128], index: 7, kind: output, shape index: {}]  }
   0x1   :  { %v176_v0 = vld [vmem:[%s264_s6 + $0x38] sm:$0xff]  ;;  %v175_v1 = vld [vmem:[%s264_s6 + $0x30] sm:$0xff]  ;;  %v28_v2 = vld [vmem:[%s265_s0] sm:$0xff] }
   0x2   :  { %119 = vmatpush.bf16.msra.mxu0 %v176_v0  ;;  %v177_v3 = vld [vmem:[%s266_s4] ss:$0 sm:$0xff]  ;;  %v174_v10 = vld [vmem:[%s264_s6 + $0x28] sm:$0xff]  ;;  %v172_v22 = vld [vmem:[%s264_s6 + $0x18] sm:$0xff] }
   0x3   :  { %v178_v4 = vld [vmem:[%s269_s5] ss:$0 sm:$0xff]  ;;  %v32_v7 = vmul.f32 %v177_v3, %v28_v2  ;;  %v171_v25 = vld [vmem:[%s264_s6 + $0x10] sm:$0xff]  ;;  %v170_v27 = vld [vmem:[%s264_s6 + $0x8] sm:$0xff] }
   0x4   :  { %v38_v5 = vld [vmem:[%s267_s1] sm:$0xff] }
   0x5   :  { %v43_v6 = vld [vmem:[%s268_s2] sm:$0xff]  ;;  %v39_v8 = vmul.f32 %v177_v3, %v38_v5  ;;  %v36_v12 = vadd.f32 %v178_v4, %v32_v7 }
   0x6   :  { %v44_v9 = vmul.f32 %v177_v3, %v43_v6  ;;  %120 = vmatpush.bf16.msra.mxu0 %v175_v1  ;;  %v48_v11 = vld [vmem:[%s270_s3] sm:$0xff] }
   0x7   :  { %v40_v13 = vadd.f32 %v178_v4, %v39_v8  ;;  %v37_v14 = vmax.f32 %v36_v12, 0.0  ;;  %v49_v17 = vmul.f32 %v177_v3, %v48_v11  ;;  %v173_v18 = vld [vmem:[%s264_s6 + $0x20] sm:$0xff] }
   0x8   :  { %v45_v16 = vadd.f32 %v178_v4, %v44_v9  ;;  %v169_v29 = vld [vmem:[%s264_s6] sm:$0xff] }
   0x9   :  { %v41_v15 = vmax.f32 %v40_v13, 0.0  ;;  %v50_v21 = vadd.f32 %v178_v4, %v49_v17 }
   0xa   :  { %121 = vmatpush.bf16.msra.mxu0 %v174_v10  ;;  %v46_v20 = vmax.f32 %v45_v16, 0.0 }
   0xb   :  { %v42_v19 = vadd.f32 %v41_v15, %v37_v14  ;;  %v51_v24 = vmax.f32 %v50_v21, 0.0 }
   0xd   :  { %v47_v23 = vadd.f32 %v46_v20, %v42_v19 }
   0xe   :  { %122 = vmatpush.bf16.msra.mxu0 %v173_v18 }
   0xf   :  { %v52_v26 = vadd.f32 %v51_v24, %v47_v23 }
  0x11   :  { %v53_v28 = vmul.f32 0.25, %v52_v26 }
  0x12   :  { %123 = vmatpush.bf16.msra.mxu0 %v172_v22 }
  0x13   :  { %v54_v30 = vpack.c.bf16 %v53_v28, %v53_v28 }
  0x16   :  { %124 = vmatpush.bf16.msra.mxu0 %v171_v25 }
  0x1a   :  { %125 = vmatpush.bf16.msra.mxu0 %v170_v27 }
  0x1e   :  { %126 = vmatpush.bf16.msra.mxu0 %v169_v29 }
  0x21   :  { %127 = vmatmul.bf16.vlgmr.msra.gmra.mxu0 %v54_v30 }
  0x9e   :  { %v128_v31 = vpop.f32.mrf.mxu0 }
  0x9f   :  { %132 = vst [vmem:[%s271_s7] sm:$0xff] %v128_v31 }
  0xa6   :  { %v130_v32 = vpop.f32.mrf.mxu0 }

// kernel: densenet_forward.21
= control target key start
LH: loop header
LB: loop body
LE: loop exit
PB: predicated region body
PF: predicated region fallthrough
CT: control target
= control target key end

     0   :  { %vm17_vm0 = vcmask 1043456   ;;  %v221_v1 = vmov 4.0   ;;  %s279_s0 = inlined_call_operand.vmem [shape: f32[2,4,128], index: 0, kind: input, shape index: {}]   ;;  %s280_s1 = inlined_call_operand.vmem [shape: bf16[128,10], index: 1, kind: input, shape index: {}]   ;;  %s281_s2 = inlined_call_operand.vmem [shape: f32[1,10], index: 2, kind: input, shape index: {}]   ;;  %s282_s3 = inlined_call_operand.hbm [shape: f32[2,10], index: 3, kind: output, shape index: {}]  }
   0x1   :  { %v189_v0 = vld [vmem:[%s280_s1 + $0x38] sm:$0xff]  ;;  %193 = vrcp.f32 %v221_v1  ;;  %v188_v2 = vld [vmem:[%s280_s1 + $0x30] sm:$0xff]  ;;  %v15_v3 = vld [vmem:[%s279_s0] sm:$0xf] }
   0x2   :  { %119 = vmatpush.bf16.msra.mxu0 %v189_v0  ;;  %v16_v4 = vld [vmem:[%s279_s0 + $0x4] sm:$0xf]  ;;  %v18_v5 = vsel %vm17_vm0, %v15_v3, 0.0 }
   0x3   :  { %v19_v6 = vrot.slane %v18_v5, 4  ;;  %v25_v7 = vsel %vm17_vm0, %v16_v4, 0.0 }
   0x4   :  { %8 = vsyncpa [#allocation3], 0  ;;  %v26_v8 = vrot.slane %v25_v7, 4  ;;  %v187_v9 = vld [vmem:[%s280_s1 + $0x28] sm:$0xff]  ;;  %v186_v16 = vld [vmem:[%s280_s1 + $0x20] sm:$0xff]  ;;  %vm67_vm2 = vcmask 1041409  }
   0x5   :  { %v20_v10 = vadd.f32 %v19_v6, %v18_v5  ;;  %v185_v23 = vld [vmem:[%s280_s1 + $0x18] sm:$0xff]  ;;  %v184_v30 = vld [vmem:[%s280_s1 + $0x10] sm:$0xff]  ;;  %v183_v33 = vld [vmem:[%s280_s1 + $0x8] sm:$0xff]  ;;  %s222_s6 = smov [#allocation2]   ;;  %s141_s10 = sshll.u32 %s282_s3, 4  ;;  %vm132_vm3 = vcmask 74752   ;;  %s142_s10 = int_to_ptr.hbm [resolvable:$true] %s141_s10 }
   0x6   :  { %120 = vmatpush.bf16.msra.mxu0 %v188_v2  ;;  %v27_v12 = vadd.f32 %v26_v8, %v25_v7  ;;  %v182_v36 = vld [vmem:[%s280_s1] sm:$0xff]  ;;  %s139_s7 = sshll.u32 %s222_s6, 4  ;;  %s140_s7 = int_to_ptr.vmem [resolvable:$true] %s139_s7 }
   0x7   :  { %v194_v11 = vpop.eup %193  ;;  %v21_v13 = vrot.slane %v20_v10, 2  ;;  %v192_v39 = vld [vmem:[%s281_s2] ss:$0 sm:$0xff] }
   0x8   :  { %v33_v14 = vmul.f32 4.0, %v194_v11  ;;  %v28_v15 = vrot.slane %v27_v12, 2  ;;  %vm37_vm1 = vweird.f32 %v194_v11 }
   0x9   :  { %v22_v17 = vadd.f32 %v21_v13, %v20_v10 }
   0xa   :  { %121 = vmatpush.bf16.msra.mxu0 %v187_v9  ;;  %v34_v18 = vsub.f32 1.0, %v33_v14  ;;  %v29_v19 = vadd.f32 %v28_v15, %v27_v12 }
   0xb   :  { %v23_v20 = vrot.slane %v22_v17, 1 }
   0xc   :  { %v35_v21 = vmul.f32 %v194_v11, %v34_v18  ;;  %v30_v22 = vrot.slane %v29_v19, 1 }
   0xd   :  { %v24_v24 = vadd.f32 %v23_v20, %v22_v17 }
   0xe   :  { %122 = vmatpush.bf16.msra.mxu0 %v186_v16  ;;  %v36_v25 = vadd.f32 %v194_v11, %v35_v21  ;;  %v31_v26 = vadd.f32 %v30_v22, %v29_v19 }
  0x10   :  { %v38_v27 = vsel %vm37_vm1, %v194_v11, %v36_v25 }
  0x11   :  { %v39_v28 = vmul.f32 %v38_v27, %v24_v24  ;;  %v40_v29 = vmul.f32 %v38_v27, %v31_v26 }
  0x12   :  { %123 = vmatpush.bf16.msra.mxu0 %v185_v23 }
  0x13   :  { %v41_v31 = vpack.c.bf16 %v39_v28, %v39_v28  ;;  %v42_v32 = vpack.c.bf16 %v40_v29, %v40_v29 }
  0x15   :  { %v65_v34 = vunpack.c.l.b16 %v41_v31  ;;  %v66_v35 = vunpack.c.l.b16 %v42_v32 }
  0x16   :  { %124 = vmatpush.bf16.msra.mxu0 %v184_v30 }
  0x17   :  { %v68_v37 = vsel %vm67_vm2, %v66_v35, %v65_v34 }
  0x18   :  { %v69_v38 = vpack.c.b16 %v68_v37, %v68_v37 }
  0x1a   :  { %125 = vmatpush.bf16.msra.mxu0 %v183_v33 }
  0x1e   :  { %126 = vmatpush.bf16.msra.mxu0 %v182_v36 }
  0x21   :  { %127 = vmatmul.bf16.vlgmr.msra.gmra.mxu0 %v69_v38 }
  0x9e   :  { %v128_v40 = vpop.f32.mrf.mxu0 }
  0x9f   :  { %v129_v41 = vadd.f32 %v192_v39, %v128_v40 }
  0xa1   :  { %133 = vst.msk [vmem:[#allocation2] sm:$0x3] %vm132_vm3, %v129_v41 }
  0xa2   :  { %144 = dma.vmem_to_hbm [thread:$0]  %s140_s7, 32, %s142_s10, [#allocation3]  }
  0xa6   :  { %v130_v42 = vpop.f32.mrf.mxu0 }
  0xa7   :  { %219 = dma.done.wait [#allocation3], 32  }
  0xa8   :  { %220 = vsyncadd [#allocation3], 4294967264 }
  0xa9   :  { %149 = vsyncpa [#allocation3], 1 }

// kernel: densenet_forward.19
= control target key start
LH: loop header
LB: loop body
LE: loop exit
PB: predicated region body
PF: predicated region fallthrough
CT: control target
= control target key end

     0   :  { %s1796_s24 = smov 0   ;;  %s2075_s0 = inlined_call_operand.vmem [shape: f32[2,4,128], index: 0, kind: input, shape index: {}]   ;;  %s2076_s1 = inlined_call_operand.vmem [shape: f32[1,128], index: 1, kind: input, shape index: {}]   ;;  %s2077_s2 = inlined_call_operand.vmem [shape: f32[1,128], index: 2, kind: input, shape index: {}]   ;;  %s2078_s3 = inlined_call_operand.vmem [shape: bf16[128,128], index: 3, kind: input, shape index: {}]   ;;  %s2079_s4 = inlined_call_operand.vmem [shape: f32[1,128], index: 4, kind: input, shape index: {}]   ;;  %s2080_s5 = inlined_call_operand.vmem [shape: bf16[9,128,8], index: 5, kind: input, shape index: {}]   ;;  %s2081_s6 = inlined_call_operand.vmem [shape: f32[2,4,1], index: 6, kind: input, shape index: {}]   ;;  %s2082_s7 = inlined_call_operand.vmem [shape: f32[2,4,8], index: 7, kind: output, shape index: {}]  }
   0x1 LB: > { %s1196_s25 = sadd.s32 4294967295, %s1753_s24   ;;  %p1200_p0 = scmp.ge.s32.totalorder %s1753_s24, 1  ;;  %s1753_s24 = sphi %s1796_s24, %s17_s24  }
   0x2   : > { %p236_p1 = scmp.lt.s32.totalorder %s1753_s24, 3 }
   0x4   : > { %p237_p2 = pnand %p1200_p0, %p236_p1 }
   0x5   : > { %p266_p3 = scmp.lt.s32.totalorder (!%p237_p2), %s1196_s25, 1 }
   0x6   : > { %240 = sbr.rel (%p237_p2) target bundleno = 359 (0x167), region = 48 }
   0xb   : > { %v1661_v0 = vld [vmem:[%s2078_s3 + $0x38] sm:$0xff]  ;;  %v1660_v1 = vld [vmem:[%s2078_s3 + $0x30] sm:$0xff]  ;;  %s2084_s25 = smov (!%p266_p3, %s1196_s25), 1  ;;  %v1659_v4 = vld [vmem:[%s2078_s3 + $0x28] sm:$0xff]  ;;  %v1755_v49 = vmov 0   ;;  %vm1141_vm0 = vcmask 60416  }
   0xc   : > { %356 = vmatpush.bf16.msra.mxu0 %v1661_v0  ;;  %v1669_v2 = vld [vmem:[%s2080_s5 + $0x38] sm:$0xff]  ;;  %v1668_v5 = vld [vmem:[%s2080_s5 + $0x30] sm:$0xff]  ;;  %s1201_s19 = sshll.u32 %s2084_s25, 2  ;;  %v1658_v9 = vld [vmem:[%s2078_s3 + $0x20] sm:$0xff]  ;;  %371 = vst [vmem:[#allocation2] sm:$0xf] %v1755_v49  ;;  %1743 = vset.pattern.permute.xlu0 %v1755_v49 }
   0xd   : > { %v1677_v3 = vld [vmem:[%s2080_s5 + $0x78] sm:$0xff]  ;;  %458 = vmatpush.bf16.msra.mxu1 %v1669_v2  ;;  %v1676_v7 = vld [vmem:[%s2080_s5 + $0x70] sm:$0xff]  ;;  %v1667_v10 = vld [vmem:[%s2080_s5 + $0x28] sm:$0xff]  ;;  %s269_s30 = scalar_lea.vmem %s2075_s0, %s1201_s19  ;;  %372 = vst [vmem:[#allocation2 + $0x4] sm:$0xf] %v1755_v49  ;;  %s273_s18 = scalar_lea.vmem %s2082_s7, %s1201_s19 }
   0xe   : > { %v1685_v6 = vld [vmem:[%s2080_s5 + $0xb8] sm:$0xff]  ;;  %545 = vmatpush.bf16.msra.mxu2 %v1677_v3  ;;  %v1684_v8 = vld [vmem:[%s2080_s5 + $0xb0] sm:$0xff]  ;;  %v1675_v11 = vld [vmem:[%s2080_s5 + $0x68] sm:$0xff] }
   0xf   : > { %628 = vmatpush.bf16.msra.mxu3 %v1685_v6  ;;  %v1683_v12 = vld [vmem:[%s2080_s5 + $0xa8] sm:$0xff]  ;;  %v1744_v13 = vld [vmem:[%s2076_s1] ss:$0 sm:$0xff]  ;;  %v1657_v14 = vld [vmem:[%s2078_s3 + $0x18] sm:$0xff] }
  0x10   : > { %357 = vmatpush.bf16.msra.mxu0 %v1660_v1  ;;  %v275_v15 = vld [vmem:[%s269_s30] sm:$0xf]  ;;  %v1656_v21 = vld [vmem:[%s2078_s3 + $0x10] sm:$0xff]  ;;  %v1665_v22 = vld [vmem:[%s2080_s5 + $0x18] sm:$0xff] }
  0x11   : > { %459 = vmatpush.bf16.msra.mxu1 %v1668_v5  ;;  %v1666_v16 = vld [vmem:[%s2080_s5 + $0x20] sm:$0xff]  ;;  %v280_v19 = vmul.f32 %v1744_v13, %v275_v15  ;;  %v1673_v23 = vld [vmem:[%s2080_s5 + $0x58] sm:$0xff]  ;;  %v1655_v26 = vld [vmem:[%s2078_s3 + $0x8] sm:$0xff] }
  0x12   : > { %546 = vmatpush.bf16.msra.mxu2 %v1676_v7  ;;  %v1674_v17 = vld [vmem:[%s2080_s5 + $0x60] sm:$0xff]  ;;  %v1681_v24 = vld [vmem:[%s2080_s5 + $0x98] sm:$0xff]  ;;  %v1664_v27 = vld [vmem:[%s2080_s5 + $0x10] sm:$0xff] }
  0x13   : > { %629 = vmatpush.bf16.msra.mxu3 %v1684_v8  ;;  %v1682_v18 = vld [vmem:[%s2080_s5 + $0xa0] sm:$0xff]  ;;  %v1672_v28 = vld [vmem:[%s2080_s5 + $0x50] sm:$0xff]  ;;  %v1663_v31 = vld [vmem:[%s2080_s5 + $0x8] sm:$0xff] }
  0x14   : > { %358 = vmatpush.bf16.msra.mxu0 %v1659_v4  ;;  %v1745_v20 = vld [vmem:[%s2077_s2] ss:$0 sm:$0xff]  ;;  %v1693_v32 = vld [vmem:[%s2080_s5 + $0xf8] sm:$0xff]  ;;  %v1692_v35 = vld [vmem:[%s2080_s5 + $0xf0] sm:$0xff] }
  0x15   : > { %460 = vmatpush.bf16.msra.mxu1 %v1667_v10  ;;  %v285_v25 = vadd.f32 %v1745_v20, %v280_v19  ;;  %v1654_v30 = vld [vmem:[%s2078_s3] sm:$0xff]  ;;  %v1701_v36 = vld [vmem:[%s2080_s5 + $0x138] sm:$0xff]  ;;  %v1691_v37 = vld [vmem:[%s2080_s5 + $0xe8] sm:$0xff] }
  0x16   : > { %547 = vmatpush.bf16.msra.mxu2 %v1675_v11  ;;  %v1662_v34 = vld [vmem:[%s2080_s5] sm:$0xff]  ;;  %v1689_v39 = vld [vmem:[%s2080_s5 + $0xd8] sm:$0xff]  ;;  %v1671_v40 = vld [vmem:[%s2080_s5 + $0x48] sm:$0xff] }
  0x17   : > { %630 = vmatpush.bf16.msra.mxu3 %v1683_v12  ;;  %v286_v29 = vmax.f32 %v285_v25, 0.0  ;;  %v1690_v38 = vld [vmem:[%s2080_s5 + $0xe0] sm:$0xff]  ;;  %v1680_v41 = vld [vmem:[%s2080_s5 + $0x90] sm:$0xff]  ;;  %v1679_v45 = vld [vmem:[%s2080_s5 + $0x88] sm:$0xff] }
  0x18   : > { %359 = vmatpush.bf16.msra.mxu0 %v1658_v9  ;;  %v1688_v42 = vld [vmem:[%s2080_s5 + $0xd0] sm:$0xff]  ;;  %v1670_v44 = vld [vmem:[%s2080_s5 + $0x40] sm:$0xff]  ;;  %v1687_v46 = vld [vmem:[%s2080_s5 + $0xc8] sm:$0xff] }
  0x19   : > { %461 = vmatpush.bf16.msra.mxu1 %v1666_v16  ;;  %v287_v33 = vpack.c.bf16 %v286_v29, %v286_v29  ;;  %v1700_v43 = vld [vmem:[%s2080_s5 + $0x130] sm:$0xff]  ;;  %v1699_v47 = vld [vmem:[%s2080_s5 + $0x128] sm:$0xff]  ;;  %v1709_v48 = vld [vmem:[%s2080_s5 + $0x178] sm:$0xff] }
  0x1a   : > { %548 = vmatpush.bf16.msra.mxu2 %v1674_v17  ;;  %v1678_v50 = vld [vmem:[%s2080_s5 + $0x80] sm:$0xff]  ;;  %v1708_v53 = vld [vmem:[%s2080_s5 + $0x170] sm:$0xff]  ;;  %v1717_v54 = vld [vmem:[%s2080_s5 + $0x1b8] sm:$0xff] }
  0x1b   : > { %631 = vmatpush.bf16.msra.mxu3 %v1682_v18  ;;  %v1686_v51 = vld [vmem:[%s2080_s5 + $0xc0] sm:$0xff]  ;;  %v1725_v55 = vld [vmem:[%s2080_s5 + $0x1f8] sm:$0xff]  ;;  %v1707_v57 = vld [vmem:[%s2080_s5 + $0x168] sm:$0xff] }
  0x1c   : > { %360 = vmatpush.bf16.msra.mxu0 %v1657_v14  ;;  %v1698_v52 = vld [vmem:[%s2080_s5 + $0x120] sm:$0xff]  ;;  %v1697_v56 = vld [vmem:[%s2080_s5 + $0x118] sm:$0xff]  ;;  %v1716_v58 = vld [vmem:[%s2080_s5 + $0x1b0] sm:$0xff] }
  0x1d   : > { %462 = vmatpush.bf16.msra.mxu1 %v1665_v22  ;;  %v1724_v59 = vld [vmem:[%s2080_s5 + $0x1f0] sm:$0xff]  ;;  %v1706_v61 = vld [vmem:[%s2080_s5 + $0x160] sm:$0xff]  ;;  %v1715_v62 = vld [vmem:[%s2080_s5 + $0x1a8] sm:$0xff] }
  0x1e   : > { %549 = vmatpush.bf16.msra.mxu2 %v1673_v23  ;;  %v1696_v60 = vld [vmem:[%s2080_s5 + $0x110] sm:$0xff]  ;;  %v1723_v63 = vld [vmem:[%s2080_s5 + $0x1e8] sm:$0xff]  ;;  %v1705_v1 = vld [vmem:[%s2080_s5 + $0x158] sm:$0xff] }
  0x1f   : > { %632 = vmatpush.bf16.msra.mxu3 %v1681_v24  ;;  %v1695_v0 = vld [vmem:[%s2080_s5 + $0x108] sm:$0xff]  ;;  %v1714_v2 = vld [vmem:[%s2080_s5 + $0x1a0] sm:$0xff]  ;;  %v1704_v5 = vld [vmem:[%s2080_s5 + $0x150] sm:$0xff] }
  0x20   : > { %361 = vmatpush.bf16.msra.mxu0 %v1656_v21  ;;  %v1722_v3 = vld [vmem:[%s2080_s5 + $0x1e0] sm:$0xff]  ;;  %v1713_v6 = vld [vmem:[%s2080_s5 + $0x198] sm:$0xff]  ;;  %v1703_v8 = vld [vmem:[%s2080_s5 + $0x148] sm:$0xff] }
  0x21   : > { %463 = vmatpush.bf16.msra.mxu1 %v1664_v27  ;;  %v1694_v4 = vld [vmem:[%s2080_s5 + $0x100] sm:$0xff]  ;;  %v1721_v7 = vld [vmem:[%s2080_s5 + $0x1d8] sm:$0xff]  ;;  %v1712_v9 = vld [vmem:[%s2080_s5 + $0x190] sm:$0xff] }
  0x22   : > { %550 = vmatpush.bf16.msra.mxu2 %v1672_v28  ;;  %v1720_v10 = vld [vmem:[%s2080_s5 + $0x1d0] sm:$0xff]  ;;  %v1746_v11 = vld [vmem:[%s2079_s4] ss:$0 sm:$0xff]  ;;  %v1711_v14 = vld [vmem:[%s2080_s5 + $0x188] sm:$0xff] }
  0x23   : > { %633 = vmatpush.bf16.msra.mxu3 %v1680_v41  ;;  %v377_v12 = vld [vmem:[%s2081_s6] sm:$0xf]  ;;  %v1719_v16 = vld [vmem:[%s2080_s5 + $0x1c8] sm:$0xff]  ;;  %v1235_v24 = vld [vmem:[%s2081_s6 + $0x4] sm:$0xf] }
  0x24   : > { %362 = vmatpush.bf16.msra.mxu0 %v1655_v26  ;;  %v1702_v13 = vld [vmem:[%s2080_s5 + $0x140] sm:$0xff]  ;;  %473 = vperm.xlu0 %1743, %v377_v12   ;;  %v1728_v49 = vld [vmem:[%s2080_s5 + $0x210] sm:$0xff] }
  0x25   : > { %464 = vmatpush.bf16.msra.mxu1 %v1663_v31  ;;  %v1710_v20 = vld [vmem:[%s2080_s5 + $0x180] sm:$0xff] }
  0x26   : > { %551 = vmatpush.bf16.msra.mxu2 %v1671_v40  ;;  %v1718_v21 = vld [vmem:[%s2080_s5 + $0x1c0] sm:$0xff]  ;;  %v1732_v40 = vld [vmem:[%s2080_s5 + $0x230] sm:$0xff] }
  0x27   : > { %634 = vmatpush.bf16.msra.mxu3 %v1679_v45  ;;  %v375_v23 = vld [vmem:[#allocation2] sm:$0xf] }
  0x28   : > { %363 = vmatpush.bf16.msra.mxu0 %v1654_v30  ;;  %v398_v25 = vunpack.c.l.b16 %v375_v23  ;;  %v1730_v45 = vld [vmem:[%s2080_s5 + $0x220] sm:$0xff] }
  0x29   : > { %465 = vmatpush.bf16.msra.mxu1 %v1662_v34 }
  0x2a   : > { %552 = vmatpush.bf16.msra.mxu2 %v1670_v44 }
  0x2b   : > { %364 = vmatmul.bf16.vlgmr.msra.gmra.mxu0 %v287_v33  ;;  %635 = vmatpush.bf16.msra.mxu3 %v1678_v50  ;;  %v1727_v50 = vld [vmem:[%s2080_s5 + $0x208] sm:$0xff] }
  0x2c   : > { %713 = vmatpush.bf16.msrb.mxu0 %v1693_v32  ;;  %643 = vperm.xlu0 %1743, %v1235_v24  }
  0x2d   : > { %793 = vmatpush.bf16.msrb.mxu1 %v1701_v36  ;;  %v1733_v36 = vld [vmem:[%s2080_s5 + $0x238] sm:$0xff] }
  0x2e   : > { %881 = vmatpush.bf16.msrb.mxu2 %v1709_v48 }
  0x2f   : > { %961 = vmatpush.bf16.msrb.mxu3 %v1717_v54 }
  0x30   : > { %714 = vmatpush.bf16.msrb.mxu0 %v1692_v35 }
  0x31   : > { %794 = vmatpush.bf16.msrb.mxu1 %v1700_v43 }
  0x32   : > { %882 = vmatpush.bf16.msrb.mxu2 %v1708_v53 }
  0x33   : > { %962 = vmatpush.bf16.msrb.mxu3 %v1716_v58 }
  0x34   : > { %715 = vmatpush.bf16.msrb.mxu0 %v1691_v37 }
  0x35   : > { %795 = vmatpush.bf16.msrb.mxu1 %v1699_v47  ;;  %v1729_v47 = vld [vmem:[%s2080_s5 + $0x218] sm:$0xff] }
  0x36   : > { %883 = vmatpush.bf16.msrb.mxu2 %v1707_v57 }
  0x37   : > { %963 = vmatpush.bf16.msrb.mxu3 %v1715_v62 }
  0x38   : > { %716 = vmatpush.bf16.msrb.mxu0 %v1690_v38 }
  0x39   : > { %796 = vmatpush.bf16.msrb.mxu1 %v1698_v52 }
  0x3a   : > { %884 = vmatpush.bf16.msrb.mxu2 %v1706_v61 }
  0x3b   : > { %964 = vmatpush.bf16.msrb.mxu3 %v1714_v2 }
  0x3c   : > { %717 = vmatpush.bf16.msrb.mxu0 %v1689_v39 }
  0x3d   : > { %797 = vmatpush.bf16.msrb.mxu1 %v1697_v56 }
  0x3e   : > { %885 = vmatpush.bf16.msrb.mxu2 %v1705_v1 }
  0x3f   : > { %965 = vmatpush.bf16.msrb.mxu3 %v1713_v6 }
  0x40   : > { %718 = vmatpush.bf16.msrb.mxu0 %v1688_v42  ;;  %v1731_v42 = vld [vmem:[%s2080_s5 + $0x228] sm:$0xff] }
  0x41   : > { %798 = vmatpush.bf16.msrb.mxu1 %v1696_v60 }
  0x42   : > { %886 = vmatpush.bf16.msrb.mxu2 %v1704_v5 }
  0x43   : > { %966 = vmatpush.bf16.msrb.mxu3 %v1712_v9 }
  0x44   : > { %719 = vmatpush.bf16.msrb.mxu0 %v1687_v46 }
  0x45   : > { %799 = vmatpush.bf16.msrb.mxu1 %v1695_v0 }
  0x46   : > { %887 = vmatpush.bf16.msrb.mxu2 %v1703_v8 }
  0x47   : > { %967 = vmatpush.bf16.msrb.mxu3 %v1711_v14 }
  0x48   : > { %720 = vmatpush.bf16.msrb.mxu0 %v1686_v51  ;;  %v1726_v51 = vld [vmem:[%s2080_s5 + $0x200] sm:$0xff] }
  0x49   : > { %800 = vmatpush.bf16.msrb.mxu1 %v1694_v4 }
  0x4a   : > { %888 = vmatpush.bf16.msrb.mxu2 %v1702_v13 }
  0x4b   : > { %968 = vmatpush.bf16.msrb.mxu3 %v1710_v20 }
  0x4c   : > { %1043 = vmatpush.bf16.msra.mxu0 %v1725_v55 }
  0x50   : > { %1044 = vmatpush.bf16.msra.mxu0 %v1724_v59 }
  0x54   : > { %1045 = vmatpush.bf16.msra.mxu0 %v1723_v63 }
  0x58   : > { %1046 = vmatpush.bf16.msra.mxu0 %v1722_v3 }
  0x5c   : > { %1047 = vmatpush.bf16.msra.mxu0 %v1721_v7 }
  0x60   : > { %1048 = vmatpush.bf16.msra.mxu0 %v1720_v10 }
  0x64   : > { %1049 = vmatpush.bf16.msra.mxu0 %v1719_v16 }
  0x68   : > { %1050 = vmatpush.bf16.msra.mxu0 %v1718_v21 }
  0x96   : > { %v474_v57 = vpop.permute.xlu0 %473 }
  0x9e   : > { %v644_v63 = vpop.permute.xlu0 %643 }
  0xa8   : > { %v365_v15 = vpop.f32.mrf.mxu0 }
  0xa9   : > { %v366_v17 = vadd.f32 %v1746_v11, %v365_v15 }
  0xab   : > { %v369_v18 = vmax.f32 %v366_v17, 0.0 }
  0xad   : > { %v370_v19 = vpack.c.bf16 %v369_v18, %v369_v18 }
  0xaf   : > { %374 = vst [vmem:[#allocation2 + $0x4] sm:$0x3] %v370_v19 }
  0xb0   : > { %v367_v22 = vpop.f32.mrf.mxu0 }
  0xb6   : > { %v376_v26 = vld [vmem:[#allocation2 + $0x4] sm:$0xf] }
  0xb7   : > { %v399_v27 = vunpack.c.l.b16 %v376_v26 }
  0xb9   : > { %v400_v28 = vpack.c.b16 %v399_v27, %v398_v25  ;;  %v824_v37 = vpack.c.b16 %v399_v27, %v399_v27 }
  0xbb   : > { %v495_v29 = vrot.slane %v400_v28, 3  ;;  %v402_v30 = vshrl.u32 %v400_v28, 16  ;;  %v405_v31 = vshll.u32 %v400_v28, 16  ;;  %v828_v41 = vshll.u32 %v824_v37, 16 }
  0xbc   : > { %v826_v44 = vshrl.u32 %v824_v37, 16  ;;  %v993_v48 = vrot.slane %v824_v37, 1 }
  0xbd   : > { %553 = vmatmul.bf16.vlgmr.msra.gmra.mxu2 %v495_v29  ;;  %v404_v32 = vrot.slane %v402_v30, 2  ;;  %v407_v33 = vrot.slane %v405_v31, 3  ;;  %v576_v34 = vrot.slane %v402_v30, 3  ;;  %v577_v35 = vrot.slane %v405_v31, 4 }
  0xbe   : > { %v830_v43 = vrot.slane %v828_v41, 1  ;;  %v1074_v52 = vrot.slane %v826_v44, 1  ;;  %v1075_v53 = vrot.slane %v828_v41, 2 }
  0xbf   : > { %v408_v38 = vor.u32 %v407_v33, %v404_v32  ;;  %v578_v39 = vor.u32 %v577_v35, %v576_v34 }
  0xc0   : > { %v831_v46 = vor.u32 %v830_v43, %v826_v44  ;;  %v1076_v54 = vor.u32 %v1075_v53, %v1074_v52 }
  0xc1   : > { %466 = vmatmul.bf16.vlgmr.msra.gmra.mxu1 %v408_v38  ;;  %636 = vmatmul.bf16.vlgmr.msra.gmra.mxu3 %v578_v39 }
  0xc2   : > { %721 = vmatmul.bf16.vlgmr.msrb.gmra.mxu0 %v578_v39  ;;  %1126 = vmatpush.bf16.msra.mxu1 %v1733_v36 }
  0xc6   : > { %1127 = vmatpush.bf16.msra.mxu1 %v1732_v40 }
  0xca   : > { %1128 = vmatpush.bf16.msra.mxu1 %v1731_v42 }
  0xcd   : > { %889 = vmatmul.bf16.vlgmr.msrb.gmra.mxu2 %v831_v46 }
  0xce   : > { %1129 = vmatpush.bf16.msra.mxu1 %v1730_v45 }
  0xd1   : > { %801 = vmatmul.bf16.vlgmr.msrb.gmra.mxu1 %v376_v26  ;;  %969 = vmatmul.bf16.vlgmr.msrb.gmra.mxu3 %v831_v46 }
  0xd2   : > { %1051 = vmatmul.bf16.vlgmr.msra.gmra.mxu0 %v993_v48  ;;  %1130 = vmatpush.bf16.msra.mxu1 %v1729_v47 }
  0xd6   : > { %1131 = vmatpush.bf16.msra.mxu1 %v1728_v49 }
  0xda   : > { %1132 = vmatpush.bf16.msra.mxu1 %v1727_v50 }
  0xde   : > { %1133 = vmatpush.bf16.msra.mxu1 %v1726_v51 }
  0xe1   : > { %1134 = vmatmul.bf16.vlgmr.msra.gmra.mxu1 %v1076_v54 }
 0x13e   : > { %v467_v55 = vpop.f32.mrf.mxu1 }
 0x13f   : > { %v722_v56 = vpop.f32.mrf.mxu0  ;;  %v476_v0 = vmul.f32 %v474_v57, %v467_v55 }
 0x140   : > { %v554_v58 = vpop.f32.mrf.mxu2  ;;  %v726_v8 = vmul.f32 %v722_v56, %v474_v57 }
 0x141   : > { %v558_v4 = vadd.f32 %v554_v58, %v476_v0 }
 0x144   : > { %v637_v59 = vpop.f32.mrf.mxu3 }
 0x145   : > { %v646_v2 = vmul.f32 %v644_v63, %v637_v59 }
 0x146   : > { %v469_v60 = vpop.f32.mrf.mxu1 }
 0x147   : > { %v724_v61 = vpop.f32.mrf.mxu0  ;;  %v647_v7 = vadd.f32 %v646_v2, %v558_v4 }
 0x148   : > { %v556_v62 = vpop.f32.mrf.mxu2 }
 0x149   : > { %v727_v10 = vadd.f32 %v726_v8, %v647_v7 }
 0x14c   : > { %v639_v1 = vpop.f32.mrf.mxu3 }
 0x14e   : > { %v802_v3 = vpop.f32.mrf.mxu1 }
 0x14f   : > { %v1052_v5 = vpop.f32.mrf.mxu0  ;;  %v806_v13 = vadd.f32 %v802_v3, %v727_v10 }
 0x150   : > { %v890_v6 = vpop.f32.mrf.mxu2 }
 0x151   : > { %v894_v11 = vmul.f32 %v890_v6, %v644_v63 }
 0x153   : > { %v895_v17 = vadd.f32 %v894_v11, %v806_v13 }
 0x154   : > { %v970_v9 = vpop.f32.mrf.mxu3 }
 0x155   : > { %v974_v14 = vmul.f32 %v970_v9, %v474_v57 }
 0x156   : > { %v804_v12 = vpop.f32.mrf.mxu1 }
 0x157   : > { %v1054_v15 = vpop.f32.mrf.mxu0  ;;  %v975_v18 = vadd.f32 %v974_v14, %v895_v17 }
 0x158   : > { %v892_v16 = vpop.f32.mrf.mxu2 }
 0x159   : > { %v1056_v21 = vadd.f32 %v1052_v5, %v975_v18 }
 0x15c   : > { %v972_v19 = vpop.f32.mrf.mxu3 }
 0x15e   : > { %v1135_v20 = vpop.f32.mrf.mxu1 }
 0x15f   : > { %v1139_v22 = vmul.f32 %v1135_v20, %v644_v63 }
 0x161   : > { %v1140_v23 = vadd.f32 %v1139_v22, %v1056_v21 }
 0x163   : > { %1142 = vst.msk [vmem:[%s273_s18] sm:$0xf] %vm1141_vm0, %v1140_v23 }
 0x166   : > { %v1137_v24 = vpop.f32.mrf.mxu1 }
 0x167 PF: > { %s17_s24 = sadd.s32 1, %s1753_s24  }
 0x168   : > { %p14_p4 = scmp.ge.s32.totalorder %s17_s24, 4  }
 0x16a   :  { %16 = sbr.rel (!%p14_p4) target bundleno = 1 (0x1), region = 87 }

</bundles_post_ra>
